<compile_context>
chip_gen: v6e
topology: v6e:2x2x1
jax: 0.10.0
libtpu: 0.0.40
codegen_flags: <defaults>
</compile_context>

<pallas_src>
import functools
import math

import jax
import jax.numpy as jnp
from jax.experimental import pallas as pl
from jax.experimental.pallas import tpu as pltpu

_LANE = 128


def _round_up(n, m):
    return (n + m - 1) // m * m


# -----------------------------------------------------------------------------
# Pallas kernel: 3x3 'same' conv on one row tile of one batch element.
# -----------------------------------------------------------------------------
def _conv3x3_kernel(x_ref, w_ref, b_ref, o_ref, xpad_ref, *,
                    H, W, TH, apply_relu):
    # x_ref   : (1, H, W, Cin_p)    bf16, full plane of one batch element
    # w_ref   : (9*Cin_p, Cout_p)   bf16, rows ordered (dy, dx, cin)
    # b_ref   : (1, Cout_p)         f32
    # o_ref   : (1, TH, W, Cout_p)  rows [t*TH, t*TH+TH) of the output plane
    # xpad_ref: (H+2, W+2, Cin_p)   f32 scratch, zero-padded input plane
    t = pl.program_id(1)
    cin_p = xpad_ref.shape[-1]
    cout_p = o_ref.shape[-1]

    # Build the zero-padded plane once per batch element and reuse it for all
    # row tiles of that batch element (the t axis is "arbitrary" => sequential).
    @pl.when(t == 0)
    def _():
        xpad_ref[...] = jnp.zeros_like(xpad_ref)
        xpad_ref[1:H + 1, 1:W + 1, :] = x_ref[0].astype(xpad_ref.dtype)

    # Rows [t*TH - 1, t*TH + TH + 1) of the virtually padded input, i.e.
    # rows [t*TH, t*TH + TH + 2) of xpad -- always in bounds, no edge masking.
    row0 = pl.multiple_of(t * TH, TH)
    slab = xpad_ref[pl.ds(row0, TH + 2)]               # (TH+2, W+2, Cin_p)

    # Three dx-shifted views, computed once and reused for all dy taps.
    x_dx = [slab[:, dx:dx + W, :] for dx in range(3)]  # each (TH+2, W, Cin_p)

    # im2col patch matrix (TH*W, 9*Cin_p); column blocks ordered (dy, dx)
    # to match the (3, 3, Cin_p, Cout_p).reshape(9*Cin_p, Cout_p) weights.
    parts = [x_dx[dx][dy:dy + TH].reshape(TH * W, cin_p)
             for dy in range(3) for dx in range(3)]
    patches = jnp.concatenate(parts, axis=-1).astype(jnp.bfloat16)

    # One deep-K matmul on the MXU, f32 accumulation.
    acc = jnp.dot(patches, w_ref[...], preferred_element_type=jnp.float32)
    acc = acc + b_ref[0]
    if apply_relu:
        acc = jnp.maximum(acc, 0.0)
    o_ref[...] = acc.reshape(1, TH, W, cout_p).astype(o_ref.dtype)


def _conv3x3_lane_dense(x, w2d, b2, *, apply_relu, out_dtype):
    """3x3 'same' conv. x: (B,H,W,Cin_p) bf16 with Cin_p % 128 == 0,
    w2d: (9*Cin_p, Cout_p) bf16, b2: (1, Cout_p) f32."""
    B, H, W, cin_p = x.shape
    k9, cout_p = w2d.shape
    assert k9 == 9 * cin_p and cin_p % _LANE == 0 and cout_p % _LANE == 0

    # Row tile (with an in-kernel 2-row halo).  8 rows keeps per-step VMEM
    # bounded at production sizes while still giving >=128 matmul rows for
    # typical W; fall back to the full plane when H is not a multiple of 8.
    TH = 8 if (H % 8 == 0 and H > 8) else H
    n_rt = H // TH

    kernel = functools.partial(_conv3x3_kernel, H=H, W=W, TH=TH,
                               apply_relu=apply_relu)
    return pl.pallas_call(
        kernel,
        out_shape=jax.ShapeDtypeStruct((B, H, W, cout_p), out_dtype),
        grid_spec=pltpu.PrefetchScalarGridSpec(
            num_scalar_prefetch=0,
            grid=(B, n_rt),
            in_specs=[
                # Full plane per batch element; block index ignores the row
                # tile => DMA'd once per batch element.
                pl.BlockSpec((1, H, W, cin_p), lambda b, t: (b, 0, 0, 0)),
                pl.BlockSpec((k9, cout_p), lambda b, t: (0, 0)),
                pl.BlockSpec((1, cout_p), lambda b, t: (0, 0)),
            ],
            out_specs=pl.BlockSpec((1, TH, W, cout_p),
                                   lambda b, t: (b, t, 0, 0)),
            scratch_shapes=[pltpu.VMEM((H + 2, W + 2, cin_p), jnp.float32)],
        ),
        compiler_params=pltpu.CompilerParams(
            dimension_semantics=("parallel", "arbitrary"),
            vmem_limit_bytes=48 * 1024 * 1024,
        ),
    )(x, w2d, b2)


# -----------------------------------------------------------------------------
# Parameter prep / init / forward
# -----------------------------------------------------------------------------
def _prep_layer(w_hwio, bias):
    """Zero-pad channels to lane multiples; reshape weights for im2col matmul."""
    _, _, cin, cout = w_hwio.shape
    cin_p, cout_p = _round_up(cin, _LANE), _round_up(cout, _LANE)
    w = jnp.pad(w_hwio, ((0, 0), (0, 0), (0, cin_p - cin), (0, cout_p - cout)))
    w2d = w.reshape(9 * cin_p, cout_p).astype(jnp.bfloat16)
    b2 = jnp.pad(bias, (0, cout_p - cout)).reshape(1, cout_p).astype(jnp.float32)
    return w2d, b2


def init_regression_params(key, in_features, num_features=256, num_anchors=9):
    """Deterministic init mimicking nn.Conv2d default (uniform +/- 1/sqrt(fan_in))."""
    dims = [
        (in_features, num_features),
        (num_features, num_features),
        (num_features, num_features),
        (num_features, num_features),
        (num_features, num_anchors * 4),
    ]
    params = []
    for cin, cout in dims:
        key, kw, kb = jax.random.split(key, 3)
        bound = 1.0 / math.sqrt(cin * 9)
        w = jax.random.uniform(kw, (3, 3, cin, cout), jnp.float32, -bound, bound)
        b = jax.random.uniform(kb, (cout,), jnp.float32, -bound, bound)
        params.append((w, b))
    return params


def regression_model_forward(x_nchw, params):
    """Forward pass matching RegressionModel.forward.

    x_nchw : (B, Cin, H, W) float32 (PyTorch layout)
    returns: (B, H*W*num_anchors, 4) float32
    """
    B, cin, H, W = x_nchw.shape
    cout_last = params[-1][1].shape[0]          # num_anchors * 4

    # NCHW -> NHWC, lane-pad channels, bf16 activations between layers.
    x = jnp.transpose(x_nchw, (0, 2, 3, 1))
    x = jnp.pad(x, ((0, 0), (0, 0), (0, 0), (0, _round_up(cin, _LANE) - cin)))
    x = x.astype(jnp.bfloat16)

    for i, (w, b) in enumerate(params):
        last = (i == len(params) - 1)
        w2d, b2 = _prep_layer(w, b)
        assert w2d.shape[0] == 9 * x.shape[-1]
        x = _conv3x3_lane_dense(
            x, w2d, b2, apply_relu=not last,
            out_dtype=jnp.float32 if last else jnp.bfloat16)

    # x is NHWC (== PyTorch permute(0,2,3,1)); drop channel padding, flatten.
    return x[..., :cout_last].reshape(B, -1, 4)


# -----------------------------------------------------------------------------
# Pure-JAX f32 reference (for sanity checking the kernel path)
# -----------------------------------------------------------------------------
def regression_model_reference(x_nchw, params):
    x = jnp.transpose(x_nchw, (0, 2, 3, 1))
    for i, (w, b) in enumerate(params):
        y = jax.lax.conv_general_dilated(
            x, w, window_strides=(1, 1), padding="SAME",
            dimension_numbers=("NHWC", "HWIO", "NHWC"))
        y = y + b
        if i != len(params) - 1:
            y = jnp.maximum(y, 0.0)
        x = y
    return x.reshape(x.shape[0], -1, 4)


if __name__ == "__main__":
    key = jax.random.PRNGKey(0)
    k_x, k_p = jax.random.split(key)

    # Small shapes consistent with the module: in_features=4, num_features=32,
    # num_anchors=9, batch=2, spatial=16x16 (2 row tiles per plane).
    B, Cin, H, W = 2, 4, 16, 16
    num_features, num_anchors = 32, 9

    x = jax.random.normal(k_x, (B, Cin, H, W), jnp.float32)
    params = init_regression_params(k_p, Cin, num_features, num_anchors)

    fwd = jax.jit(regression_model_forward)
    out = jax.block_until_ready(fwd(x, params))

    ref = regression_model_reference(x, params)
    assert out.shape == (B, H * W * num_anchors, 4), out.shape
    # bf16 operands / activations (f32 accumulation) => loose-ish tolerance.
    max_err = float(jnp.max(jnp.abs(out - ref)))
    assert jnp.allclose(out, ref, atol=3e-2, rtol=3e-2), f"mismatch: {max_err}"

    print("KERNEL_OK")
</pallas_src>

<mosaic_0001>
module attributes {stable_mosaic.version = 11 : i64} {
  func.func @_conv3x3_kernel(%arg0: i32, %arg1: i32, %arg2: memref<1x16x16x128xbf16, #tpu.memory_space<vmem>>, %arg3: memref<1152x128xbf16, #tpu.memory_space<vmem>>, %arg4: memref<1x128xf32, #tpu.memory_space<vmem>>, %arg5: memref<1x8x16x128xf32, #tpu.memory_space<vmem>>, %arg6: memref<18x18x128xf32, #tpu.memory_space<vmem>>) attributes {dimension_semantics = [#tpu.dimension_semantics<parallel>, #tpu.dimension_semantics<arbitrary>], iteration_bounds = array<i64: 2, 2>, scalar_prefetch = 0 : i64, scratch_operands = 1 : i64, tpu.core_type = #tpu.core_type<tc>, window_params = [{transform_indices = @transform_0, window_bounds = array<i64: 1, 16, 16, 128>}, {pipeline_mode = #tpu.pipeline_mode<synchronous>, transform_indices = @transform_1, window_bounds = array<i64: 1152, 128>}, {pipeline_mode = #tpu.pipeline_mode<synchronous>, transform_indices = @transform_2, window_bounds = array<i64: 1, 128>}, {transform_indices = @transform_3, window_bounds = array<i64: 1, 8, 16, 128>}]} {
    %c0_i32 = arith.constant 0 : i32
    %0 = arith.cmpi eq, %arg1, %c0_i32 : i32
    %1 = arith.extui %0 : i1 to i32
    %c0_i32_0 = arith.constant 0 : i32
    %2 = arith.cmpi ne, %1, %c0_i32_0 : i32
    scf.if %2 {
      %cst_10 = arith.constant 0.000000e+00 : f32
      %39 = vector.broadcast %cst_10 : f32 to vector<18x18x128xf32>
      %c0_11 = arith.constant 0 : index
      %c0_12 = arith.constant 0 : index
      %c0_13 = arith.constant 0 : index
      %40 = vector.load %arg6[%c0_11, %c0_12, %c0_13] : memref<18x18x128xf32, #tpu.memory_space<vmem>>, vector<18x18x128xf32>
      tpu.vector_store %arg6[%c0_11, %c0_12, %c0_13], %39 {strides = array<i32>} : memref<18x18x128xf32, #tpu.memory_space<vmem>>, vector<18x18x128xf32>,
      %c0_14 = arith.constant 0 : index
      %c0_15 = arith.constant 0 : index
      %c0_16 = arith.constant 0 : index
      %c0_17 = arith.constant 0 : index
      %41 = vector.load %arg2[%c0_14, %c0_15, %c0_16, %c0_17] : memref<1x16x16x128xbf16, #tpu.memory_space<vmem>>, vector<1x16x16x128xbf16>
      %42 = vector.shape_cast %41 : vector<1x16x16x128xbf16> to vector<16x16x128xbf16>
      %43 = arith.extf %42 : vector<16x16x128xbf16> to vector<16x16x128xf32>
      %c1 = arith.constant 1 : index
      %c1_18 = arith.constant 1 : index
      %c0_19 = arith.constant 0 : index
      %44 = vector.load %arg6[%c1, %c1_18, %c0_19] : memref<18x18x128xf32, #tpu.memory_space<vmem>>, vector<16x16x128xf32>
      tpu.vector_store %arg6[%c1, %c1_18, %c0_19], %43 {strides = array<i32>} : memref<18x18x128xf32, #tpu.memory_space<vmem>>, vector<16x16x128xf32>,
    } else {
    }
    %c8_i32 = arith.constant 8 : i32
    %3 = arith.muli %arg1, %c8_i32 : i32
    %4 = tpu.assume_multiple %3, 8 : i32
    %5 = arith.index_cast %4 : i32 to index
    %c0 = arith.constant 0 : index
    %c0_1 = arith.constant 0 : index
    %6 = vector.load %arg6[%5, %c0, %c0_1] : memref<18x18x128xf32, #tpu.memory_space<vmem>>, vector<10x18x128xf32>
    %7 = vector.extract_strided_slice %6 {offsets = [0, 0, 0], sizes = [10, 16, 128], strides = [1, 1, 1]} : vector<10x18x128xf32> to vector<10x16x128xf32>
    %8 = vector.extract_strided_slice %6 {offsets = [0, 1, 0], sizes = [10, 16, 128], strides = [1, 1, 1]} : vector<10x18x128xf32> to vector<10x16x128xf32>
    %9 = vector.extract_strided_slice %6 {offsets = [0, 2, 0], sizes = [10, 16, 128], strides = [1, 1, 1]} : vector<10x18x128xf32> to vector<10x16x128xf32>
    %10 = vector.extract_strided_slice %7 {offsets = [0, 0, 0], sizes = [8, 16, 128], strides = [1, 1, 1]} : vector<10x16x128xf32> to vector<8x16x128xf32>
    %11 = vector.shape_cast %10 : vector<8x16x128xf32> to vector<128x128xf32>
    %12 = vector.extract_strided_slice %8 {offsets = [0, 0, 0], sizes = [8, 16, 128], strides = [1, 1, 1]} : vector<10x16x128xf32> to vector<8x16x128xf32>
    %13 = vector.shape_cast %12 : vector<8x16x128xf32> to vector<128x128xf32>
    %14 = vector.extract_strided_slice %9 {offsets = [0, 0, 0], sizes = [8, 16, 128], strides = [1, 1, 1]} : vector<10x16x128xf32> to vector<8x16x128xf32>
    %15 = vector.shape_cast %14 : vector<8x16x128xf32> to vector<128x128xf32>
    %16 = vector.extract_strided_slice %7 {offsets = [1, 0, 0], sizes = [8, 16, 128], strides = [1, 1, 1]} : vector<10x16x128xf32> to vector<8x16x128xf32>
    %17 = vector.shape_cast %16 : vector<8x16x128xf32> to vector<128x128xf32>
    %18 = vector.extract_strided_slice %8 {offsets = [1, 0, 0], sizes = [8, 16, 128], strides = [1, 1, 1]} : vector<10x16x128xf32> to vector<8x16x128xf32>
    %19 = vector.shape_cast %18 : vector<8x16x128xf32> to vector<128x128xf32>
    %20 = vector.extract_strided_slice %9 {offsets = [1, 0, 0], sizes = [8, 16, 128], strides = [1, 1, 1]} : vector<10x16x128xf32> to vector<8x16x128xf32>
    %21 = vector.shape_cast %20 : vector<8x16x128xf32> to vector<128x128xf32>
    %22 = vector.extract_strided_slice %7 {offsets = [2, 0, 0], sizes = [8, 16, 128], strides = [1, 1, 1]} : vector<10x16x128xf32> to vector<8x16x128xf32>
    %23 = vector.shape_cast %22 : vector<8x16x128xf32> to vector<128x128xf32>
    %24 = vector.extract_strided_slice %8 {offsets = [2, 0, 0], sizes = [8, 16, 128], strides = [1, 1, 1]} : vector<10x16x128xf32> to vector<8x16x128xf32>
    %25 = vector.shape_cast %24 : vector<8x16x128xf32> to vector<128x128xf32>
    %26 = vector.extract_strided_slice %9 {offsets = [2, 0, 0], sizes = [8, 16, 128], strides = [1, 1, 1]} : vector<10x16x128xf32> to vector<8x16x128xf32>
    %27 = vector.shape_cast %26 : vector<8x16x128xf32> to vector<128x128xf32>
    %28 = tpu.concatenate %11, %13, %15, %17, %19, %21, %23, %25, %27 in 1 : vector<128x128xf32>, vector<128x128xf32>, vector<128x128xf32>, vector<128x128xf32>, vector<128x128xf32>, vector<128x128xf32>, vector<128x128xf32>, vector<128x128xf32>, vector<128x128xf32> -> vector<128x1152xf32>
    %29 = arith.truncf %28 : vector<128x1152xf32> to vector<128x1152xbf16>
    %c0_2 = arith.constant 0 : index
    %c0_3 = arith.constant 0 : index
    %30 = vector.load %arg3[%c0_2, %c0_3] : memref<1152x128xbf16, #tpu.memory_space<vmem>>, vector<1152x128xbf16>
    %cst = arith.constant dense<0.000000e+00> : vector<128x128xf32>
    %31 = tpu.matmul %29, %30, %cst {dimension_numbers = #tpu.dot_dimension_numbers<[1], [0], [0], [1], [0, 0, 1, 1], [], []>} : vector<128x1152xbf16>, vector<1152x128xbf16>, vector<128x128xf32> -> vector<128x128xf32>
    %c0_4 = arith.constant 0 : index
    %c0_5 = arith.constant 0 : index
    %32 = vector.load %arg4[%c0_4, %c0_5] : memref<1x128xf32, #tpu.memory_space<vmem>>, vector<1x128xf32>
    %33 = vector.shape_cast %32 : vector<1x128xf32> to vector<128xf32>
    %34 = vector.shape_cast %33 : vector<128xf32> to vector<1x128xf32>
    %35 = vector.broadcast %34 : vector<1x128xf32> to vector<128x128xf32>
    %36 = arith.addf %31, %35 : vector<128x128xf32>
    %37 = vector.shape_cast %36 : vector<128x128xf32> to vector<1x8x16x128xf32>
    %c0_6 = arith.constant 0 : index
    %c0_7 = arith.constant 0 : index
    %c0_8 = arith.constant 0 : index
    %c0_9 = arith.constant 0 : index
    %38 = vector.load %arg5[%c0_6, %c0_7, %c0_8, %c0_9] : memref<1x8x16x128xf32, #tpu.memory_space<vmem>>, vector<1x8x16x128xf32>
    tpu.vector_store %arg5[%c0_6, %c0_7, %c0_8, %c0_9], %37 {strides = array<i32>} : memref<1x8x16x128xf32, #tpu.memory_space<vmem>>, vector<1x8x16x128xf32>,
    return
  }
  func.func @transform_0(%arg0: i32, %arg1: i32) -> (i32, i32, i32, i32) {
    %c0_i32 = arith.constant 0 : i32
    %c0_i32_0 = arith.constant 0 : i32
    %c0_i32_1 = arith.constant 0 : i32
    %c0_i32_2 = arith.constant 0 : i32
    return %arg0, %c0_i32, %c0_i32_0, %c0_i32_1 : i32, i32, i32, i32
  }
  func.func @transform_1(%arg0: i32, %arg1: i32) -> (i32, i32) {
    %c0_i32 = arith.constant 0 : i32
    %c0_i32_0 = arith.constant 0 : i32
    %c0_i32_1 = arith.constant 0 : i32
    return %c0_i32, %c0_i32_0 : i32, i32
  }
  func.func @transform_2(%arg0: i32, %arg1: i32) -> (i32, i32) {
    %c0_i32 = arith.constant 0 : i32
    %c0_i32_0 = arith.constant 0 : i32
    %c0_i32_1 = arith.constant 0 : i32
    return %c0_i32, %c0_i32_0 : i32, i32
  }
  func.func @transform_3(%arg0: i32, %arg1: i32) -> (i32, i32, i32, i32) {
    %c0_i32 = arith.constant 0 : i32
    %c0_i32_0 = arith.constant 0 : i32
    %c0_i32_1 = arith.constant 0 : i32
    return %arg0, %arg1, %c0_i32, %c0_i32_0 : i32, i32, i32, i32
  }
}

module attributes {stable_mosaic.version = 11 : i64} {
  func.func @_conv3x3_kernel(%arg0: i32, %arg1: i32, %arg2: memref<1x16x16x128xbf16, #tpu.memory_space<vmem>>, %arg3: memref<1152x128xbf16, #tpu.memory_space<vmem>>, %arg4: memref<1x128xf32, #tpu.memory_space<vmem>>, %arg5: memref<1x8x16x128xbf16, #tpu.memory_space<vmem>>, %arg6: memref<18x18x128xf32, #tpu.memory_space<vmem>>) attributes {dimension_semantics = [#tpu.dimension_semantics<parallel>, #tpu.dimension_semantics<arbitrary>], iteration_bounds = array<i64: 2, 2>, scalar_prefetch = 0 : i64, scratch_operands = 1 : i64, tpu.core_type = #tpu.core_type<tc>, window_params = [{transform_indices = @transform_0, window_bounds = array<i64: 1, 16, 16, 128>}, {pipeline_mode = #tpu.pipeline_mode<synchronous>, transform_indices = @transform_1, window_bounds = array<i64: 1152, 128>}, {pipeline_mode = #tpu.pipeline_mode<synchronous>, transform_indices = @transform_2, window_bounds = array<i64: 1, 128>}, {transform_indices = @transform_3, window_bounds = array<i64: 1, 8, 16, 128>}]} {
    %c0_i32 = arith.constant 0 : i32
    %0 = arith.cmpi eq, %arg1, %c0_i32 : i32
    %1 = arith.extui %0 : i1 to i32
    %c0_i32_0 = arith.constant 0 : i32
    %2 = arith.cmpi ne, %1, %c0_i32_0 : i32
    scf.if %2 {
      %cst_11 = arith.constant 0.000000e+00 : f32
      %42 = vector.broadcast %cst_11 : f32 to vector<18x18x128xf32>
      %c0_12 = arith.constant 0 : index
      %c0_13 = arith.constant 0 : index
      %c0_14 = arith.constant 0 : index
      %43 = vector.load %arg6[%c0_12, %c0_13, %c0_14] : memref<18x18x128xf32, #tpu.memory_space<vmem>>, vector<18x18x128xf32>
      tpu.vector_store %arg6[%c0_12, %c0_13, %c0_14], %42 {strides = array<i32>} : memref<18x18x128xf32, #tpu.memory_space<vmem>>, vector<18x18x128xf32>,
      %c0_15 = arith.constant 0 : index
      %c0_16 = arith.constant 0 : index
      %c0_17 = arith.constant 0 : index
      %c0_18 = arith.constant 0 : index
      %44 = vector.load %arg2[%c0_15, %c0_16, %c0_17, %c0_18] : memref<1x16x16x128xbf16, #tpu.memory_space<vmem>>, vector<1x16x16x128xbf16>
      %45 = vector.shape_cast %44 : vector<1x16x16x128xbf16> to vector<16x16x128xbf16>
      %46 = arith.extf %45 : vector<16x16x128xbf16> to vector<16x16x128xf32>
      %c1 = arith.constant 1 : index
      %c1_19 = arith.constant 1 : index
      %c0_20 = arith.constant 0 : index
      %47 = vector.load %arg6[%c1, %c1_19, %c0_20] : memref<18x18x128xf32, #tpu.memory_space<vmem>>, vector<16x16x128xf32>
      tpu.vector_store %arg6[%c1, %c1_19, %c0_20], %46 {strides = array<i32>} : memref<18x18x128xf32, #tpu.memory_space<vmem>>, vector<16x16x128xf32>,
    } else {
    }
    %c8_i32 = arith.constant 8 : i32
    %3 = arith.muli %arg1, %c8_i32 : i32
    %4 = tpu.assume_multiple %3, 8 : i32
    %5 = arith.index_cast %4 : i32 to index
    %c0 = arith.constant 0 : index
    %c0_1 = arith.constant 0 : index
    %6 = vector.load %arg6[%5, %c0, %c0_1] : memref<18x18x128xf32, #tpu.memory_space<vmem>>, vector<10x18x128xf32>
    %7 = vector.extract_strided_slice %6 {offsets = [0, 0, 0], sizes = [10, 16, 128], strides = [1, 1, 1]} : vector<10x18x128xf32> to vector<10x16x128xf32>
    %8 = vector.extract_strided_slice %6 {offsets = [0, 1, 0], sizes = [10, 16, 128], strides = [1, 1, 1]} : vector<10x18x128xf32> to vector<10x16x128xf32>
    %9 = vector.extract_strided_slice %6 {offsets = [0, 2, 0], sizes = [10, 16, 128], strides = [1, 1, 1]} : vector<10x18x128xf32> to vector<10x16x128xf32>
    %10 = vector.extract_strided_slice %7 {offsets = [0, 0, 0], sizes = [8, 16, 128], strides = [1, 1, 1]} : vector<10x16x128xf32> to vector<8x16x128xf32>
    %11 = vector.shape_cast %10 : vector<8x16x128xf32> to vector<128x128xf32>
    %12 = vector.extract_strided_slice %8 {offsets = [0, 0, 0], sizes = [8, 16, 128], strides = [1, 1, 1]} : vector<10x16x128xf32> to vector<8x16x128xf32>
    %13 = vector.shape_cast %12 : vector<8x16x128xf32> to vector<128x128xf32>
    %14 = vector.extract_strided_slice %9 {offsets = [0, 0, 0], sizes = [8, 16, 128], strides = [1, 1, 1]} : vector<10x16x128xf32> to vector<8x16x128xf32>
    %15 = vector.shape_cast %14 : vector<8x16x128xf32> to vector<128x128xf32>
    %16 = vector.extract_strided_slice %7 {offsets = [1, 0, 0], sizes = [8, 16, 128], strides = [1, 1, 1]} : vector<10x16x128xf32> to vector<8x16x128xf32>
    %17 = vector.shape_cast %16 : vector<8x16x128xf32> to vector<128x128xf32>
    %18 = vector.extract_strided_slice %8 {offsets = [1, 0, 0], sizes = [8, 16, 128], strides = [1, 1, 1]} : vector<10x16x128xf32> to vector<8x16x128xf32>
    %19 = vector.shape_cast %18 : vector<8x16x128xf32> to vector<128x128xf32>
    %20 = vector.extract_strided_slice %9 {offsets = [1, 0, 0], sizes = [8, 16, 128], strides = [1, 1, 1]} : vector<10x16x128xf32> to vector<8x16x128xf32>
    %21 = vector.shape_cast %20 : vector<8x16x128xf32> to vector<128x128xf32>
    %22 = vector.extract_strided_slice %7 {offsets = [2, 0, 0], sizes = [8, 16, 128], strides = [1, 1, 1]} : vector<10x16x128xf32> to vector<8x16x128xf32>
    %23 = vector.shape_cast %22 : vector<8x16x128xf32> to vector<128x128xf32>
    %24 = vector.extract_strided_slice %8 {offsets = [2, 0, 0], sizes = [8, 16, 128], strides = [1, 1, 1]} : vector<10x16x128xf32> to vector<8x16x128xf32>
    %25 = vector.shape_cast %24 : vector<8x16x128xf32> to vector<128x128xf32>
    %26 = vector.extract_strided_slice %9 {offsets = [2, 0, 0], sizes = [8, 16, 128], strides = [1, 1, 1]} : vector<10x16x128xf32> to vector<8x16x128xf32>
    %27 = vector.shape_cast %26 : vector<8x16x128xf32> to vector<128x128xf32>
    %28 = tpu.concatenate %11, %13, %15, %17, %19, %21, %23, %25, %27 in 1 : vector<128x128xf32>, vector<128x128xf32>, vector<128x128xf32>, vector<128x128xf32>, vector<128x128xf32>, vector<128x128xf32>, vector<128x128xf32>, vector<128x128xf32>, vector<128x128xf32> -> vector<128x1152xf32>
    %29 = arith.truncf %28 : vector<128x1152xf32> to vector<128x1152xbf16>
    %c0_2 = arith.constant 0 : index
    %c0_3 = arith.constant 0 : index
    %30 = vector.load %arg3[%c0_2, %c0_3] : memref<1152x128xbf16, #tpu.memory_space<vmem>>, vector<1152x128xbf16>
    %cst = arith.constant dense<0.000000e+00> : vector<128x128xf32>
    %31 = tpu.matmul %29, %30, %cst {dimension_numbers = #tpu.dot_dimension_numbers<[1], [0], [0], [1], [0, 0, 1, 1], [], []>} : vector<128x1152xbf16>, vector<1152x128xbf16>, vector<128x128xf32> -> vector<128x128xf32>
    %c0_4 = arith.constant 0 : index
    %c0_5 = arith.constant 0 : index
    %32 = vector.load %arg4[%c0_4, %c0_5] : memref<1x128xf32, #tpu.memory_space<vmem>>, vector<1x128xf32>
    %33 = vector.shape_cast %32 : vector<1x128xf32> to vector<128xf32>
    %34 = vector.shape_cast %33 : vector<128xf32> to vector<1x128xf32>
    %35 = vector.broadcast %34 : vector<1x128xf32> to vector<128x128xf32>
    %36 = arith.addf %31, %35 : vector<128x128xf32>
    %cst_6 = arith.constant 0.000000e+00 : f32
    %37 = vector.broadcast %cst_6 : f32 to vector<128x128xf32>
    %38 = arith.maximumf %36, %37 : vector<128x128xf32>
    %39 = vector.shape_cast %38 : vector<128x128xf32> to vector<1x8x16x128xf32>
    %40 = arith.truncf %39 : vector<1x8x16x128xf32> to vector<1x8x16x128xbf16>
    %c0_7 = arith.constant 0 : index
    %c0_8 = arith.constant 0 : index
    %c0_9 = arith.constant 0 : index
    %c0_10 = arith.constant 0 : index
    %41 = vector.load %arg5[%c0_7, %c0_8, %c0_9, %c0_10] : memref<1x8x16x128xbf16, #tpu.memory_space<vmem>>, vector<1x8x16x128xbf16>
    tpu.vector_store %arg5[%c0_7, %c0_8, %c0_9, %c0_10], %40 {strides = array<i32>} : memref<1x8x16x128xbf16, #tpu.memory_space<vmem>>, vector<1x8x16x128xbf16>,
    return
  }
  func.func @transform_0(%arg0: i32, %arg1: i32) -> (i32, i32, i32, i32) {
    %c0_i32 = arith.constant 0 : i32
    %c0_i32_0 = arith.constant 0 : i32
    %c0_i32_1 = arith.constant 0 : i32
    %c0_i32_2 = arith.constant 0 : i32
    return %arg0, %c0_i32, %c0_i32_0, %c0_i32_1 : i32, i32, i32, i32
  }
  func.func @transform_1(%arg0: i32, %arg1: i32) -> (i32, i32) {
    %c0_i32 = arith.constant 0 : i32
    %c0_i32_0 = arith.constant 0 : i32
    %c0_i32_1 = arith.constant 0 : i32
    return %c0_i32, %c0_i32_0 : i32, i32
  }
  func.func @transform_2(%arg0: i32, %arg1: i32) -> (i32, i32) {
    %c0_i32 = arith.constant 0 : i32
    %c0_i32_0 = arith.constant 0 : i32
    %c0_i32_1 = arith.constant 0 : i32
    return %c0_i32, %c0_i32_0 : i32, i32
  }
  func.func @transform_3(%arg0: i32, %arg1: i32) -> (i32, i32, i32, i32) {
    %c0_i32 = arith.constant 0 : i32
    %c0_i32_0 = arith.constant 0 : i32
    %c0_i32_1 = arith.constant 0 : i32
    return %arg0, %arg1, %c0_i32, %c0_i32_0 : i32, i32, i32, i32
  }
}

</mosaic_0001>

<bundles_post_ra>
// kernel: regression_model_forward.9
= control target key start
LH: loop header
LB: loop body
LE: loop exit
PB: predicated region body
PF: predicated region fallthrough
CT: control target
= control target key end

     0   :  { %s2426_s12 = smov 0   ;;  %s2428_s13 = smov 0   ;;  %s3142_s0 = inlined_call_operand.vmem [shape: bf16[2,16,16,128], index: 0, kind: input, shape index: {}]   ;;  %s3143_s1 = inlined_call_operand.vmem [shape: bf16[1152,128], index: 1, kind: input, shape index: {}]   ;;  %s3144_s2 = inlined_call_operand.vmem [shape: f32[1,128], index: 2, kind: input, shape index: {}]   ;;  %s3145_s3 = inlined_call_operand.vmem [shape: f32[2,16,16,128], index: 3, kind: output, shape index: {}]  }
   0x1   :  { %s2430_s14 = smov 0   ;;  %s2432_s15 = smov 0  }
   0x2   :  { %s2434_s16 = smov 0  }
   0x3 LB: > { %s22_s17 = sadd.s32 1, %s2395_s14  ;;  %s25_s18 = sadd.s32 1, %s2399_s15  ;;  %s2403_s16 = sphi %s2434_s16, %s13_s16   ;;  %s2399_s15 = sphi %s2432_s15, %s3187_s15   ;;  %s2395_s14 = sphi %s2430_s14, %s3186_s14   ;;  %s2391_s13 = sphi %s2428_s13, %s3185_s13   ;;  %s2387_s12 = sphi %s2426_s12, %s3184_s12  }
   0x4   : > { %p23_p0 = scmp.ge.s32.totalorder %s22_s17, 2  ;;  %p1767_p1 = scmp.ge.s32.totalorder %s2403_s16, 1 }
   0x5   : > { %p151_p2 = scmp.lt.s32.totalorder %s2403_s16, 5 }
   0x6   : > { %s3189_s17 = smov (%p23_p0, %s22_s17), 0  ;;  %s3191_s18 = smov (!%p23_p0, %s25_s18), %s2399_s15 }
   0x7   : > { %p152_p3 = pnand %p1767_p1, %p151_p2  ;;  %p27_p4 = scmp.ge.s32.totalorder %s3191_s18, 2 }
   0x9   : > { %s3193_s18 = smov (%p27_p4, %s3191_s18), 0  ;;  %155 = sbr.rel (%p152_p3) target bundleno = 442 (0x1ba), region = 32 }
   0xe   : > { %p180_p5 = scmp.lt.s32.totalorder %s2391_s13, 1  ;;  %s1770_s19 = sshll.u32 %s2387_s12, 3 }
   0xf   : > { %p188_p6 = scmp.lt.s32.totalorder %s1770_s19, 15  ;;  %p1774_p7 = scmp.ne.s32.totalorder %s2387_s12, 0 }
  0x10   : > { %s3195_s13 = smov (!%p180_p5, %s2391_s13), 1 }
  0x11   : > { %s3197_s19 = smov (!%p188_p6, %s1770_s19), 15  ;;  %s1852_s20 = sshll.u32 %s3195_s13, 7 }
  0x12   : > { %s1772_s21 = sshll.u32 %s3195_s13, 5  ;;  %s2462_s24 = scalar_lea.vmem %s3142_s0, %s1852_s20 }
  0x13   : > { %s1771_s25 = sshll.u32 %s3197_s19, 1  ;;  %200 = sbr.rel (%p1774_p7) target bundleno = 68 (0x44), region = 36 }
  0x14   : > { %s192_s26 = sadd.s32 %s1772_s21, %s1771_s25 }
  0x15   : > { %s1773_s27 = sshll.u32 %s192_s26, 3 }
  0x16   : > { %s2467_s30 = scalar_lea.vmem %s3145_s3, %s1773_s27 }
  0x18   : > { %v2471_v0 = vld [vmem:[%s2462_s24] sm:$0xff]   ;;  %v2474_v1 = vld [vmem:[%s2462_s24 + $0x8] sm:$0xff]   ;;  %v2477_v2 = vld [vmem:[%s2462_s24 + $0x10] sm:$0xff]   ;;  %v2405_v3 = vmov 0.0  }
  0x19   : > { %204 = vst [vmem:[#allocation2 + $0x18] sm:$0xff] %v2405_v3  ;;  %201 = vst [vmem:[#allocation2] sm:$0xff] %v2405_v3  ;;  %v1855_v4 = vunpack.c.l.bf16 %v2471_v0  ;;  %v1856_v5 = vunpack.c.h.bf16 %v2471_v0  ;;  %v1859_v6 = vunpack.c.l.bf16 %v2474_v1  ;;  %v1860_v7 = vunpack.c.h.bf16 %v2474_v1  ;;  %v1919_v8 = vld [vmem:[%s2462_s24 + $0x18] sm:$0xff]   ;;  %v1920_v9 = vld [vmem:[%s2462_s24 + $0x20] sm:$0xff]  }
  0x1a   : > { %202 = vst [vmem:[#allocation2 + $0x8] sm:$0xff] %v2405_v3  ;;  %203 = vst [vmem:[#allocation2 + $0x10] sm:$0x3] %v2405_v3  ;;  %v1921_v10 = vld [vmem:[%s2462_s24 + $0x28] sm:$0xff]   ;;  %v1863_v11 = vunpack.c.l.bf16 %v2477_v2  ;;  %v1864_v12 = vunpack.c.h.bf16 %v2477_v2  ;;  %v1867_v13 = vunpack.c.l.bf16 %v1919_v8  ;;  %v1868_v14 = vunpack.c.h.bf16 %v1919_v8  ;;  %v1922_v15 = vld [vmem:[%s2462_s24 + $0x30] sm:$0xff]  }
  0x1b   : > { %205 = vst [vmem:[#allocation2 + $0x20] sm:$0xff] %v2405_v3  ;;  %206 = vst [vmem:[#allocation2 + $0x28] sm:$0x3] %v2405_v3  ;;  %v1923_v16 = vld [vmem:[%s2462_s24 + $0x38] sm:$0xff]   ;;  %v1924_v17 = vld [vmem:[%s2462_s24 + $0x40] sm:$0xff]   ;;  %v1871_v18 = vunpack.c.l.bf16 %v1920_v9  ;;  %v1872_v19 = vunpack.c.h.bf16 %v1920_v9  ;;  %v1875_v20 = vunpack.c.l.bf16 %v1921_v10  ;;  %v1876_v21 = vunpack.c.h.bf16 %v1921_v10 }
  0x1c   : > { %207 = vst [vmem:[#allocation2 + $0x30] sm:$0xff] %v2405_v3  ;;  %208 = vst [vmem:[#allocation2 + $0x38] sm:$0xff] %v2405_v3  ;;  %v1925_v22 = vld [vmem:[%s2462_s24 + $0x48] sm:$0xff]   ;;  %v1926_v23 = vld [vmem:[%s2462_s24 + $0x50] sm:$0xff]   ;;  %v1879_v25 = vunpack.c.l.bf16 %v1922_v15  ;;  %v1880_v26 = vunpack.c.h.bf16 %v1922_v15  ;;  %v1883_v27 = vunpack.c.l.bf16 %v1923_v16  ;;  %v1884_v28 = vunpack.c.h.bf16 %v1923_v16 }
  0x1d   : > { %209 = vst [vmem:[#allocation2 + $0x40] sm:$0x3] %v2405_v3  ;;  %210 = vst [vmem:[#allocation2 + $0x48] sm:$0xff] %v2405_v3  ;;  %v1927_v24 = vld [vmem:[%s2462_s24 + $0x58] sm:$0xff]   ;;  %v1928_v29 = vld [vmem:[%s2462_s24 + $0x60] sm:$0xff]   ;;  %v1887_v31 = vunpack.c.l.bf16 %v1924_v17  ;;  %v1888_v32 = vunpack.c.h.bf16 %v1924_v17  ;;  %v1891_v33 = vunpack.c.l.bf16 %v1925_v22  ;;  %v1892_v34 = vunpack.c.h.bf16 %v1925_v22 }
  0x1e   : > { %211 = vst [vmem:[#allocation2 + $0x50] sm:$0xff] %v2405_v3  ;;  %212 = vst [vmem:[#allocation2 + $0x58] sm:$0x3] %v2405_v3  ;;  %v1929_v30 = vld [vmem:[%s2462_s24 + $0x68] sm:$0xff]   ;;  %v1930_v35 = vld [vmem:[%s2462_s24 + $0x70] sm:$0xff]   ;;  %v1895_v37 = vunpack.c.l.bf16 %v1926_v23  ;;  %v1896_v38 = vunpack.c.h.bf16 %v1926_v23  ;;  %v1899_v39 = vunpack.c.l.bf16 %v1927_v24  ;;  %v1900_v40 = vunpack.c.h.bf16 %v1927_v24 }
  0x1f   : > { %213 = vst [vmem:[#allocation2 + $0x60] sm:$0xff] %v2405_v3  ;;  %214 = vst [vmem:[#allocation2 + $0x68] sm:$0xff] %v2405_v3  ;;  %v1931_v36 = vld [vmem:[%s2462_s24 + $0x78] sm:$0xff]   ;;  %v1903_v41 = vunpack.c.l.bf16 %v1928_v29  ;;  %v1904_v42 = vunpack.c.h.bf16 %v1928_v29  ;;  %v1907_v43 = vunpack.c.l.bf16 %v1929_v30  ;;  %v1908_v44 = vunpack.c.h.bf16 %v1929_v30 }
  0x20   : > { %215 = vst [vmem:[#allocation2 + $0x70] sm:$0x3] %v2405_v3  ;;  %216 = vst [vmem:[#allocation2 + $0x78] sm:$0xff] %v2405_v3  ;;  %v1911_v45 = vunpack.c.l.bf16 %v1930_v35  ;;  %v1912_v46 = vunpack.c.h.bf16 %v1930_v35  ;;  %v1915_v47 = vunpack.c.l.bf16 %v1931_v36  ;;  %v1916_v48 = vunpack.c.h.bf16 %v1931_v36 }
  0x21   : > { %217 = vst [vmem:[#allocation2 + $0x80] sm:$0xff] %v2405_v3  ;;  %218 = vst [vmem:[#allocation2 + $0x88] sm:$0x3] %v2405_v3 }
  0x22   : > { %219 = vst [vmem:[#allocation2 + $0x90] sm:$0xff] %v2405_v3  ;;  %220 = vst [vmem:[#allocation2 + $0x98] sm:$0xff] %v2405_v3 }
  0x23   : > { %221 = vst [vmem:[#allocation2 + $0xa0] sm:$0x3] %v2405_v3  ;;  %222 = vst [vmem:[#allocation2 + $0xa8] sm:$0xff] %v2405_v3 }
  0x24   : > { %223 = vst [vmem:[#allocation2 + $0xb0] sm:$0xff] %v2405_v3  ;;  %224 = vst [vmem:[#allocation2 + $0xb8] sm:$0x3] %v2405_v3 }
  0x25   : > { %225 = vst [vmem:[#allocation2 + $0xc0] sm:$0xff] %v2405_v3  ;;  %226 = vst [vmem:[#allocation2 + $0xc8] sm:$0xff] %v2405_v3 }
  0x26   : > { %227 = vst [vmem:[#allocation2 + $0xd0] sm:$0x3] %v2405_v3  ;;  %228 = vst [vmem:[#allocation2 + $0xd8] sm:$0xff] %v2405_v3 }
  0x27   : > { %229 = vst [vmem:[#allocation2 + $0xe0] sm:$0xff] %v2405_v3  ;;  %230 = vst [vmem:[#allocation2 + $0xe8] sm:$0x3] %v2405_v3 }
  0x28   : > { %231 = vst [vmem:[#allocation2 + $0xf0] sm:$0xff] %v2405_v3  ;;  %232 = vst [vmem:[#allocation2 + $0xf8] sm:$0xff] %v2405_v3 }
  0x29   : > { %233 = vst [vmem:[#allocation2 + $0x100] sm:$0x3] %v2405_v3  ;;  %234 = vst [vmem:[#allocation2 + $0x108] sm:$0xff] %v2405_v3 }
  0x2a   : > { %235 = vst [vmem:[#allocation2 + $0x110] sm:$0xff] %v2405_v3  ;;  %236 = vst [vmem:[#allocation2 + $0x118] sm:$0x3] %v2405_v3 }
  0x2b   : > { %237 = vst [vmem:[#allocation2 + $0x120] sm:$0xff] %v2405_v3  ;;  %238 = vst [vmem:[#allocation2 + $0x128] sm:$0xff] %v2405_v3 }
  0x2c   : > { %239 = vst [vmem:[#allocation2 + $0x130] sm:$0x3] %v2405_v3  ;;  %240 = vst [vmem:[#allocation2 + $0x138] sm:$0xff] %v2405_v3 }
  0x2d   : > { %241 = vst [vmem:[#allocation2 + $0x140] sm:$0xff] %v2405_v3  ;;  %242 = vst [vmem:[#allocation2 + $0x148] sm:$0x3] %v2405_v3 }
  0x2e   : > { %243 = vst [vmem:[#allocation2 + $0x150] sm:$0xff] %v2405_v3  ;;  %244 = vst [vmem:[#allocation2 + $0x158] sm:$0xff] %v2405_v3 }
  0x2f   : > { %245 = vst [vmem:[#allocation2 + $0x160] sm:$0x3] %v2405_v3  ;;  %246 = vst [vmem:[#allocation2 + $0x168] sm:$0xff] %v2405_v3 }
  0x30   : > { %247 = vst [vmem:[#allocation2 + $0x170] sm:$0xff] %v2405_v3  ;;  %248 = vst [vmem:[#allocation2 + $0x178] sm:$0x3] %v2405_v3 }
  0x31   : > { %249 = vst [vmem:[#allocation2 + $0x180] sm:$0xff] %v2405_v3  ;;  %250 = vst [vmem:[#allocation2 + $0x188] sm:$0xff] %v2405_v3 }
  0x32   : > { %251 = vst [vmem:[#allocation2 + $0x190] sm:$0x3] %v2405_v3  ;;  %252 = vst [vmem:[#allocation2 + $0x198] sm:$0xff] %v2405_v3 }
  0x33   : > { %253 = vst [vmem:[#allocation2 + $0x1a0] sm:$0xff] %v2405_v3  ;;  %254 = vst [vmem:[#allocation2 + $0x1a8] sm:$0x3] %v2405_v3 }
  0x34   : > { %320 = vst [vmem:[#allocation2 + $0x19] sm:$0xff] %v1855_v4  ;;  %321 = vst [vmem:[#allocation2 + $0x21] sm:$0xff] %v1856_v5 }
  0x35   : > { %322 = vst [vmem:[#allocation2 + $0x31] sm:$0xff] %v1859_v6  ;;  %323 = vst [vmem:[#allocation2 + $0x39] sm:$0xff] %v1860_v7 }
  0x36   : > { %324 = vst [vmem:[#allocation2 + $0x49] sm:$0xff] %v1863_v11  ;;  %325 = vst [vmem:[#allocation2 + $0x51] sm:$0xff] %v1864_v12 }
  0x37   : > { %326 = vst [vmem:[#allocation2 + $0x61] sm:$0xff] %v1867_v13  ;;  %327 = vst [vmem:[#allocation2 + $0x69] sm:$0xff] %v1868_v14 }
  0x38   : > { %328 = vst [vmem:[#allocation2 + $0x79] sm:$0xff] %v1871_v18  ;;  %329 = vst [vmem:[#allocation2 + $0x81] sm:$0xff] %v1872_v19 }
  0x39   : > { %330 = vst [vmem:[#allocation2 + $0x91] sm:$0xff] %v1875_v20  ;;  %331 = vst [vmem:[#allocation2 + $0x99] sm:$0xff] %v1876_v21 }
  0x3a   : > { %332 = vst [vmem:[#allocation2 + $0xa9] sm:$0xff] %v1879_v25  ;;  %333 = vst [vmem:[#allocation2 + $0xb1] sm:$0xff] %v1880_v26 }
  0x3b   : > { %334 = vst [vmem:[#allocation2 + $0xc1] sm:$0xff] %v1883_v27  ;;  %335 = vst [vmem:[#allocation2 + $0xc9] sm:$0xff] %v1884_v28 }
  0x3c   : > { %336 = vst [vmem:[#allocation2 + $0xd9] sm:$0xff] %v1887_v31  ;;  %337 = vst [vmem:[#allocation2 + $0xe1] sm:$0xff] %v1888_v32 }
  0x3d   : > { %338 = vst [vmem:[#allocation2 + $0xf1] sm:$0xff] %v1891_v33  ;;  %339 = vst [vmem:[#allocation2 + $0xf9] sm:$0xff] %v1892_v34 }
  0x3e   : > { %340 = vst [vmem:[#allocation2 + $0x109] sm:$0xff] %v1895_v37  ;;  %341 = vst [vmem:[#allocation2 + $0x111] sm:$0xff] %v1896_v38 }
  0x3f   : > { %342 = vst [vmem:[#allocation2 + $0x121] sm:$0xff] %v1899_v39  ;;  %343 = vst [vmem:[#allocation2 + $0x129] sm:$0xff] %v1900_v40 }
  0x40   : > { %344 = vst [vmem:[#allocation2 + $0x139] sm:$0xff] %v1903_v41  ;;  %345 = vst [vmem:[#allocation2 + $0x141] sm:$0xff] %v1904_v42 }
  0x41   : > { %346 = vst [vmem:[#allocation2 + $0x151] sm:$0xff] %v1907_v43  ;;  %347 = vst [vmem:[#allocation2 + $0x159] sm:$0xff] %v1908_v44 }
  0x42   : > { %348 = vst [vmem:[#allocation2 + $0x169] sm:$0xff] %v1911_v45  ;;  %349 = vst [vmem:[#allocation2 + $0x171] sm:$0xff] %v1912_v46 }
  0x43   : > { %350 = vst [vmem:[#allocation2 + $0x181] sm:$0xff] %v1915_v47  ;;  %351 = vst [vmem:[#allocation2 + $0x189] sm:$0xff] %v1916_v48 }
  0x44 PF: > { %v2293_v49 = vld [vmem:[%s3143_s1 + $0x78] sm:$0xff]   ;;  %v2297_v53 = vld [vmem:[%s3143_s1 + $0x70] sm:$0xff]   ;;  %v2301_v57 = vld [vmem:[%s3143_s1 + $0x68] sm:$0xff]   ;;  %s1776_s22 = smul.u32 192, %s2387_s12  ;;  %vm409_vm0 = vcmask 1046528   ;;  %vm466_vm1 = vcmask 1045504  }
  0x45   : > { %v2294_v50 = vld [vmem:[%s3143_s1 + $0xf8] sm:$0xff]   ;;  %1932 = vmatprep.subr.bf16.mxu0 %v2293_v49  ;;  %v2298_v54 = vld [vmem:[%s3143_s1 + $0xf0] sm:$0xff]   ;;  %v2302_v58 = vld [vmem:[%s3143_s1 + $0xe8] sm:$0xff]  }
  0x46   : > { %v2295_v51 = vld [vmem:[%s3143_s1 + $0x38] sm:$0xff]   ;;  %1996 = vmatprep.subr.bf16.mxu1 %v2294_v50  ;;  %v2299_v55 = vld [vmem:[%s3143_s1 + $0x30] sm:$0xff]   ;;  %v2303_v59 = vld [vmem:[%s3143_s1 + $0x28] sm:$0xff]   ;;  %s2595_s8 = scalar_lea.vmem [#allocation2], %s1776_s22 }
  0x47   : > { %v2296_v52 = vld [vmem:[%s3143_s1 + $0xb8] sm:$0xff]   ;;  %1933 = vmatpush3.bf16.msra.mxu0 %v2295_v51  ;;  %v2300_v56 = vld [vmem:[%s3143_s1 + $0xb0] sm:$0xff]   ;;  %v2304_v60 = vld [vmem:[%s3143_s1 + $0xa8] sm:$0xff]  }
  0x48   : > { %1997 = vmatpush3.bf16.msra.mxu1 %v2296_v52  ;;  %1934 = vmatprep.subr.bf16.mxu0 %v2297_v53  ;;  %v2305_v61 = vld [vmem:[%s3143_s1 + $0x60] sm:$0xff]   ;;  %v2309_v1 = vld [vmem:[%s3143_s1 + $0x58] sm:$0xff]   ;;  %v2313_v5 = vld [vmem:[%s3143_s1 + $0x50] sm:$0xff]  }
  0x49   : > { %1998 = vmatprep.subr.bf16.mxu1 %v2298_v54  ;;  %v2306_v62 = vld [vmem:[%s3143_s1 + $0xe0] sm:$0xff]   ;;  %v2310_v2 = vld [vmem:[%s3143_s1 + $0xd8] sm:$0xff]   ;;  %v2314_v6 = vld [vmem:[%s3143_s1 + $0xd0] sm:$0xff]  }
  0x4a   : > { %v2307_v63 = vld [vmem:[%s3143_s1 + $0x20] sm:$0xff]   ;;  %v2311_v3 = vld [vmem:[%s3143_s1 + $0x18] sm:$0xff]   ;;  %v2315_v7 = vld [vmem:[%s3143_s1 + $0x10] sm:$0xff]  }
  0x4b   : > { %1935 = vmatpush3.bf16.msra.mxu0 %v2299_v55  ;;  %v2308_v0 = vld [vmem:[%s3143_s1 + $0xa0] sm:$0xff]   ;;  %v2312_v4 = vld [vmem:[%s3143_s1 + $0x98] sm:$0xff]   ;;  %v2316_v8 = vld [vmem:[%s3143_s1 + $0x90] sm:$0xff]  }
  0x4c   : > { %1999 = vmatpush3.bf16.msra.mxu1 %v2300_v56  ;;  %1936 = vmatprep.subr.bf16.mxu0 %v2301_v57  ;;  %v2317_v9 = vld [vmem:[%s3143_s1 + $0x48] sm:$0xff]   ;;  %v2321_v13 = vld [vmem:[%s3143_s1 + $0x40] sm:$0xff]   ;;  %v357_v19 = vld [vmem:[%s2595_s8 + $0x10] sm:$0x3] }
  0x4d   : > { %2000 = vmatprep.subr.bf16.mxu1 %v2302_v58  ;;  %v2318_v10 = vld [vmem:[%s3143_s1 + $0xc8] sm:$0xff]   ;;  %v2322_v14 = vld [vmem:[%s3143_s1 + $0xc0] sm:$0xff]   ;;  %v413_v22 = vrot.slane %v357_v19, 1  ;;  %v358_v23 = vld [vmem:[%s2595_s8 + $0x18] sm:$0xff]  ;;  %v470_v25 = vrot.slane %v357_v19, 2 }
  0x4e   : > { %v2319_v11 = vld [vmem:[%s3143_s1 + $0x8] sm:$0xff]   ;;  %v2323_v15 = vld [vmem:[%s3143_s1] sm:$0xff]   ;;  %v415_v26 = vrot.slane %v358_v23, 1  ;;  %v472_v28 = vrot.slane %v358_v23, 2  ;;  %v2325_v33 = vld [vmem:[%s3143_s1 + $0x178] sm:$0xff]  }
  0x4f   : > { %1937 = vmatpush3.bf16.msra.mxu0 %v2303_v59  ;;  %v2320_v12 = vld [vmem:[%s3143_s1 + $0x88] sm:$0xff]   ;;  %v2324_v16 = vld [vmem:[%s3143_s1 + $0x80] sm:$0xff]   ;;  %v2326_v37 = vld [vmem:[%s3143_s1 + $0x1f8] sm:$0xff]  }
  0x50   : > { %2001 = vmatpush3.bf16.msra.mxu1 %v2304_v60  ;;  %1938 = vmatprep.subr.bf16.mxu0 %v2305_v61  ;;  %v355_v17 = vld [vmem:[%s2595_s8] sm:$0xff]  ;;  %v356_v18 = vld [vmem:[%s2595_s8 + $0x8] sm:$0xff]  ;;  %v2327_v38 = vld [vmem:[%s3143_s1 + $0x138] sm:$0xff]  }
  0x51   : > { %2002 = vmatprep.subr.bf16.mxu1 %v2306_v62  ;;  %v410_v20 = vrot.slane %v355_v17, 1  ;;  %v411_v21 = vrot.slane %v356_v18, 1  ;;  %v359_v24 = vld [vmem:[%s2595_s8 + $0x20] sm:$0xff]  ;;  %v557_v32 = vpack.c.bf16 %v356_v18, %v355_v17  ;;  %v467_v35 = vrot.slane %v355_v17, 2  ;;  %v2328_v42 = vld [vmem:[%s3143_s1 + $0x1b8] sm:$0xff]   ;;  %v361_v47 = vld [vmem:[%s2595_s8 + $0x30] sm:$0xff] }
  0x52   : > { %v416_v27 = vrot.slane %v359_v24, 1  ;;  %v560_v31 = vpack.c.bf16 %v359_v24, %v358_v23  ;;  %v468_v36 = vrot.slane %v356_v18, 2  ;;  %v473_v39 = vrot.slane %v359_v24, 2  ;;  %v360_v43 = vld [vmem:[%s2595_s8 + $0x28] sm:$0x3]  ;;  %v362_v48 = vld [vmem:[%s2595_s8 + $0x38] sm:$0xff] }
  0x53   : > { %1939 = vmatpush3.bf16.msra.mxu0 %v2307_v63  ;;  %v412_v29 = vsel %vm409_vm0, %v410_v20, %v411_v21  ;;  %v414_v30 = vsel %vm409_vm0, %v411_v21, %v413_v22  ;;  %v418_v46 = vrot.slane %v360_v43, 1  ;;  %v475_v49 = vrot.slane %v360_v43, 2  ;;  %v2329_v54 = vld [vmem:[%s3143_s1 + $0x170] sm:$0xff]   ;;  %v363_v62 = vld [vmem:[%s2595_s8 + $0x40] sm:$0x3]  ;;  %v364_v63 = vld [vmem:[%s2595_s8 + $0x48] sm:$0xff] }
  0x54   : > { %2003 = vmatpush3.bf16.msra.mxu1 %v2308_v0  ;;  %1940 = vmatprep.subr.bf16.mxu0 %v2309_v1  ;;  %v558_v34 = vpack.c.bf16 %v414_v30, %v412_v29  ;;  %v469_v40 = vsel %vm466_vm1, %v467_v35, %v468_v36  ;;  %v471_v41 = vsel %vm466_vm1, %v468_v36, %v470_v25  ;;  %v420_v50 = vrot.slane %v361_v47, 1  ;;  %v2330_v58 = vld [vmem:[%s3143_s1 + $0x1f0] sm:$0xff]   ;;  %v366_v18 = vld [vmem:[%s2595_s8 + $0x58] sm:$0x3]  ;;  %v367_v22 = vld [vmem:[%s2595_s8 + $0x60] sm:$0xff] }
  0x55   : > { %2004 = vmatprep.subr.bf16.mxu1 %v2310_v2  ;;  %1299 = vmatprep.mubr.bf16.mxu1 %v560_v31  ;;  %v559_v44 = vpack.c.bf16 %v471_v41, %v469_v40  ;;  %v417_v45 = vsel %vm409_vm0, %v415_v26, %v416_v27  ;;  %v419_v51 = vsel %vm409_vm0, %v416_v27, %v418_v46  ;;  %v421_v52 = vrot.slane %v362_v48, 1  ;;  %v2331_v59 = vld [vmem:[%s3143_s1 + $0x130] sm:$0xff]   ;;  %v368_v23 = vld [vmem:[%s2595_s8 + $0x68] sm:$0xff]  ;;  %v2337_v26 = vld [vmem:[%s3143_s1 + $0x160] sm:$0xff]  }
  0x56   : > { %1202 = vmatprep.mubr.bf16.mxu0 %v558_v34  ;;  %v2623_v53 = vpack.c.bf16 %v362_v48, %v361_v47  ;;  %v2628_v55 = vpack.c.bf16 %v419_v51, %v417_v45  ;;  %v474_v56 = vsel %vm466_vm1, %v472_v28, %v473_v39  ;;  %v476_v57 = vsel %vm466_vm1, %v473_v39, %v475_v49  ;;  %v2332_v61 = vld [vmem:[%s3143_s1 + $0x1b0] sm:$0xff]   ;;  %v2338_v27 = vld [vmem:[%s3143_s1 + $0x1e0] sm:$0xff]   ;;  %v2341_v43 = vld [vmem:[%s3143_s1 + $0x158] sm:$0xff]  }
  0x57   : > { %1941 = vmatpush3.bf16.msra.mxu0 %v2311_v3  ;;  %v477_v60 = vrot.slane %v361_v47, 2  ;;  %v478_v0 = vrot.slane %v362_v48, 2  ;;  %v2645_v1 = vpack.c.bf16 %v476_v57, %v474_v56  ;;  %v422_v2 = vsel %vm409_vm0, %v420_v50, %v421_v52  ;;  %v2340_v34 = vld [vmem:[%s3143_s1 + $0x1a0] sm:$0xff]   ;;  %v369_v35 = vld [vmem:[%s2595_s8 + $0x70] sm:$0x3]  ;;  %v2343_v46 = vld [vmem:[%s3143_s1 + $0x118] sm:$0xff]  }
  0x58   : > { %2005 = vmatpush3.bf16.msra.mxu1 %v2312_v4  ;;  %1942 = vmatprep.subr.bf16.mxu0 %v2313_v5  ;;  %v423_v3 = vrot.slane %v363_v62, 1  ;;  %v365_v4 = vld [vmem:[%s2595_s8 + $0x50] sm:$0xff]  ;;  %v2333_v5 = vld [vmem:[%s3143_s1 + $0x168] sm:$0xff]   ;;  %v428_v21 = vrot.slane %v366_v18, 1  ;;  %v430_v24 = vrot.slane %v367_v22, 1  ;;  %v431_v25 = vrot.slane %v368_v23, 1 }
  0x59   : > { %2006 = vmatprep.subr.bf16.mxu1 %v2314_v6  ;;  %v425_v6 = vrot.slane %v364_v63, 1  ;;  %v483_v19 = vrot.slane %v365_v4, 2  ;;  %v433_v36 = vrot.slane %v369_v35, 1  ;;  %v2703_v39 = vld [vmem:[%s2595_s8 + $0x80] sm:$0xff]  ;;  %v487_v47 = vrot.slane %v367_v22, 2  ;;  %v2344_v51 = vld [vmem:[%s3143_s1 + $0x198] sm:$0xff]  }
  0x5a   : > { %v436_v50 = vrot.slane %v2703_v39, 1  ;;  %v490_v57 = vrot.slane %v369_v35, 2 }
  0x5b   : > { %1943 = vmatpush3.bf16.msra.mxu0 %v2315_v7  ;;  %v2652_v7 = vpack.c.bf16 %v365_v4, %v364_v63 }
  0x5c   : > { %2007 = vmatpush3.bf16.msra.mxu1 %v2316_v8  ;;  %1944 = vmatprep.subr.bf16.mxu0 %v2317_v9  ;;  %v480_v8 = vrot.slane %v363_v62, 2  ;;  %v424_v9 = vsel %vm409_vm0, %v421_v52, %v423_v3  ;;  %v372_v52 = vld [vmem:[%s2595_s8 + $0x88] sm:$0x3]  ;;  %v2348_v3 = vld [vmem:[%s3143_s1 + $0x190] sm:$0xff]  }
  0x5d   : > { %2008 = vmatprep.subr.bf16.mxu1 %v2318_v10  ;;  %v426_v10 = vrot.slane %v365_v4, 1 }
  0x5e   : > { %v481_v17 = vsel %vm466_vm1, %v478_v0, %v480_v8  ;;  %v375_v8 = vld [vmem:[%s2595_s8 + $0xa0] sm:$0x3] }
  0x5f   : > { %1945 = vmatpush3.bf16.msra.mxu0 %v2319_v11  ;;  %v2334_v11 = vld [vmem:[%s3143_s1 + $0x1e8] sm:$0xff]   ;;  %v427_v20 = vsel %vm409_vm0, %v425_v6, %v426_v10  ;;  %v429_v29 = vsel %vm409_vm0, %v426_v10, %v428_v21  ;;  %v374_v6 = vld [vmem:[%s2595_s8 + $0x98] sm:$0xff] }
  0x60   : > { %2009 = vmatpush3.bf16.msra.mxu1 %v2320_v12  ;;  %1946 = vmatprep.subr.bf16.mxu0 %v2321_v13  ;;  %v2658_v12 = vpack.c.bf16 %v424_v9, %v422_v2  ;;  %v2335_v13 = vld [vmem:[%s3143_s1 + $0x128] sm:$0xff]   ;;  %v2684_v30 = vpack.c.bf16 %v429_v29, %v427_v20  ;;  %v493_v9 = vrot.slane %v2703_v39, 2 }
  0x61   : > { %2010 = vmatprep.subr.bf16.mxu1 %v2322_v14  ;;  %v2336_v14 = vld [vmem:[%s3143_s1 + $0x1a8] sm:$0xff]  }
  0x62   : > { %v2351_v20 = vld [vmem:[%s3143_s1 + $0x108] sm:$0xff]  }
  0x63   : > { %1947 = vmatpush3.bf16.msra.mxu0 %v2323_v15  ;;  %v482_v15 = vrot.slane %v364_v63, 2  ;;  %v2347_v63 = vld [vmem:[%s3143_s1 + $0x110] sm:$0xff]   ;;  %v2352_v21 = vld [vmem:[%s3143_s1 + $0x188] sm:$0xff]  }
  0x64   : > { %2011 = vmatpush3.bf16.msra.mxu1 %v2324_v16  ;;  %2060 = vmatprep.subr.bf16.mxu0 %v2325_v33  ;;  %v479_v16 = vsel %vm466_vm1, %v477_v60, %v478_v0  ;;  %v2339_v33 = vld [vmem:[%s3143_s1 + $0x120] sm:$0xff]   ;;  %v2346_v60 = vld [vmem:[%s3143_s1 + $0x1d0] sm:$0xff]  }
  0x65   : > { %2124 = vmatprep.subr.bf16.mxu1 %v2326_v37  ;;  %v2681_v28 = vpack.c.bf16 %v481_v17, %v479_v16  ;;  %v432_v37 = vsel %vm409_vm0, %v430_v24, %v431_v25  ;;  %v484_v40 = vsel %vm466_vm1, %v482_v15, %v483_v19  ;;  %v441_v15 = vrot.slane %v374_v6, 1  ;;  %v2349_v17 = vld [vmem:[%s3143_s1 + $0x148] sm:$0xff]  }
  0x66   : > { %1203 = vmatmul.mubr.bf16.vlgmr.msra.gmra.mxu0 %v557_v32  ;;  %v485_v32 = vrot.slane %v366_v18, 2  ;;  %v443_v16 = vrot.slane %v375_v8, 1  ;;  %v2350_v18 = vld [vmem:[%s3143_s1 + $0x1c8] sm:$0xff]  }
  0x67   : > { %2061 = vmatpush3.bf16.msra.mxu0 %v2327_v38  ;;  %1300 = vmatmul.mubr.bf16.vlgmr.msra.gmra.mxu1 %v559_v44  ;;  %v2700_v38 = vld [vmem:[%s2595_s8 + $0x78] sm:$0xff] }
  0x68   : > { %2125 = vmatpush3.bf16.msra.mxu1 %v2328_v42  ;;  %1307 = vmatprep.mubr.bf16.mxu1 %v2623_v53  ;;  %v486_v41 = vsel %vm466_vm1, %v483_v19, %v485_v32  ;;  %v434_v42 = vsel %vm409_vm0, %v431_v25, %v433_v36  ;;  %v2342_v44 = vld [vmem:[%s3143_s1 + $0x1d8] sm:$0xff]   ;;  %v435_v49 = vrot.slane %v2700_v38, 1  ;;  %v2730_v56 = vpack.c.bf16 %v2703_v39, %v2700_v38  ;;  %v2787_v32 = vld [vmem:[%s2595_s8 + $0xb0] sm:$0xff]  ;;  %v2353_v36 = vld [vmem:[%s3143_s1 + $0x140] sm:$0xff]  }
  0x69   : > { %2062 = vmatprep.subr.bf16.mxu0 %v2329_v54  ;;  %1210 = vmatprep.mubr.bf16.mxu0 %v2628_v55  ;;  %v2715_v45 = vpack.c.bf16 %v434_v42, %v432_v37  ;;  %v2720_v48 = vpack.c.bf16 %v486_v41, %v484_v40  ;;  %v488_v54 = vrot.slane %v368_v23, 2  ;;  %v492_v4 = vrot.slane %v2700_v38, 2  ;;  %v2354_v39 = vld [vmem:[%s3143_s1 + $0x1c0] sm:$0xff]  }
  0x6a   : > { %2126 = vmatprep.subr.bf16.mxu1 %v2330_v58  ;;  %v438_v58 = vrot.slane %v372_v52, 1  ;;  %v444_v25 = vsel %vm409_vm0, %v441_v15, %v443_v16  ;;  %v446_v35 = vrot.slane %v2787_v32, 1  ;;  %v500_v38 = vrot.slane %v375_v8, 2  ;;  %v379_v42 = vld [vmem:[%s2595_s8 + $0xc0] sm:$0xff] }
  0x6b   : > { %2063 = vmatpush3.bf16.msra.mxu0 %v2331_v59  ;;  %v2345_v59 = vld [vmem:[%s3143_s1 + $0x150] sm:$0xff]   ;;  %v489_v0 = vsel %vm466_vm1, %v487_v47, %v488_v54  ;;  %v491_v2 = vsel %vm466_vm1, %v488_v54, %v490_v57  ;;  %v2356_v47 = vld [vmem:[%s3143_s1 + $0x180] sm:$0xff]  }
  0x6c   : > { %2127 = vmatpush3.bf16.msra.mxu1 %v2332_v61  ;;  %2064 = vmatprep.subr.bf16.mxu0 %v2333_v5  ;;  %v437_v61 = vsel %vm409_vm0, %v435_v49, %v436_v50  ;;  %v439_v62 = vsel %vm409_vm0, %v436_v50, %v438_v58  ;;  %v373_v5 = vld [vmem:[%s2595_s8 + $0x90] sm:$0xff]  ;;  %v2821_v49 = vld [vmem:[%s3143_s1 + $0x238] sm:$0xff]  }
  0x6d   : > { %2128 = vmatprep.subr.bf16.mxu1 %v2334_v11  ;;  %v2757_v10 = vpack.c.bf16 %v439_v62, %v437_v61  ;;  %v440_v11 = vrot.slane %v373_v5, 1  ;;  %v2767_v19 = vpack.c.bf16 %v374_v6, %v373_v5  ;;  %v503_v62 = vrot.slane %v2787_v32, 2 }
  0x6e   : > { %1211 = vmatmul.mubr.bf16.gmra.mxu0 %v560_v31  ;;  %v2686_v31 = vpack.c.bf16 %v368_v23, %v367_v22  ;;  %v497_v22 = vrot.slane %v373_v5, 2  ;;  %v498_v23 = vrot.slane %v374_v6, 2 }
  0x6f   : > { %1308 = vmatmul.mubr.bf16.gmra.mxu1 %v2645_v1  ;;  %1218 = vmatprep.mubr.bf16.mxu0 %v2658_v12  ;;  %v442_v24 = vsel %vm409_vm0, %v440_v11, %v441_v15  ;;  %v384_v15 = vld [vmem:[%s2595_s8 + $0xe8] sm:$0x3] }
  0x70   : > { %1315 = vmatprep.mubr.bf16.mxu1 %v2652_v7  ;;  %2065 = vmatpush3.bf16.msra.mxu0 %v2335_v13  ;;  %v495_v13 = vrot.slane %v372_v52, 2  ;;  %v2797_v37 = vpack.c.bf16 %v444_v25, %v442_v24  ;;  %v499_v50 = vsel %vm466_vm1, %v497_v22, %v498_v23  ;;  %v526_v52 = vrot.slane %v379_v42, 1 }
  0x71   : > { %2129 = vmatpush3.bf16.msra.mxu1 %v2336_v14  ;;  %2066 = vmatprep.subr.bf16.mxu0 %v2337_v26  ;;  %v2759_v14 = vpack.c.bf16 %v491_v2, %v489_v0  ;;  %v2781_v26 = vld [vmem:[%s2595_s8 + $0xa8] sm:$0xff]  ;;  %v501_v57 = vsel %vm466_vm1, %v498_v23, %v500_v38 }
  0x72   : > { %2130 = vmatprep.subr.bf16.mxu1 %v2338_v27  ;;  %v494_v27 = vsel %vm466_vm1, %v492_v4, %v493_v9  ;;  %v496_v29 = vsel %vm466_vm1, %v493_v9, %v495_v13  ;;  %v502_v61 = vrot.slane %v2781_v26, 2  ;;  %v2843_v9 = vld [vmem:[%s2595_s8 + $0xd8] sm:$0xff]  ;;  %v2848_v13 = vld [vmem:[%s2595_s8 + $0xe0] sm:$0xff] }
  0x73   : > { %v2802_v40 = vpack.c.bf16 %v496_v29, %v494_v27  ;;  %v543_v16 = vrot.slane %v2843_v9, 1  ;;  %v550_v24 = vrot.slane %v2843_v9, 2  ;;  %v551_v27 = vrot.slane %v2848_v13, 2 }
  0x74   : > { %2067 = vmatpush3.bf16.msra.mxu0 %v2339_v33  ;;  %v445_v33 = vrot.slane %v2781_v26, 1  ;;  %v553_v29 = vrot.slane %v384_v15, 2 }
  0x75   : > { %2131 = vmatpush3.bf16.msra.mxu1 %v2340_v34  ;;  %2068 = vmatprep.subr.bf16.mxu0 %v2341_v43  ;;  %v2791_v34 = vld [vmem:[%s2595_s8 + $0xb8] sm:$0x3]  ;;  %v380_v43 = vld [vmem:[%s2595_s8 + $0xc8] sm:$0xff] }
  0x76   : > { %1219 = vmatmul.mubr.bf16.gmra.mxu0 %v2623_v53  ;;  %2132 = vmatprep.subr.bf16.mxu1 %v2342_v44  ;;  %v448_v41 = vrot.slane %v2791_v34, 1  ;;  %v2355_v44 = vld [vmem:[%s3143_s1 + $0x100] sm:$0xff]   ;;  %v527_v54 = vrot.slane %v380_v43, 1  ;;  %v505_v2 = vrot.slane %v2791_v34, 2  ;;  %v2845_v11 = vpack.c.bf16 %v380_v43, %v379_v42 }
  0x77   : > { %1226 = vmatprep.mubr.bf16.mxu0 %v2684_v30  ;;  %1316 = vmatmul.mubr.bf16.gmra.mxu1 %v2681_v28 }
  0x78   : > { %1323 = vmatprep.mubr.bf16.mxu1 %v2686_v31  ;;  %2069 = vmatpush3.bf16.msra.mxu0 %v2343_v46  ;;  %v2812_v46 = vpack.c.bf16 %v2787_v32, %v2781_v26  ;;  %v449_v58 = vsel %vm409_vm0, %v446_v35, %v448_v41  ;;  %v528_v4 = vsel %vm409_vm0, %v526_v52, %v527_v54  ;;  %v2358_v41 = vld [vmem:[%s3143_s1 + $0x230] sm:$0xff]  }
  0x79   : > { %2133 = vmatpush3.bf16.msra.mxu1 %v2344_v51  ;;  %2070 = vmatprep.subr.bf16.mxu0 %v2345_v59  ;;  %v447_v51 = vsel %vm409_vm0, %v445_v33, %v446_v35  ;;  %v533_v59 = vrot.slane %v379_v42, 2  ;;  %v504_v32 = vsel %vm466_vm1, %v502_v61, %v503_v62  ;;  %v506_v33 = vsel %vm466_vm1, %v503_v62, %v505_v2 }
  0x7a   : > { %2134 = vmatprep.subr.bf16.mxu1 %v2346_v60  ;;  %v534_v60 = vrot.slane %v380_v43, 2  ;;  %v2836_v0 = vpack.c.bf16 %v449_v58, %v447_v51  ;;  %v2876_v35 = vsel %vm466_vm1, %v550_v24, %v551_v27 }
  0x7c   : > { %2071 = vmatpush3.bf16.msra.mxu0 %v2347_v63  ;;  %v2834_v63 = vpack.c.bf16 %v501_v57, %v499_v50  ;;  %v535_v6 = vsel %vm466_vm1, %v533_v59, %v534_v60 }
  0x7d   : > { %2135 = vmatpush3.bf16.msra.mxu1 %v2348_v3  ;;  %2072 = vmatprep.subr.bf16.mxu0 %v2349_v17  ;;  %v381_v3 = vld [vmem:[%s2595_s8 + $0xd0] sm:$0x3] }
  0x7e   : > { %1227 = vmatmul.mubr.bf16.gmra.mxu0 %v2652_v7  ;;  %2136 = vmatprep.subr.bf16.mxu1 %v2350_v18  ;;  %v529_v5 = vrot.slane %v381_v3, 1  ;;  %v536_v8 = vrot.slane %v381_v3, 2 }
  0x7f   : > { %1234 = vmatprep.mubr.bf16.mxu0 %v2715_v45  ;;  %1324 = vmatmul.mubr.bf16.gmra.mxu1 %v2720_v48 }
  0x80   : > { %1331 = vmatprep.mubr.bf16.mxu1 %v2730_v56  ;;  %2073 = vmatpush3.bf16.msra.mxu0 %v2351_v20  ;;  %v530_v17 = vsel %vm409_vm0, %v527_v54, %v529_v5  ;;  %v537_v18 = vsel %vm466_vm1, %v534_v60, %v536_v8  ;;  %v544_v20 = vrot.slane %v2848_v13, 1 }
  0x81   : > { %2137 = vmatpush3.bf16.msra.mxu1 %v2352_v21  ;;  %2074 = vmatprep.subr.bf16.mxu0 %v2353_v36  ;;  %v546_v21 = vrot.slane %v384_v15, 1  ;;  %v2857_v22 = vpack.c.bf16 %v530_v17, %v528_v4  ;;  %v2859_v23 = vpack.c.bf16 %v537_v18, %v535_v6  ;;  %v2879_v36 = vsel %vm466_vm1, %v551_v27, %v553_v29 }
  0x82   : > { %2138 = vmatprep.subr.bf16.mxu1 %v2354_v39  ;;  %v2864_v25 = vsel %vm409_vm0, %v543_v16, %v544_v20  ;;  %v586_v38 = vpack.c.bf16 %v2879_v36, %v2876_v35  ;;  %v2883_v39 = vpack.c.bf16 %v506_v33, %v504_v32 }
  0x83   : > { %v2867_v26 = vsel %vm409_vm0, %v544_v20, %v546_v21 }
  0x84   : > { %2075 = vmatpush3.bf16.msra.mxu0 %v2355_v44  ;;  %v585_v34 = vpack.c.bf16 %v2867_v26, %v2864_v25 }
  0x85   : > { %2204 = vmatprep.subr.bf16.mxu0 %v2821_v49  ;;  %2139 = vmatpush3.bf16.msra.mxu1 %v2356_v47 }
  0x86   : > { %1235 = vmatmul.mubr.bf16.gmra.mxu0 %v2686_v31  ;;  %2236 = vmatprep.subr.bf16.mxu1 %v2821_v49 }
  0x87   : > { %1242 = vmatprep.mubr.bf16.mxu0 %v2757_v10  ;;  %1332 = vmatmul.mubr.bf16.gmra.mxu1 %v2759_v14 }
  0x88   : > { %1339 = vmatprep.mubr.bf16.mxu1 %v2767_v19 }
  0x8e   : > { %1243 = vmatmul.mubr.bf16.gmra.mxu0 %v2730_v56 }
  0x8f   : > { %1250 = vmatprep.mubr.bf16.mxu0 %v2797_v37  ;;  %1340 = vmatmul.mubr.bf16.gmra.mxu1 %v2802_v40 }
  0x90   : > { %1347 = vmatprep.mubr.bf16.mxu1 %v2812_v46 }
  0x96   : > { %1251 = vmatmul.mubr.bf16.gmra.mxu0 %v2767_v19 }
  0x97   : > { %1258 = vmatprep.mubr.bf16.mxu0 %v2836_v0  ;;  %1348 = vmatmul.mubr.bf16.gmra.mxu1 %v2834_v63 }
  0x98   : > { %1355 = vmatprep.mubr.bf16.mxu1 %v2845_v11 }
  0x9e   : > { %1259 = vmatmul.mubr.bf16.gmra.mxu0 %v2812_v46 }
  0x9f   : > { %1396 = vmatprep.mubr.bf16.mxu0 %v2645_v1  ;;  %1356 = vmatmul.mubr.bf16.gmra.mxu1 %v2883_v39  ;;  %v2359_v1 = vld [vmem:[%s3143_s1 + $0x228] sm:$0xff]  }
  0xa0   : > { %1493 = vmatprep.mubr.bf16.mxu1 %v2658_v12 }
  0xa6   : > { %1397 = vmatmul.mubr.bf16.vlgmr.msra.gmra.mxu0 %v2628_v55  ;;  %v2360_v55 = vld [vmem:[%s3143_s1 + $0x220] sm:$0xff]  }
  0xa7   : > { %2205 = vmatpush3.bf16.msra.mxu0 %v2821_v49  ;;  %1404 = vmatprep.mubr.bf16.mxu0 %v2681_v28 }
  0xa8   : > { %1494 = vmatmul.mubr.bf16.vlgmr.msra.gmra.mxu1 %v2623_v53  ;;  %2206 = vmatprep.subr.bf16.mxu0 %v2358_v41  ;;  %v2361_v53 = vld [vmem:[%s3143_s1 + $0x218] sm:$0xff]  }
  0xa9   : > { %2244 = vmatpush3.bf16.msra.mxu1 %v2821_v49  ;;  %1501 = vmatprep.mubr.bf16.mxu1 %v2684_v30 }
  0xaa   : > { %2237 = vmatprep.subr.bf16.mxu1 %v2358_v41 }
  0xab   : > { %2207 = vmatpush3.bf16.msra.mxu0 %v2358_v41 }
  0xac   : > { %2208 = vmatprep.subr.bf16.mxu0 %v2359_v1 }
  0xad   : > { %2245 = vmatpush3.bf16.msra.mxu1 %v2358_v41 }
  0xae   : > { %1405 = vmatmul.mubr.bf16.gmra.mxu0 %v2658_v12  ;;  %2238 = vmatprep.subr.bf16.mxu1 %v2359_v1  ;;  %v2362_v12 = vld [vmem:[%s3143_s1 + $0x210] sm:$0xff]  }
  0xaf   : > { %1412 = vmatprep.mubr.bf16.mxu0 %v2720_v48  ;;  %2209 = vmatpush3.bf16.msra.mxu0 %v2359_v1 }
  0xb0   : > { %1502 = vmatmul.mubr.bf16.gmra.mxu1 %v2652_v7  ;;  %2210 = vmatprep.subr.bf16.mxu0 %v2360_v55  ;;  %v2363_v7 = vld [vmem:[%s3143_s1 + $0x208] sm:$0xff]  }
  0xb1   : > { %1509 = vmatprep.mubr.bf16.mxu1 %v2715_v45  ;;  %2246 = vmatpush3.bf16.msra.mxu1 %v2359_v1 }
  0xb2   : > { %2239 = vmatprep.subr.bf16.mxu1 %v2360_v55 }
  0xb3   : > { %2211 = vmatpush3.bf16.msra.mxu0 %v2360_v55 }
  0xb4   : > { %2212 = vmatprep.subr.bf16.mxu0 %v2361_v53 }
  0xb5   : > { %2247 = vmatpush3.bf16.msra.mxu1 %v2360_v55 }
  0xb6   : > { %1413 = vmatmul.mubr.bf16.gmra.mxu0 %v2684_v30  ;;  %2240 = vmatprep.subr.bf16.mxu1 %v2361_v53  ;;  %v2364_v30 = vld [vmem:[%s3143_s1 + $0x200] sm:$0xff]  }
  0xb7   : > { %1420 = vmatprep.mubr.bf16.mxu0 %v2759_v14  ;;  %2213 = vmatpush3.bf16.msra.mxu0 %v2361_v53 }
  0xb8   : > { %1510 = vmatmul.mubr.bf16.gmra.mxu1 %v2686_v31  ;;  %2214 = vmatprep.subr.bf16.mxu0 %v2362_v12  ;;  %v584_v31 = vpack.c.bf16 %v2848_v13, %v2843_v9 }
  0xb9   : > { %1517 = vmatprep.mubr.bf16.mxu1 %v2757_v10  ;;  %2248 = vmatpush3.bf16.msra.mxu1 %v2361_v53 }
  0xba   : > { %2241 = vmatprep.subr.bf16.mxu1 %v2362_v12 }
  0xbb   : > { %2215 = vmatpush3.bf16.msra.mxu0 %v2362_v12 }
  0xbc   : > { %2216 = vmatprep.subr.bf16.mxu0 %v2363_v7 }
  0xbd   : > { %2249 = vmatpush3.bf16.msra.mxu1 %v2362_v12 }
  0xbe   : > { %1421 = vmatmul.mubr.bf16.gmra.mxu0 %v2715_v45  ;;  %2242 = vmatprep.subr.bf16.mxu1 %v2363_v7 }
  0xbf   : > { %1428 = vmatprep.mubr.bf16.mxu0 %v2802_v40  ;;  %2217 = vmatpush3.bf16.msra.mxu0 %v2363_v7 }
  0xc0   : > { %1518 = vmatmul.mubr.bf16.gmra.mxu1 %v2730_v56  ;;  %2218 = vmatprep.subr.bf16.mxu0 %v2364_v30 }
  0xc1   : > { %1525 = vmatprep.mubr.bf16.mxu1 %v2797_v37  ;;  %2250 = vmatpush3.bf16.msra.mxu1 %v2363_v7 }
  0xc2   : > { %2243 = vmatprep.subr.bf16.mxu1 %v2364_v30 }
  0xc3   : > { %2219 = vmatpush3.bf16.msra.mxu0 %v2364_v30 }
  0xc5   : > { %2251 = vmatpush3.bf16.msra.mxu1 %v2364_v30 }
  0xc6   : > { %1429 = vmatmul.mubr.bf16.gmra.mxu0 %v2757_v10 }
  0xc7   : > { %1436 = vmatprep.mubr.bf16.mxu0 %v2834_v63 }
  0xc8   : > { %1526 = vmatmul.mubr.bf16.gmra.mxu1 %v2767_v19 }
  0xc9   : > { %1533 = vmatprep.mubr.bf16.mxu1 %v2836_v0 }
  0xce   : > { %1437 = vmatmul.mubr.bf16.gmra.mxu0 %v2797_v37 }
  0xcf   : > { %1444 = vmatprep.mubr.bf16.mxu0 %v2883_v39 }
  0xd0   : > { %1534 = vmatmul.mubr.bf16.gmra.mxu1 %v2812_v46 }
  0xd1   : > { %1541 = vmatprep.mubr.bf16.mxu1 %v2857_v22 }
  0xd6   : > { %1445 = vmatmul.mubr.bf16.gmra.mxu0 %v2836_v0 }
  0xd7   : > { %1452 = vmatprep.mubr.bf16.mxu0 %v2859_v23 }
  0xd8   : > { %1542 = vmatmul.mubr.bf16.gmra.mxu1 %v2845_v11 }
  0xd9   : > { %1549 = vmatprep.mubr.bf16.mxu1 %v585_v34 }
  0xde   : > { %1453 = vmatmul.mubr.bf16.gmra.mxu0 %v2857_v22 }
  0xdf   : > { %2220 = vmatprep.mubr.bf16.mxu0 %v2681_v28  ;;  %v2958_v28 = vld [vmem:[%s3144_s2] ss:$0 sm:$0xff] }
  0xe0   : > { %1550 = vmatmul.mubr.bf16.gmra.mxu1 %v584_v31 }
  0xe1   : > { %2228 = vmatprep.mubr.bf16.mxu1 %v2834_v63 }
  0xe6   : > { %2221 = vmatmul.mubr.bf16.vlgmr.msra.gmra.mxu0 %v2720_v48 }
  0xe7   : > { %2224 = vmatprep.mubr.bf16.mxu0 %v2759_v14 }
  0xe8   : > { %2229 = vmatmul.mubr.bf16.vlgmr.msra.gmra.mxu1 %v2883_v39 }
  0xe9   : > { %2232 = vmatprep.mubr.bf16.mxu1 %v2859_v23 }
  0xee   : > { %2225 = vmatmul.mubr.bf16.gmra.mxu0 %v2802_v40 }
  0xf0   : > { %2233 = vmatmul.mubr.bf16.gmra.mxu1 %v586_v38 }
 0x126   : > { %v1948_v45 = vpop.f32.mrf.mxu0 }
 0x127   : > { %v2012_v56 = vpop.f32.mrf.mxu1 }
 0x128   : > { %v1949_v48 = vpop.f32.mrf.mxu0 }
 0x129   : > { %v1950_v10 = vadd.f32 %v1949_v48, %v1948_v45  ;;  %v2013_v14 = vpop.f32.mrf.mxu1 }
 0x12a   : > { %v1951_v19 = vpop.f32.mrf.mxu0  ;;  %v2014_v42 = vadd.f32 %v2013_v14, %v2012_v56 }
 0x12b   : > { %v1205_v37 = vadd.f32 %v1950_v10, %v2958_v28  ;;  %v2015_v43 = vpop.f32.mrf.mxu1 }
 0x12c   : > { %v1952_v40 = vpop.f32.mrf.mxu0 }
 0x12d   : > { %v2961_v44 = vadd.f32 %v2014_v42, %v1205_v37  ;;  %v1953_v46 = vadd.f32 %v1952_v40, %v1951_v19  ;;  %v2016_v47 = vpop.f32.mrf.mxu1 }
 0x12e   : > { %v1954_v49 = vpop.f32.mrf.mxu0  ;;  %v2017_v51 = vadd.f32 %v2016_v47, %v2015_v43 }
 0x12f   : > { %v1208_v50 = vadd.f32 %v1953_v46, %v2958_v28  ;;  %v2018_v52 = vpop.f32.mrf.mxu1 }
 0x130   : > { %v1955_v54 = vpop.f32.mrf.mxu0 }
 0x131   : > { %v2964_v57 = vadd.f32 %v2017_v51, %v1208_v50  ;;  %v1956_v58 = vadd.f32 %v1955_v54, %v1954_v49  ;;  %v2019_v59 = vpop.f32.mrf.mxu1 }
 0x132   : > { %v1957_v60 = vpop.f32.mrf.mxu0  ;;  %v2020_v62 = vadd.f32 %v2019_v59, %v2018_v52 }
 0x133   : > { %v1213_v61 = vadd.f32 %v1956_v58, %v2958_v28  ;;  %v2021_v63 = vpop.f32.mrf.mxu1 }
 0x134   : > { %v1958_v0 = vpop.f32.mrf.mxu0 }
 0x135   : > { %v2967_v2 = vadd.f32 %v2020_v62, %v1213_v61  ;;  %v1959_v3 = vadd.f32 %v1958_v0, %v1957_v60  ;;  %v2022_v4 = vpop.f32.mrf.mxu1 }
 0x136   : > { %v1960_v5 = vpop.f32.mrf.mxu0  ;;  %v2023_v8 = vadd.f32 %v2022_v4, %v2021_v63 }
 0x137   : > { %v1216_v6 = vadd.f32 %v1959_v3, %v2958_v28  ;;  %v2024_v9 = vpop.f32.mrf.mxu1 }
 0x138   : > { %v1961_v11 = vpop.f32.mrf.mxu0 }
 0x139   : > { %v2970_v13 = vadd.f32 %v2023_v8, %v1216_v6  ;;  %v1962_v15 = vadd.f32 %v1961_v11, %v1960_v5  ;;  %v2025_v16 = vpop.f32.mrf.mxu1 }
 0x13a   : > { %v1963_v17 = vpop.f32.mrf.mxu0  ;;  %v2026_v20 = vadd.f32 %v2025_v16, %v2024_v9 }
 0x13b   : > { %v1221_v18 = vadd.f32 %v1962_v15, %v2958_v28  ;;  %v2027_v21 = vpop.f32.mrf.mxu1 }
 0x13c   : > { %v1964_v22 = vpop.f32.mrf.mxu0 }
 0x13d   : > { %v2973_v23 = vadd.f32 %v2026_v20, %v1221_v18  ;;  %v1965_v24 = vadd.f32 %v1964_v22, %v1963_v17  ;;  %v2028_v25 = vpop.f32.mrf.mxu1 }
 0x13e   : > { %v1966_v26 = vpop.f32.mrf.mxu0  ;;  %v2029_v29 = vadd.f32 %v2028_v25, %v2027_v21 }
 0x13f   : > { %v1224_v27 = vadd.f32 %v1965_v24, %v2958_v28  ;;  %v2030_v32 = vpop.f32.mrf.mxu1 }
 0x140   : > { %v1967_v33 = vpop.f32.mrf.mxu0 }
 0x141   : > { %v2976_v34 = vadd.f32 %v2029_v29, %v1224_v27  ;;  %v1968_v35 = vadd.f32 %v1967_v33, %v1966_v26  ;;  %v2031_v36 = vpop.f32.mrf.mxu1 }
 0x142   : > { %v1969_v38 = vpop.f32.mrf.mxu0  ;;  %v2032_v41 = vadd.f32 %v2031_v36, %v2030_v32 }
 0x143   : > { %3146 = vst [vmem:[#allocation3_spill] sm:$0xff] %v2976_v34  ;;  %v1229_v39 = vadd.f32 %v1968_v35, %v2958_v28  ;;  %v2033_v1 = vpop.f32.mrf.mxu1 }
 0x144   : > { %v1970_v55 = vpop.f32.mrf.mxu0 }
 0x145   : > { %v2979_v53 = vadd.f32 %v2032_v41, %v1229_v39  ;;  %v1971_v12 = vadd.f32 %v1970_v55, %v1969_v38  ;;  %v2034_v7 = vpop.f32.mrf.mxu1 }
 0x146   : > { %v1972_v30 = vpop.f32.mrf.mxu0  ;;  %v2035_v45 = vadd.f32 %v2034_v7, %v2033_v1 }
 0x147   : > { %v1232_v31 = vadd.f32 %v1971_v12, %v2958_v28  ;;  %v2036_v56 = vpop.f32.mrf.mxu1 }
 0x148   : > { %v1973_v48 = vpop.f32.mrf.mxu0 }
 0x149   : > { %v2982_v10 = vadd.f32 %v2035_v45, %v1232_v31  ;;  %v1974_v14 = vadd.f32 %v1973_v48, %v1972_v30  ;;  %v2037_v19 = vpop.f32.mrf.mxu1 }
 0x14a   : > { %v1975_v37 = vpop.f32.mrf.mxu0  ;;  %v2038_v43 = vadd.f32 %v2037_v19, %v2036_v56 }
 0x14b   : > { %3147 = vst [vmem:[#allocation4_spill] sm:$0xff] %v2982_v10  ;;  %v1237_v42 = vadd.f32 %v1974_v14, %v2958_v28  ;;  %v2039_v40 = vpop.f32.mrf.mxu1 }
 0x14c   : > { %v1976_v46 = vpop.f32.mrf.mxu0 }
 0x14d   : > { %v2985_v47 = vadd.f32 %v2038_v43, %v1237_v42  ;;  %v1977_v49 = vadd.f32 %v1976_v46, %v1975_v37  ;;  %v2040_v50 = vpop.f32.mrf.mxu1 }
 0x14e   : > { %v1978_v51 = vpop.f32.mrf.mxu0  ;;  %v2041_v54 = vadd.f32 %v2040_v50, %v2039_v40 }
 0x14f   : > { %v1240_v52 = vadd.f32 %v1977_v49, %v2958_v28  ;;  %v2042_v58 = vpop.f32.mrf.mxu1 }
 0x150   : > { %v1979_v59 = vpop.f32.mrf.mxu0 }
 0x151   : > { %v2988_v60 = vadd.f32 %v2041_v54, %v1240_v52  ;;  %v1980_v61 = vadd.f32 %v1979_v59, %v1978_v51  ;;  %v2043_v62 = vpop.f32.mrf.mxu1 }
 0x152   : > { %v1981_v63 = vpop.f32.mrf.mxu0  ;;  %v2044_v3 = vadd.f32 %v2043_v62, %v2042_v58 }
 0x153   : > { %v1245_v0 = vadd.f32 %v1980_v61, %v2958_v28  ;;  %v2045_v4 = vpop.f32.mrf.mxu1 }
 0x154   : > { %v1982_v5 = vpop.f32.mrf.mxu0 }
 0x155   : > { %v2991_v6 = vadd.f32 %v2044_v3, %v1245_v0  ;;  %v1983_v8 = vadd.f32 %v1982_v5, %v1981_v63  ;;  %v2046_v9 = vpop.f32.mrf.mxu1 }
 0x156   : > { %v1984_v11 = vpop.f32.mrf.mxu0  ;;  %v2047_v16 = vadd.f32 %v2046_v9, %v2045_v4 }
 0x157   : > { %v1248_v15 = vadd.f32 %v1983_v8, %v2958_v28  ;;  %v2048_v17 = vpop.f32.mrf.mxu1 }
 0x158   : > { %v1985_v18 = vpop.f32.mrf.mxu0 }
 0x159   : > { %v2994_v20 = vadd.f32 %v2047_v16, %v1248_v15  ;;  %v1986_v21 = vadd.f32 %v1985_v18, %v1984_v11  ;;  %v2049_v22 = vpop.f32.mrf.mxu1 }
 0x15a   : > { %v1987_v24 = vpop.f32.mrf.mxu0  ;;  %v2050_v26 = vadd.f32 %v2049_v22, %v2048_v17 }
 0x15b   : > { %v1253_v25 = vadd.f32 %v1986_v21, %v2958_v28  ;;  %v2051_v27 = vpop.f32.mrf.mxu1 }
 0x15c   : > { %v1988_v29 = vpop.f32.mrf.mxu0 }
 0x15d   : > { %v2997_v32 = vadd.f32 %v2050_v26, %v1253_v25  ;;  %v1989_v33 = vadd.f32 %v1988_v29, %v1987_v24  ;;  %v2052_v35 = vpop.f32.mrf.mxu1 }
 0x15e   : > { %v1990_v36 = vpop.f32.mrf.mxu0  ;;  %v2053_v39 = vadd.f32 %v2052_v35, %v2051_v27 }
 0x15f   : > { %3148 = vst [vmem:[#allocation5_spill] sm:$0xff] %v2997_v32  ;;  %v1256_v38 = vadd.f32 %v1989_v33, %v2958_v28  ;;  %v2054_v41 = vpop.f32.mrf.mxu1 }
 0x160   : > { %v1991_v1 = vpop.f32.mrf.mxu0 }
 0x161   : > { %v3000_v55 = vadd.f32 %v2053_v39, %v1256_v38  ;;  %v1992_v12 = vadd.f32 %v1991_v1, %v1990_v36  ;;  %v2055_v7 = vpop.f32.mrf.mxu1 }
 0x162   : > { %v1993_v30 = vpop.f32.mrf.mxu0  ;;  %v2056_v45 = vadd.f32 %v2055_v7, %v2054_v41 }
 0x163   : > { %3149 = vst [vmem:[#allocation6_spill] sm:$0xff] %v3000_v55  ;;  %v1261_v31 = vadd.f32 %v1992_v12, %v2958_v28  ;;  %v2057_v56 = vpop.f32.mrf.mxu1 }
 0x164   : > { %v1994_v48 = vpop.f32.mrf.mxu0 }
 0x165   : > { %v3003_v14 = vadd.f32 %v2056_v45, %v1261_v31  ;;  %v1995_v19 = vadd.f32 %v1994_v48, %v1993_v30  ;;  %v2058_v37 = vpop.f32.mrf.mxu1 }
 0x166   : > { %v2076_v42 = vpop.f32.mrf.mxu0  ;;  %v2059_v40 = vadd.f32 %v2058_v37, %v2057_v56 }
 0x167   : > { %3150 = vst [vmem:[#allocation7_spill] sm:$0xff] %v3003_v14  ;;  %v1264_v43 = vadd.f32 %v1995_v19, %v2958_v28 }
 0x168   : > { %v3006_v46 = vpop.f32.mrf.mxu1  ;;  %v2077_v49 = vpop.f32.mrf.mxu0 }
 0x169   : > { %v3008_v50 = vadd.f32 %v2059_v40, %v1264_v43 }
 0x16a   : > { %v2141_v51 = vpop.f32.mrf.mxu1  ;;  %v2079_v52 = vpop.f32.mrf.mxu0 }
 0x16b   : > { %3151 = vst [vmem:[#allocation8_spill] sm:$0xff] %v3008_v50 }
 0x16c   : > { %v3010_v54 = vpop.f32.mrf.mxu1  ;;  %v2080_v58 = vpop.f32.mrf.mxu0 }
 0x16d   : > { %v2081_v10 = vadd.f32 %v2080_v58, %v2079_v52 }
 0x16e   : > { %v3012_v59 = vpop.f32.mrf.mxu1  ;;  %v2082_v61 = vpop.f32.mrf.mxu0 }
 0x170   : > { %v3014_v62 = vpop.f32.mrf.mxu1  ;;  %v2083_v63 = vpop.f32.mrf.mxu0 }
 0x171   : > { %v2084_v14 = vadd.f32 %v2083_v63, %v2082_v61 }
 0x172   : > { %v3016_v0 = vpop.f32.mrf.mxu1  ;;  %v2085_v28 = vpop.f32.mrf.mxu0 }
 0x174   : > { %v3018_v3 = vpop.f32.mrf.mxu1  ;;  %v2086_v4 = vpop.f32.mrf.mxu0 }
 0x176   : > { %v3020_v5 = vpop.f32.mrf.mxu1  ;;  %v2088_v8 = vpop.f32.mrf.mxu0 }
 0x178   : > { %v3022_v9 = vpop.f32.mrf.mxu1  ;;  %v2089_v11 = vpop.f32.mrf.mxu0 }
 0x179   : > { %v2090_v58 = vadd.f32 %v2089_v11, %v2088_v8 }
 0x17a   : > { %v3024_v15 = vpop.f32.mrf.mxu1  ;;  %v3026_v16 = vpop.f32.mrf.mxu0 }
 0x17b   : > { %3152 = vst [vmem:[#allocation9_spill] sm:$0xff] %v3026_v16 }
 0x17c   : > { %v3028_v17 = vpop.f32.mrf.mxu1  ;;  %v3030_v18 = vpop.f32.mrf.mxu0 }
 0x17d   : > { %3153 = vst [vmem:[#allocation10_spill] sm:$0xff] %v3028_v17  ;;  %3154 = vst [vmem:[#allocation11_spill] sm:$0xff] %v3030_v18 }
 0x17e   : > { %v3032_v21 = vpop.f32.mrf.mxu1  ;;  %v2094_v22 = vpop.f32.mrf.mxu0 }
 0x17f   : > { %3155 = vst [vmem:[#allocation12_spill] sm:$0xff] %v3032_v21 }
 0x180   : > { %v3034_v24 = vpop.f32.mrf.mxu1  ;;  %v2095_v25 = vpop.f32.mrf.mxu0 }
 0x181   : > { %3156 = vst [vmem:[#allocation13_spill] sm:$0xff] %v3034_v24  ;;  %v2096_v61 = vadd.f32 %v2095_v25, %v2094_v22 }
 0x182   : > { %v3036_v26 = vpop.f32.mrf.mxu1  ;;  %v3038_v27 = vpop.f32.mrf.mxu0 }
 0x183   : > { %3157 = vst [vmem:[#allocation14_spill] sm:$0xff] %v3036_v26 }
 0x184   : > { %v3040_v29 = vpop.f32.mrf.mxu1  ;;  %v3042_v33 = vpop.f32.mrf.mxu0 }
 0x185   : > { %3158 = vst [vmem:[#allocation15_spill] sm:$0xff] %v3040_v29  ;;  %v2078_v29 = vadd.f32 %v2077_v49, %v2076_v42  ;;  %v1402_v42 = vadd.f32 %v2081_v10, %v2964_v57  ;;  %v1407_v49 = vadd.f32 %v2084_v14, %v2967_v2  ;;  %v2151_v57 = vadd.f32 %v3020_v5, %v3018_v3 }
 0x186   : > { %v3044_v35 = vpop.f32.mrf.mxu1  ;;  %v2100_v36 = vpop.f32.mrf.mxu0 }
 0x187   : > { %3159 = vst [vmem:[#allocation16_spill] sm:$0xff] %v3044_v35  ;;  %v1399_v18 = vadd.f32 %v2078_v29, %v2961_v44  ;;  %v2145_v44 = vadd.f32 %v3012_v59, %v3010_v54  ;;  %v2148_v29 = vadd.f32 %v3016_v0, %v3014_v62  ;;  %v1415_v54 = vadd.f32 %v2090_v58, %v2973_v23 }
 0x188   : > { %v2164_v38 = vpop.f32.mrf.mxu1  ;;  %v2101_v39 = vpop.f32.mrf.mxu0  ;;  %v1423_v59 = vadd.f32 %v2096_v61, %v2979_v53 }
 0x189   : > { %v1504_v11 = vadd.f32 %v2148_v29, %v1407_v49  ;;  %v1499_v22 = vadd.f32 %v2145_v44, %v1402_v42 }
 0x18a   : > { %v2165_v41 = vpop.f32.mrf.mxu1  ;;  %v2103_v1 = vpop.f32.mrf.mxu0 }
 0x18b   : > { %v2166_v5 = vadd.f32 %v2165_v41, %v2164_v38  ;;  %v3166_v41 = vld [vmem:[#allocation11_spill] sm:$0xff] }
 0x18c   : > { %v3046_v12 = vpop.f32.mrf.mxu1  ;;  %v2104_v7 = vpop.f32.mrf.mxu0 }
 0x18d   : > { %3160 = vst [vmem:[#allocation17_spill] sm:$0xff] %v3046_v12  ;;  %v2105_v2 = vadd.f32 %v2104_v7, %v2103_v1  ;;  %v3167_v7 = vld [vmem:[#allocation13_spill] sm:$0xff] }
 0x18e   : > { %v3048_v30 = vpop.f32.mrf.mxu1  ;;  %v2106_v31 = vpop.f32.mrf.mxu0 }
 0x18f   : > { %3161 = vst [vmem:[#allocation18_spill] sm:$0xff] %v3048_v30  ;;  %v2087_v30 = vadd.f32 %v2086_v4, %v2085_v28 }
 0x190   : > { %v2170_v45 = vpop.f32.mrf.mxu1  ;;  %v2107_v56 = vpop.f32.mrf.mxu0 }
 0x191   : > { %v2108_v24 = vadd.f32 %v2107_v56, %v2106_v31  ;;  %v1410_v52 = vadd.f32 %v2087_v30, %v2970_v13  ;;  %v3171_v56 = vld [vmem:[#allocation7_spill] sm:$0xff] }
 0x192   : > { %v2171_v48 = vpop.f32.mrf.mxu1  ;;  %v2109_v19 = vpop.f32.mrf.mxu0 }
 0x193   : > { %v2172_v8 = vadd.f32 %v2171_v48, %v2170_v45  ;;  %v1507_v3 = vadd.f32 %v2151_v57, %v1410_v52 }
 0x194   : > { %v2173_v37 = vpop.f32.mrf.mxu1  ;;  %v2110_v43 = vpop.f32.mrf.mxu0 }
 0x195   : > { %v2111_v63 = vadd.f32 %v2110_v43, %v2109_v19 }
 0x196   : > { %v2174_v40 = vpop.f32.mrf.mxu1  ;;  %v2112_v55 = vpop.f32.mrf.mxu0  ;;  %v3170_v30 = vld [vmem:[#allocation18_spill] sm:$0xff] }
 0x198   : > { %v3050_v21 = vpop.f32.mrf.mxu1  ;;  %v2113_v17 = vpop.f32.mrf.mxu0 }
 0x199   : > { %3162 = vst [vmem:[#allocation19_spill] sm:$0xff] %v3050_v21 }
 0x19a   : > { %v3052_v50 = vpop.f32.mrf.mxu1  ;;  %v3054_v35 = vpop.f32.mrf.mxu0 }
 0x19b   : > { %3163 = vst [vmem:[#allocation20_spill] sm:$0xff] %v3052_v50  ;;  %v2142_v50 = vadd.f32 %v2141_v51, %v3006_v46  ;;  %v1439_v46 = vadd.f32 %v2108_v24, %v2991_v6  ;;  %v1442_v6 = vadd.f32 %v2111_v63, %v2994_v20  ;;  %v2154_v20 = vadd.f32 %v3024_v15, %v3022_v9 }
 0x19c   : > { %v3056_v34 = vpop.f32.mrf.mxu1  ;;  %v3058_v32 = vpop.f32.mrf.mxu0 }
 0x19d   : > { %3164 = vst [vmem:[#allocation21_spill] sm:$0xff] %v3056_v34  ;;  %v2102_v34 = vadd.f32 %v2101_v39, %v2100_v36  ;;  %v1496_v14 = vadd.f32 %v2142_v50, %v1399_v18  ;;  %v1536_v36 = vadd.f32 %v2172_v8, %v1439_v46  ;;  %v2175_v50 = vadd.f32 %v2174_v40, %v2173_v37  ;;  %v3172_v37 = vld [vmem:[#allocation4_spill] sm:$0xff]  ;;  %v3173_v40 = vld [vmem:[#allocation5_spill] sm:$0xff]  ;;  %v3174_v46 = vld [vmem:[#allocation3_spill] sm:$0xff] }
 0x19e   : > { %v3060_v12 = vpop.f32.mrf.mxu1  ;;  %v2118_v26 = vpop.f32.mrf.mxu0  ;;  %v2114_v18 = vadd.f32 %v2113_v17, %v2112_v55  ;;  %v2117_v63 = vadd.f32 %v3058_v32, %v3054_v35  ;;  %v3179_v32 = vld [vmem:[#allocation8_spill] sm:$0xff] }
 0x19f   : > { %v1431_v51 = vadd.f32 %v2102_v34, %v2985_v47  ;;  %v2099_v34 = vadd.f32 %v3042_v33, %v3038_v27  ;;  %v1434_v47 = vadd.f32 %v2105_v2, %v2988_v60  ;;  %v3168_v27 = vld [vmem:[#allocation14_spill] sm:$0xff]  ;;  %v3169_v60 = vld [vmem:[#allocation17_spill] sm:$0xff]  ;;  %v1539_v45 = vadd.f32 %v2175_v50, %v1442_v6  ;;  %v3175_v2 = vld [vmem:[#allocation15_spill] sm:$0xff] }
 0x1a0   : > { %v3063_v21 = vpop.f32.mrf.mxu1  ;;  %v2119_v16 = vpop.f32.mrf.mxu0  ;;  %v2160_v33 = vadd.f32 %v3168_v27, %v3167_v7  ;;  %v2169_v55 = vadd.f32 %v3170_v30, %v3169_v60  ;;  %v1447_v42 = vadd.f32 %v2114_v18, %v3173_v40  ;;  %v3182_v50 = vld [vmem:[#allocation6_spill] sm:$0xff] }
 0x1a1   : > { %v2120_v24 = vadd.f32 %v2119_v16, %v2118_v26  ;;  %v1528_v16 = vadd.f32 %v2166_v5, %v1431_v51  ;;  %v3165_v26 = vld [vmem:[#allocation9_spill] sm:$0xff]  ;;  %v1426_v43 = vadd.f32 %v2099_v34, %v3172_v37  ;;  %v3177_v51 = vld [vmem:[#allocation19_spill] sm:$0xff]  ;;  %v3181_v5 = vld [vmem:[#allocation12_spill] sm:$0xff]  ;;  %v1450_v18 = vadd.f32 %v2117_v63, %v3182_v50 }
 0x1a2   : > { %v2183_v28 = vpop.f32.mrf.mxu1  ;;  %v2121_v4 = vpop.f32.mrf.mxu0  ;;  %v2093_v1 = vadd.f32 %v3166_v41, %v3165_v26  ;;  %v1531_v58 = vadd.f32 %v2169_v55, %v1434_v47  ;;  %v1520_v61 = vadd.f32 %v2160_v33, %v1423_v59  ;;  %v3178_v8 = vld [vmem:[#allocation20_spill] sm:$0xff] }
 0x1a3   : > { %v1455_v9 = vadd.f32 %v2120_v24, %v3171_v56  ;;  %v2184_v44 = vadd.f32 %v2183_v28, %v3063_v21 }
 0x1a4   : > { %v3076_v10 = vpop.f32.mrf.mxu1  ;;  %v2122_v13 = vpop.f32.mrf.mxu0  ;;  %v1418_v57 = vadd.f32 %v2093_v1, %v3174_v46 }
 0x1a5   : > { %v2123_v15 = vadd.f32 %v2122_v13, %v2121_v4  ;;  %v3176_v13 = vld [vmem:[#allocation16_spill] sm:$0xff] }
 0x1a6   : > { %v2186_v62 = vpop.f32.mrf.mxu1  ;;  %v2222_v0 = vpop.f32.mrf.mxu0 }
 0x1a7   : > { %v1601_v25 = vadd.f32 %v2222_v0, %v1504_v11  ;;  %v2178_v11 = vadd.f32 %v3178_v8, %v3177_v51  ;;  %v1512_v0 = vadd.f32 %v2154_v20, %v1415_v54  ;;  %v1458_v35 = vadd.f32 %v2123_v15, %v3179_v32 }
 0x1a8   : > { %v2230_v23 = vpop.f32.mrf.mxu1  ;;  %v1592_v53 = vpop.f32.mrf.mxu0  ;;  %v2187_v54 = vadd.f32 %v2186_v62, %v3076_v10 }
 0x1a9   : > { %1657 = vst [vmem:[%s2467_s30 + $0x10] sm:$0xff] %v1601_v25  ;;  %v1633_v39 = vadd.f32 %v2230_v23, %v1536_v36  ;;  %v1593_v38 = vadd.f32 %v1592_v53, %v1496_v14  ;;  %v2163_v14 = vadd.f32 %v3176_v13, %v3175_v2  ;;  %v1544_v34 = vadd.f32 %v2178_v11, %v1447_v42 }
 0x1aa   : > { %v1624_v17 = vpop.f32.mrf.mxu1  ;;  %v2223_v31 = vpop.f32.mrf.mxu0  ;;  %v1555_v10 = vadd.f32 %v2187_v54, %v1458_v35 }
 0x1ab   : > { %1665 = vst [vmem:[%s2467_s30 + $0x50] sm:$0xff] %v1633_v39  ;;  %1655 = vst [vmem:[%s2467_s30] sm:$0xff] %v1593_v38  ;;  %v1625_v48 = vadd.f32 %v1624_v17, %v1528_v16  ;;  %v1604_v19 = vadd.f32 %v2223_v31, %v1507_v3  ;;  %v3180_v3 = vld [vmem:[#allocation10_spill] sm:$0xff]  ;;  %v1523_v47 = vadd.f32 %v2163_v14, %v1426_v43  ;;  %v3183_v16 = vld [vmem:[#allocation21_spill] sm:$0xff] }
 0x1ac   : > { %v2231_v49 = vpop.f32.mrf.mxu1  ;;  %v1595_v52 = vpop.f32.mrf.mxu0  ;;  %v2157_v24 = vadd.f32 %v3181_v5, %v3180_v3  ;;  %v2181_v26 = vadd.f32 %v3060_v12, %v3183_v16 }
 0x1ad   : > { %1663 = vst [vmem:[%s2467_s30 + $0x40] sm:$0xff] %v1625_v48  ;;  %1658 = vst [vmem:[%s2467_s30 + $0x18] sm:$0xff] %v1604_v19  ;;  %v1636_v4 = vadd.f32 %v2231_v49, %v1539_v45  ;;  %v1596_v29 = vadd.f32 %v1595_v52, %v1499_v22  ;;  %v1552_v22 = vadd.f32 %v2184_v44, %v1455_v9 }
 0x1ae   : > { %v1627_v6 = vpop.f32.mrf.mxu1  ;;  %v2226_v59 = vpop.f32.mrf.mxu0  ;;  %v1515_v38 = vadd.f32 %v2157_v24, %v1418_v57  ;;  %v1547_v60 = vadd.f32 %v2181_v26, %v1450_v18 }
 0x1af   : > { %1666 = vst [vmem:[%s2467_s30 + $0x58] sm:$0xff] %v1636_v4  ;;  %1656 = vst [vmem:[%s2467_s30 + $0x8] sm:$0xff] %v1596_v29  ;;  %v1628_v21 = vadd.f32 %v1627_v6, %v1531_v58  ;;  %v1617_v28 = vadd.f32 %v2226_v59, %v1520_v61 }
 0x1b0   : > { %v2234_v25 = vpop.f32.mrf.mxu1  ;;  %v1608_v36 = vpop.f32.mrf.mxu0 }
 0x1b1   : > { %1664 = vst [vmem:[%s2467_s30 + $0x48] sm:$0xff] %v1628_v21  ;;  %1661 = vst [vmem:[%s2467_s30 + $0x30] sm:$0xff] %v1617_v28  ;;  %v1649_v23 = vadd.f32 %v2234_v25, %v1552_v22  ;;  %v1609_v53 = vadd.f32 %v1608_v36, %v1512_v0 }
 0x1b2   : > { %v1640_v20 = vpop.f32.mrf.mxu1  ;;  %v2227_v39 = vpop.f32.mrf.mxu0 }
 0x1b3   : > { %1669 = vst [vmem:[%s2467_s30 + $0x70] sm:$0xff] %v1649_v23  ;;  %1659 = vst [vmem:[%s2467_s30 + $0x20] sm:$0xff] %v1609_v53  ;;  %v1641_v41 = vadd.f32 %v1640_v20, %v1544_v34  ;;  %v1620_v1 = vadd.f32 %v2227_v39, %v1523_v47 }
 0x1b4   : > { %v2235_v62 = vpop.f32.mrf.mxu1  ;;  %v1611_v7 = vpop.f32.mrf.mxu0 }
 0x1b5   : > { %1667 = vst [vmem:[%s2467_s30 + $0x60] sm:$0xff] %v1641_v41  ;;  %1662 = vst [vmem:[%s2467_s30 + $0x38] sm:$0xff] %v1620_v1  ;;  %v1652_v27 = vadd.f32 %v2235_v62, %v1555_v10  ;;  %v1612_v33 = vadd.f32 %v1611_v7, %v1515_v38 }
 0x1b6   : > { %v1643_v30 = vpop.f32.mrf.mxu1 }
 0x1b7   : > { %1670 = vst [vmem:[%s2467_s30 + $0x78] sm:$0xff] %v1652_v27  ;;  %1660 = vst [vmem:[%s2467_s30 + $0x28] sm:$0xff] %v1612_v33  ;;  %v1644_v55 = vadd.f32 %v1643_v30, %v1547_v60 }
 0x1b9   : > { %1668 = vst [vmem:[%s2467_s30 + $0x68] sm:$0xff] %v1644_v55 }
 0x1ba PF: > { %s13_s16 = sadd.s32 1, %s2403_s16   ;;  %s3184_s12 = smov %s2395_s14 }
 0x1bb   : > { %p10_p8 = scmp.ge.s32.totalorder %s13_s16, 6   ;;  %s3185_s13 = smov %s2399_s15 }
 0x1bc   : > { %s3186_s14 = smov %s3189_s17  ;;  %s3187_s15 = smov %s3193_s18 }
 0x1bd   :  { %12 = sbr.rel (!%p10_p8) target bundleno = 3 (0x3), region = 68 }

// kernel: regression_model_forward.5
= control target key start
LH: loop header
LB: loop body
LE: loop exit
PB: predicated region body
PF: predicated region fallthrough
CT: control target
= control target key end

     0   :  { %s2585_s12 = smov 0   ;;  %s2587_s13 = smov 0   ;;  %s3278_s0 = inlined_call_operand.vmem [shape: bf16[2,16,16,128], index: 0, kind: input, shape index: {}]   ;;  %s3279_s1 = inlined_call_operand.vmem [shape: bf16[1152,128], index: 1, kind: input, shape index: {}]   ;;  %s3280_s2 = inlined_call_operand.vmem [shape: f32[1,128], index: 2, kind: input, shape index: {}]   ;;  %s3281_s3 = inlined_call_operand.vmem [shape: bf16[2,16,16,128], index: 3, kind: output, shape index: {}]  }
   0x1   :  { %s2589_s14 = smov 0   ;;  %s2591_s15 = smov 0  }
   0x2   :  { %s2593_s16 = smov 0  }
   0x3 LB: > { %s22_s17 = sadd.s32 1, %s2554_s14  ;;  %s25_s18 = sadd.s32 1, %s2558_s15  ;;  %s2562_s16 = sphi %s2593_s16, %s13_s16   ;;  %s2558_s15 = sphi %s2591_s15, %s3315_s15   ;;  %s2554_s14 = sphi %s2589_s14, %s3314_s14   ;;  %s2550_s13 = sphi %s2587_s13, %s3313_s13   ;;  %s2546_s12 = sphi %s2585_s12, %s3312_s12  }
   0x4   : > { %p23_p0 = scmp.ge.s32.totalorder %s22_s17, 2  ;;  %p1847_p1 = scmp.ge.s32.totalorder %s2562_s16, 1 }
   0x5   : > { %p151_p2 = scmp.lt.s32.totalorder %s2562_s16, 5 }
   0x6   : > { %s3317_s17 = smov (%p23_p0, %s22_s17), 0  ;;  %s3319_s18 = smov (!%p23_p0, %s25_s18), %s2558_s15 }
   0x7   : > { %p152_p3 = pnand %p1847_p1, %p151_p2  ;;  %p27_p4 = scmp.ge.s32.totalorder %s3319_s18, 2 }
   0x9   : > { %s3321_s18 = smov (%p27_p4, %s3319_s18), 0  ;;  %155 = sbr.rel (%p152_p3) target bundleno = 446 (0x1be), region = 32 }
   0xe   : > { %p180_p5 = scmp.lt.s32.totalorder %s2550_s13, 1  ;;  %s1850_s19 = sshll.u32 %s2546_s12, 3 }
   0xf   : > { %p188_p6 = scmp.lt.s32.totalorder %s1850_s19, 15  ;;  %p1854_p7 = scmp.ne.s32.totalorder %s2546_s12, 0 }
  0x10   : > { %s3323_s13 = smov (!%p180_p5, %s2550_s13), 1 }
  0x11   : > { %s3325_s19 = smov (!%p188_p6, %s1850_s19), 15  ;;  %s1948_s20 = sshll.u32 %s3323_s13, 7 }
  0x12   : > { %s1852_s21 = sshll.u32 %s3323_s13, 5  ;;  %s2621_s24 = scalar_lea.vmem %s3278_s0, %s1948_s20 }
  0x13   : > { %s1851_s25 = sshll.u32 %s3325_s19, 1  ;;  %200 = sbr.rel (%p1854_p7) target bundleno = 68 (0x44), region = 36 }
  0x14   : > { %s192_s26 = sadd.s32 %s1852_s21, %s1851_s25 }
  0x15   : > { %s1853_s27 = sshll.u32 %s192_s26, 2 }
  0x16   : > { %s2626_s30 = scalar_lea.vmem %s3281_s3, %s1853_s27 }
  0x18   : > { %v2630_v0 = vld [vmem:[%s2621_s24] sm:$0xff]   ;;  %v2633_v1 = vld [vmem:[%s2621_s24 + $0x8] sm:$0xff]   ;;  %v2636_v2 = vld [vmem:[%s2621_s24 + $0x10] sm:$0xff]   ;;  %v2564_v3 = vmov 0.0  }
  0x19   : > { %204 = vst [vmem:[#allocation2 + $0x18] sm:$0xff] %v2564_v3  ;;  %201 = vst [vmem:[#allocation2] sm:$0xff] %v2564_v3  ;;  %v1967_v4 = vunpack.c.l.bf16 %v2630_v0  ;;  %v1968_v5 = vunpack.c.h.bf16 %v2630_v0  ;;  %v1971_v6 = vunpack.c.l.bf16 %v2633_v1  ;;  %v1972_v7 = vunpack.c.h.bf16 %v2633_v1  ;;  %v2071_v8 = vld [vmem:[%s2621_s24 + $0x18] sm:$0xff]   ;;  %v2072_v9 = vld [vmem:[%s2621_s24 + $0x20] sm:$0xff]  }
  0x1a   : > { %202 = vst [vmem:[#allocation2 + $0x8] sm:$0xff] %v2564_v3  ;;  %203 = vst [vmem:[#allocation2 + $0x10] sm:$0x3] %v2564_v3  ;;  %v2073_v10 = vld [vmem:[%s2621_s24 + $0x28] sm:$0xff]   ;;  %v1975_v11 = vunpack.c.l.bf16 %v2636_v2  ;;  %v1976_v12 = vunpack.c.h.bf16 %v2636_v2  ;;  %v1979_v13 = vunpack.c.l.bf16 %v2071_v8  ;;  %v1980_v14 = vunpack.c.h.bf16 %v2071_v8  ;;  %v2074_v15 = vld [vmem:[%s2621_s24 + $0x30] sm:$0xff]  }
  0x1b   : > { %205 = vst [vmem:[#allocation2 + $0x20] sm:$0xff] %v2564_v3  ;;  %206 = vst [vmem:[#allocation2 + $0x28] sm:$0x3] %v2564_v3  ;;  %v2075_v16 = vld [vmem:[%s2621_s24 + $0x38] sm:$0xff]   ;;  %v2076_v17 = vld [vmem:[%s2621_s24 + $0x40] sm:$0xff]   ;;  %v1983_v18 = vunpack.c.l.bf16 %v2072_v9  ;;  %v1984_v19 = vunpack.c.h.bf16 %v2072_v9  ;;  %v1987_v20 = vunpack.c.l.bf16 %v2073_v10  ;;  %v1988_v21 = vunpack.c.h.bf16 %v2073_v10 }
  0x1c   : > { %207 = vst [vmem:[#allocation2 + $0x30] sm:$0xff] %v2564_v3  ;;  %208 = vst [vmem:[#allocation2 + $0x38] sm:$0xff] %v2564_v3  ;;  %v2077_v22 = vld [vmem:[%s2621_s24 + $0x48] sm:$0xff]   ;;  %v2078_v23 = vld [vmem:[%s2621_s24 + $0x50] sm:$0xff]   ;;  %v1991_v25 = vunpack.c.l.bf16 %v2074_v15  ;;  %v1992_v26 = vunpack.c.h.bf16 %v2074_v15  ;;  %v1995_v27 = vunpack.c.l.bf16 %v2075_v16  ;;  %v1996_v28 = vunpack.c.h.bf16 %v2075_v16 }
  0x1d   : > { %209 = vst [vmem:[#allocation2 + $0x40] sm:$0x3] %v2564_v3  ;;  %210 = vst [vmem:[#allocation2 + $0x48] sm:$0xff] %v2564_v3  ;;  %v2079_v24 = vld [vmem:[%s2621_s24 + $0x58] sm:$0xff]   ;;  %v2080_v29 = vld [vmem:[%s2621_s24 + $0x60] sm:$0xff]   ;;  %v1999_v31 = vunpack.c.l.bf16 %v2076_v17  ;;  %v2000_v32 = vunpack.c.h.bf16 %v2076_v17  ;;  %v2003_v33 = vunpack.c.l.bf16 %v2077_v22  ;;  %v2004_v34 = vunpack.c.h.bf16 %v2077_v22 }
  0x1e   : > { %211 = vst [vmem:[#allocation2 + $0x50] sm:$0xff] %v2564_v3  ;;  %212 = vst [vmem:[#allocation2 + $0x58] sm:$0x3] %v2564_v3  ;;  %v2081_v30 = vld [vmem:[%s2621_s24 + $0x68] sm:$0xff]   ;;  %v2082_v35 = vld [vmem:[%s2621_s24 + $0x70] sm:$0xff]   ;;  %v2007_v37 = vunpack.c.l.bf16 %v2078_v23  ;;  %v2008_v38 = vunpack.c.h.bf16 %v2078_v23  ;;  %v2011_v39 = vunpack.c.l.bf16 %v2079_v24  ;;  %v2012_v40 = vunpack.c.h.bf16 %v2079_v24 }
  0x1f   : > { %213 = vst [vmem:[#allocation2 + $0x60] sm:$0xff] %v2564_v3  ;;  %214 = vst [vmem:[#allocation2 + $0x68] sm:$0xff] %v2564_v3  ;;  %v2083_v36 = vld [vmem:[%s2621_s24 + $0x78] sm:$0xff]   ;;  %v2015_v41 = vunpack.c.l.bf16 %v2080_v29  ;;  %v2016_v42 = vunpack.c.h.bf16 %v2080_v29  ;;  %v2019_v43 = vunpack.c.l.bf16 %v2081_v30  ;;  %v2020_v44 = vunpack.c.h.bf16 %v2081_v30 }
  0x20   : > { %215 = vst [vmem:[#allocation2 + $0x70] sm:$0x3] %v2564_v3  ;;  %216 = vst [vmem:[#allocation2 + $0x78] sm:$0xff] %v2564_v3  ;;  %v2023_v45 = vunpack.c.l.bf16 %v2082_v35  ;;  %v2024_v46 = vunpack.c.h.bf16 %v2082_v35  ;;  %v2027_v47 = vunpack.c.l.bf16 %v2083_v36  ;;  %v2028_v48 = vunpack.c.h.bf16 %v2083_v36 }
  0x21   : > { %217 = vst [vmem:[#allocation2 + $0x80] sm:$0xff] %v2564_v3  ;;  %218 = vst [vmem:[#allocation2 + $0x88] sm:$0x3] %v2564_v3 }
  0x22   : > { %219 = vst [vmem:[#allocation2 + $0x90] sm:$0xff] %v2564_v3  ;;  %220 = vst [vmem:[#allocation2 + $0x98] sm:$0xff] %v2564_v3 }
  0x23   : > { %221 = vst [vmem:[#allocation2 + $0xa0] sm:$0x3] %v2564_v3  ;;  %222 = vst [vmem:[#allocation2 + $0xa8] sm:$0xff] %v2564_v3 }
  0x24   : > { %223 = vst [vmem:[#allocation2 + $0xb0] sm:$0xff] %v2564_v3  ;;  %224 = vst [vmem:[#allocation2 + $0xb8] sm:$0x3] %v2564_v3 }
  0x25   : > { %225 = vst [vmem:[#allocation2 + $0xc0] sm:$0xff] %v2564_v3  ;;  %226 = vst [vmem:[#allocation2 + $0xc8] sm:$0xff] %v2564_v3 }
  0x26   : > { %227 = vst [vmem:[#allocation2 + $0xd0] sm:$0x3] %v2564_v3  ;;  %228 = vst [vmem:[#allocation2 + $0xd8] sm:$0xff] %v2564_v3 }
  0x27   : > { %229 = vst [vmem:[#allocation2 + $0xe0] sm:$0xff] %v2564_v3  ;;  %230 = vst [vmem:[#allocation2 + $0xe8] sm:$0x3] %v2564_v3 }
  0x28   : > { %231 = vst [vmem:[#allocation2 + $0xf0] sm:$0xff] %v2564_v3  ;;  %232 = vst [vmem:[#allocation2 + $0xf8] sm:$0xff] %v2564_v3 }
  0x29   : > { %233 = vst [vmem:[#allocation2 + $0x100] sm:$0x3] %v2564_v3  ;;  %234 = vst [vmem:[#allocation2 + $0x108] sm:$0xff] %v2564_v3 }
  0x2a   : > { %235 = vst [vmem:[#allocation2 + $0x110] sm:$0xff] %v2564_v3  ;;  %236 = vst [vmem:[#allocation2 + $0x118] sm:$0x3] %v2564_v3 }
  0x2b   : > { %237 = vst [vmem:[#allocation2 + $0x120] sm:$0xff] %v2564_v3  ;;  %238 = vst [vmem:[#allocation2 + $0x128] sm:$0xff] %v2564_v3 }
  0x2c   : > { %239 = vst [vmem:[#allocation2 + $0x130] sm:$0x3] %v2564_v3  ;;  %240 = vst [vmem:[#allocation2 + $0x138] sm:$0xff] %v2564_v3 }
  0x2d   : > { %241 = vst [vmem:[#allocation2 + $0x140] sm:$0xff] %v2564_v3  ;;  %242 = vst [vmem:[#allocation2 + $0x148] sm:$0x3] %v2564_v3 }
  0x2e   : > { %243 = vst [vmem:[#allocation2 + $0x150] sm:$0xff] %v2564_v3  ;;  %244 = vst [vmem:[#allocation2 + $0x158] sm:$0xff] %v2564_v3 }
  0x2f   : > { %245 = vst [vmem:[#allocation2 + $0x160] sm:$0x3] %v2564_v3  ;;  %246 = vst [vmem:[#allocation2 + $0x168] sm:$0xff] %v2564_v3 }
  0x30   : > { %247 = vst [vmem:[#allocation2 + $0x170] sm:$0xff] %v2564_v3  ;;  %248 = vst [vmem:[#allocation2 + $0x178] sm:$0x3] %v2564_v3 }
  0x31   : > { %249 = vst [vmem:[#allocation2 + $0x180] sm:$0xff] %v2564_v3  ;;  %250 = vst [vmem:[#allocation2 + $0x188] sm:$0xff] %v2564_v3 }
  0x32   : > { %251 = vst [vmem:[#allocation2 + $0x190] sm:$0x3] %v2564_v3  ;;  %252 = vst [vmem:[#allocation2 + $0x198] sm:$0xff] %v2564_v3 }
  0x33   : > { %253 = vst [vmem:[#allocation2 + $0x1a0] sm:$0xff] %v2564_v3  ;;  %254 = vst [vmem:[#allocation2 + $0x1a8] sm:$0x3] %v2564_v3 }
  0x34   : > { %320 = vst [vmem:[#allocation2 + $0x19] sm:$0xff] %v1967_v4  ;;  %321 = vst [vmem:[#allocation2 + $0x21] sm:$0xff] %v1968_v5 }
  0x35   : > { %322 = vst [vmem:[#allocation2 + $0x31] sm:$0xff] %v1971_v6  ;;  %323 = vst [vmem:[#allocation2 + $0x39] sm:$0xff] %v1972_v7 }
  0x36   : > { %324 = vst [vmem:[#allocation2 + $0x49] sm:$0xff] %v1975_v11  ;;  %325 = vst [vmem:[#allocation2 + $0x51] sm:$0xff] %v1976_v12 }
  0x37   : > { %326 = vst [vmem:[#allocation2 + $0x61] sm:$0xff] %v1979_v13  ;;  %327 = vst [vmem:[#allocation2 + $0x69] sm:$0xff] %v1980_v14 }
  0x38   : > { %328 = vst [vmem:[#allocation2 + $0x79] sm:$0xff] %v1983_v18  ;;  %329 = vst [vmem:[#allocation2 + $0x81] sm:$0xff] %v1984_v19 }
  0x39   : > { %330 = vst [vmem:[#allocation2 + $0x91] sm:$0xff] %v1987_v20  ;;  %331 = vst [vmem:[#allocation2 + $0x99] sm:$0xff] %v1988_v21 }
  0x3a   : > { %332 = vst [vmem:[#allocation2 + $0xa9] sm:$0xff] %v1991_v25  ;;  %333 = vst [vmem:[#allocation2 + $0xb1] sm:$0xff] %v1992_v26 }
  0x3b   : > { %334 = vst [vmem:[#allocation2 + $0xc1] sm:$0xff] %v1995_v27  ;;  %335 = vst [vmem:[#allocation2 + $0xc9] sm:$0xff] %v1996_v28 }
  0x3c   : > { %336 = vst [vmem:[#allocation2 + $0xd9] sm:$0xff] %v1999_v31  ;;  %337 = vst [vmem:[#allocation2 + $0xe1] sm:$0xff] %v2000_v32 }
  0x3d   : > { %338 = vst [vmem:[#allocation2 + $0xf1] sm:$0xff] %v2003_v33  ;;  %339 = vst [vmem:[#allocation2 + $0xf9] sm:$0xff] %v2004_v34 }
  0x3e   : > { %340 = vst [vmem:[#allocation2 + $0x109] sm:$0xff] %v2007_v37  ;;  %341 = vst [vmem:[#allocation2 + $0x111] sm:$0xff] %v2008_v38 }
  0x3f   : > { %342 = vst [vmem:[#allocation2 + $0x121] sm:$0xff] %v2011_v39  ;;  %343 = vst [vmem:[#allocation2 + $0x129] sm:$0xff] %v2012_v40 }
  0x40   : > { %344 = vst [vmem:[#allocation2 + $0x139] sm:$0xff] %v2015_v41  ;;  %345 = vst [vmem:[#allocation2 + $0x141] sm:$0xff] %v2016_v42 }
  0x41   : > { %346 = vst [vmem:[#allocation2 + $0x151] sm:$0xff] %v2019_v43  ;;  %347 = vst [vmem:[#allocation2 + $0x159] sm:$0xff] %v2020_v44 }
  0x42   : > { %348 = vst [vmem:[#allocation2 + $0x169] sm:$0xff] %v2023_v45  ;;  %349 = vst [vmem:[#allocation2 + $0x171] sm:$0xff] %v2024_v46 }
  0x43   : > { %350 = vst [vmem:[#allocation2 + $0x181] sm:$0xff] %v2027_v47  ;;  %351 = vst [vmem:[#allocation2 + $0x189] sm:$0xff] %v2028_v48 }
  0x44 PF: > { %v2452_v49 = vld [vmem:[%s3279_s1 + $0x78] sm:$0xff]   ;;  %v2456_v53 = vld [vmem:[%s3279_s1 + $0x70] sm:$0xff]   ;;  %v2460_v57 = vld [vmem:[%s3279_s1 + $0x68] sm:$0xff]   ;;  %s1856_s22 = smul.u32 192, %s2546_s12  ;;  %vm409_vm0 = vcmask 1046528   ;;  %vm466_vm1 = vcmask 1045504  }
  0x45   : > { %v2453_v50 = vld [vmem:[%s3279_s1 + $0xf8] sm:$0xff]   ;;  %2091 = vmatprep.subr.bf16.mxu0 %v2452_v49  ;;  %v2457_v54 = vld [vmem:[%s3279_s1 + $0xf0] sm:$0xff]   ;;  %v2461_v58 = vld [vmem:[%s3279_s1 + $0xe8] sm:$0xff]  }
  0x46   : > { %v2454_v51 = vld [vmem:[%s3279_s1 + $0x38] sm:$0xff]   ;;  %2155 = vmatprep.subr.bf16.mxu1 %v2453_v50  ;;  %v2458_v55 = vld [vmem:[%s3279_s1 + $0x30] sm:$0xff]   ;;  %v2462_v59 = vld [vmem:[%s3279_s1 + $0x28] sm:$0xff]   ;;  %s2754_s8 = scalar_lea.vmem [#allocation2], %s1856_s22 }
  0x47   : > { %v2455_v52 = vld [vmem:[%s3279_s1 + $0xb8] sm:$0xff]   ;;  %2092 = vmatpush3.bf16.msra.mxu0 %v2454_v51  ;;  %v2459_v56 = vld [vmem:[%s3279_s1 + $0xb0] sm:$0xff]   ;;  %v2463_v60 = vld [vmem:[%s3279_s1 + $0xa8] sm:$0xff]  }
  0x48   : > { %2156 = vmatpush3.bf16.msra.mxu1 %v2455_v52  ;;  %2093 = vmatprep.subr.bf16.mxu0 %v2456_v53  ;;  %v2464_v61 = vld [vmem:[%s3279_s1 + $0x60] sm:$0xff]   ;;  %v2468_v1 = vld [vmem:[%s3279_s1 + $0x58] sm:$0xff]   ;;  %v2472_v5 = vld [vmem:[%s3279_s1 + $0x50] sm:$0xff]  }
  0x49   : > { %2157 = vmatprep.subr.bf16.mxu1 %v2457_v54  ;;  %v2465_v62 = vld [vmem:[%s3279_s1 + $0xe0] sm:$0xff]   ;;  %v2469_v2 = vld [vmem:[%s3279_s1 + $0xd8] sm:$0xff]   ;;  %v2473_v6 = vld [vmem:[%s3279_s1 + $0xd0] sm:$0xff]  }
  0x4a   : > { %v2466_v63 = vld [vmem:[%s3279_s1 + $0x20] sm:$0xff]   ;;  %v2470_v3 = vld [vmem:[%s3279_s1 + $0x18] sm:$0xff]   ;;  %v2474_v7 = vld [vmem:[%s3279_s1 + $0x10] sm:$0xff]  }
  0x4b   : > { %2094 = vmatpush3.bf16.msra.mxu0 %v2458_v55  ;;  %v2467_v0 = vld [vmem:[%s3279_s1 + $0xa0] sm:$0xff]   ;;  %v2471_v4 = vld [vmem:[%s3279_s1 + $0x98] sm:$0xff]   ;;  %v2475_v8 = vld [vmem:[%s3279_s1 + $0x90] sm:$0xff]  }
  0x4c   : > { %2158 = vmatpush3.bf16.msra.mxu1 %v2459_v56  ;;  %2095 = vmatprep.subr.bf16.mxu0 %v2460_v57  ;;  %v2476_v9 = vld [vmem:[%s3279_s1 + $0x48] sm:$0xff]   ;;  %v2480_v13 = vld [vmem:[%s3279_s1 + $0x40] sm:$0xff]   ;;  %v357_v19 = vld [vmem:[%s2754_s8 + $0x10] sm:$0x3] }
  0x4d   : > { %2159 = vmatprep.subr.bf16.mxu1 %v2461_v58  ;;  %v2477_v10 = vld [vmem:[%s3279_s1 + $0xc8] sm:$0xff]   ;;  %v2481_v14 = vld [vmem:[%s3279_s1 + $0xc0] sm:$0xff]   ;;  %v413_v22 = vrot.slane %v357_v19, 1  ;;  %v358_v23 = vld [vmem:[%s2754_s8 + $0x18] sm:$0xff]  ;;  %v470_v25 = vrot.slane %v357_v19, 2 }
  0x4e   : > { %v2478_v11 = vld [vmem:[%s3279_s1 + $0x8] sm:$0xff]   ;;  %v2482_v15 = vld [vmem:[%s3279_s1] sm:$0xff]   ;;  %v415_v26 = vrot.slane %v358_v23, 1  ;;  %v472_v28 = vrot.slane %v358_v23, 2  ;;  %v2484_v33 = vld [vmem:[%s3279_s1 + $0x178] sm:$0xff]  }
  0x4f   : > { %2096 = vmatpush3.bf16.msra.mxu0 %v2462_v59  ;;  %v2479_v12 = vld [vmem:[%s3279_s1 + $0x88] sm:$0xff]   ;;  %v2483_v16 = vld [vmem:[%s3279_s1 + $0x80] sm:$0xff]   ;;  %v2485_v37 = vld [vmem:[%s3279_s1 + $0x1f8] sm:$0xff]  }
  0x50   : > { %2160 = vmatpush3.bf16.msra.mxu1 %v2463_v60  ;;  %2097 = vmatprep.subr.bf16.mxu0 %v2464_v61  ;;  %v355_v17 = vld [vmem:[%s2754_s8] sm:$0xff]  ;;  %v356_v18 = vld [vmem:[%s2754_s8 + $0x8] sm:$0xff]  ;;  %v2486_v38 = vld [vmem:[%s3279_s1 + $0x138] sm:$0xff]  }
  0x51   : > { %2161 = vmatprep.subr.bf16.mxu1 %v2465_v62  ;;  %v410_v20 = vrot.slane %v355_v17, 1  ;;  %v411_v21 = vrot.slane %v356_v18, 1  ;;  %v359_v24 = vld [vmem:[%s2754_s8 + $0x20] sm:$0xff]  ;;  %v557_v32 = vpack.c.bf16 %v356_v18, %v355_v17  ;;  %v467_v35 = vrot.slane %v355_v17, 2  ;;  %v2487_v42 = vld [vmem:[%s3279_s1 + $0x1b8] sm:$0xff]   ;;  %v361_v47 = vld [vmem:[%s2754_s8 + $0x30] sm:$0xff] }
  0x52   : > { %v416_v27 = vrot.slane %v359_v24, 1  ;;  %v560_v31 = vpack.c.bf16 %v359_v24, %v358_v23  ;;  %v468_v36 = vrot.slane %v356_v18, 2  ;;  %v473_v39 = vrot.slane %v359_v24, 2  ;;  %v360_v43 = vld [vmem:[%s2754_s8 + $0x28] sm:$0x3]  ;;  %v362_v48 = vld [vmem:[%s2754_s8 + $0x38] sm:$0xff] }
  0x53   : > { %2098 = vmatpush3.bf16.msra.mxu0 %v2466_v63  ;;  %v412_v29 = vsel %vm409_vm0, %v410_v20, %v411_v21  ;;  %v414_v30 = vsel %vm409_vm0, %v411_v21, %v413_v22  ;;  %v418_v46 = vrot.slane %v360_v43, 1  ;;  %v475_v49 = vrot.slane %v360_v43, 2  ;;  %v2488_v54 = vld [vmem:[%s3279_s1 + $0x170] sm:$0xff]   ;;  %v363_v62 = vld [vmem:[%s2754_s8 + $0x40] sm:$0x3]  ;;  %v364_v63 = vld [vmem:[%s2754_s8 + $0x48] sm:$0xff] }
  0x54   : > { %2162 = vmatpush3.bf16.msra.mxu1 %v2467_v0  ;;  %2099 = vmatprep.subr.bf16.mxu0 %v2468_v1  ;;  %v558_v34 = vpack.c.bf16 %v414_v30, %v412_v29  ;;  %v469_v40 = vsel %vm466_vm1, %v467_v35, %v468_v36  ;;  %v471_v41 = vsel %vm466_vm1, %v468_v36, %v470_v25  ;;  %v420_v50 = vrot.slane %v361_v47, 1  ;;  %v2489_v58 = vld [vmem:[%s3279_s1 + $0x1f0] sm:$0xff]   ;;  %v366_v18 = vld [vmem:[%s2754_s8 + $0x58] sm:$0x3]  ;;  %v367_v22 = vld [vmem:[%s2754_s8 + $0x60] sm:$0xff] }
  0x55   : > { %2163 = vmatprep.subr.bf16.mxu1 %v2469_v2  ;;  %1299 = vmatprep.mubr.bf16.mxu1 %v560_v31  ;;  %v559_v44 = vpack.c.bf16 %v471_v41, %v469_v40  ;;  %v417_v45 = vsel %vm409_vm0, %v415_v26, %v416_v27  ;;  %v419_v51 = vsel %vm409_vm0, %v416_v27, %v418_v46  ;;  %v421_v52 = vrot.slane %v362_v48, 1  ;;  %v2490_v59 = vld [vmem:[%s3279_s1 + $0x130] sm:$0xff]   ;;  %v368_v23 = vld [vmem:[%s2754_s8 + $0x68] sm:$0xff]  ;;  %v2496_v26 = vld [vmem:[%s3279_s1 + $0x160] sm:$0xff]  }
  0x56   : > { %1202 = vmatprep.mubr.bf16.mxu0 %v558_v34  ;;  %v2782_v53 = vpack.c.bf16 %v362_v48, %v361_v47  ;;  %v2787_v55 = vpack.c.bf16 %v419_v51, %v417_v45  ;;  %v474_v56 = vsel %vm466_vm1, %v472_v28, %v473_v39  ;;  %v476_v57 = vsel %vm466_vm1, %v473_v39, %v475_v49  ;;  %v2491_v61 = vld [vmem:[%s3279_s1 + $0x1b0] sm:$0xff]   ;;  %v2497_v27 = vld [vmem:[%s3279_s1 + $0x1e0] sm:$0xff]   ;;  %v2500_v43 = vld [vmem:[%s3279_s1 + $0x158] sm:$0xff]  }
  0x57   : > { %2100 = vmatpush3.bf16.msra.mxu0 %v2470_v3  ;;  %v477_v60 = vrot.slane %v361_v47, 2  ;;  %v478_v0 = vrot.slane %v362_v48, 2  ;;  %v2804_v1 = vpack.c.bf16 %v476_v57, %v474_v56  ;;  %v422_v2 = vsel %vm409_vm0, %v420_v50, %v421_v52  ;;  %v2499_v34 = vld [vmem:[%s3279_s1 + $0x1a0] sm:$0xff]   ;;  %v369_v35 = vld [vmem:[%s2754_s8 + $0x70] sm:$0x3]  ;;  %v2502_v46 = vld [vmem:[%s3279_s1 + $0x118] sm:$0xff]  }
  0x58   : > { %2164 = vmatpush3.bf16.msra.mxu1 %v2471_v4  ;;  %2101 = vmatprep.subr.bf16.mxu0 %v2472_v5  ;;  %v423_v3 = vrot.slane %v363_v62, 1  ;;  %v365_v4 = vld [vmem:[%s2754_s8 + $0x50] sm:$0xff]  ;;  %v2492_v5 = vld [vmem:[%s3279_s1 + $0x168] sm:$0xff]   ;;  %v428_v21 = vrot.slane %v366_v18, 1  ;;  %v430_v24 = vrot.slane %v367_v22, 1  ;;  %v431_v25 = vrot.slane %v368_v23, 1 }
  0x59   : > { %2165 = vmatprep.subr.bf16.mxu1 %v2473_v6  ;;  %v425_v6 = vrot.slane %v364_v63, 1  ;;  %v483_v19 = vrot.slane %v365_v4, 2  ;;  %v433_v36 = vrot.slane %v369_v35, 1  ;;  %v2862_v39 = vld [vmem:[%s2754_s8 + $0x80] sm:$0xff]  ;;  %v487_v47 = vrot.slane %v367_v22, 2  ;;  %v2503_v51 = vld [vmem:[%s3279_s1 + $0x198] sm:$0xff]  }
  0x5a   : > { %v436_v50 = vrot.slane %v2862_v39, 1  ;;  %v490_v57 = vrot.slane %v369_v35, 2 }
  0x5b   : > { %2102 = vmatpush3.bf16.msra.mxu0 %v2474_v7  ;;  %v2811_v7 = vpack.c.bf16 %v365_v4, %v364_v63 }
  0x5c   : > { %2166 = vmatpush3.bf16.msra.mxu1 %v2475_v8  ;;  %2103 = vmatprep.subr.bf16.mxu0 %v2476_v9  ;;  %v480_v8 = vrot.slane %v363_v62, 2  ;;  %v424_v9 = vsel %vm409_vm0, %v421_v52, %v423_v3  ;;  %v372_v52 = vld [vmem:[%s2754_s8 + $0x88] sm:$0x3]  ;;  %v2507_v3 = vld [vmem:[%s3279_s1 + $0x190] sm:$0xff]  }
  0x5d   : > { %2167 = vmatprep.subr.bf16.mxu1 %v2477_v10  ;;  %v426_v10 = vrot.slane %v365_v4, 1 }
  0x5e   : > { %v481_v17 = vsel %vm466_vm1, %v478_v0, %v480_v8  ;;  %v375_v8 = vld [vmem:[%s2754_s8 + $0xa0] sm:$0x3] }
  0x5f   : > { %2104 = vmatpush3.bf16.msra.mxu0 %v2478_v11  ;;  %v2493_v11 = vld [vmem:[%s3279_s1 + $0x1e8] sm:$0xff]   ;;  %v427_v20 = vsel %vm409_vm0, %v425_v6, %v426_v10  ;;  %v429_v29 = vsel %vm409_vm0, %v426_v10, %v428_v21  ;;  %v374_v6 = vld [vmem:[%s2754_s8 + $0x98] sm:$0xff] }
  0x60   : > { %2168 = vmatpush3.bf16.msra.mxu1 %v2479_v12  ;;  %2105 = vmatprep.subr.bf16.mxu0 %v2480_v13  ;;  %v2817_v12 = vpack.c.bf16 %v424_v9, %v422_v2  ;;  %v2494_v13 = vld [vmem:[%s3279_s1 + $0x128] sm:$0xff]   ;;  %v2843_v30 = vpack.c.bf16 %v429_v29, %v427_v20  ;;  %v493_v9 = vrot.slane %v2862_v39, 2 }
  0x61   : > { %2169 = vmatprep.subr.bf16.mxu1 %v2481_v14  ;;  %v2495_v14 = vld [vmem:[%s3279_s1 + $0x1a8] sm:$0xff]  }
  0x62   : > { %v2510_v20 = vld [vmem:[%s3279_s1 + $0x108] sm:$0xff]  }
  0x63   : > { %2106 = vmatpush3.bf16.msra.mxu0 %v2482_v15  ;;  %v482_v15 = vrot.slane %v364_v63, 2  ;;  %v2506_v63 = vld [vmem:[%s3279_s1 + $0x110] sm:$0xff]   ;;  %v2511_v21 = vld [vmem:[%s3279_s1 + $0x188] sm:$0xff]  }
  0x64   : > { %2170 = vmatpush3.bf16.msra.mxu1 %v2483_v16  ;;  %2219 = vmatprep.subr.bf16.mxu0 %v2484_v33  ;;  %v479_v16 = vsel %vm466_vm1, %v477_v60, %v478_v0  ;;  %v2498_v33 = vld [vmem:[%s3279_s1 + $0x120] sm:$0xff]   ;;  %v2505_v60 = vld [vmem:[%s3279_s1 + $0x1d0] sm:$0xff]  }
  0x65   : > { %2283 = vmatprep.subr.bf16.mxu1 %v2485_v37  ;;  %v2840_v28 = vpack.c.bf16 %v481_v17, %v479_v16  ;;  %v432_v37 = vsel %vm409_vm0, %v430_v24, %v431_v25  ;;  %v484_v40 = vsel %vm466_vm1, %v482_v15, %v483_v19  ;;  %v441_v15 = vrot.slane %v374_v6, 1  ;;  %v2508_v17 = vld [vmem:[%s3279_s1 + $0x148] sm:$0xff]  }
  0x66   : > { %1203 = vmatmul.mubr.bf16.vlgmr.msra.gmra.mxu0 %v557_v32  ;;  %v485_v32 = vrot.slane %v366_v18, 2  ;;  %v443_v16 = vrot.slane %v375_v8, 1  ;;  %v2509_v18 = vld [vmem:[%s3279_s1 + $0x1c8] sm:$0xff]  }
  0x67   : > { %2220 = vmatpush3.bf16.msra.mxu0 %v2486_v38  ;;  %1300 = vmatmul.mubr.bf16.vlgmr.msra.gmra.mxu1 %v559_v44  ;;  %v2859_v38 = vld [vmem:[%s2754_s8 + $0x78] sm:$0xff] }
  0x68   : > { %2284 = vmatpush3.bf16.msra.mxu1 %v2487_v42  ;;  %1307 = vmatprep.mubr.bf16.mxu1 %v2782_v53  ;;  %v486_v41 = vsel %vm466_vm1, %v483_v19, %v485_v32  ;;  %v434_v42 = vsel %vm409_vm0, %v431_v25, %v433_v36  ;;  %v2501_v44 = vld [vmem:[%s3279_s1 + $0x1d8] sm:$0xff]   ;;  %v435_v49 = vrot.slane %v2859_v38, 1  ;;  %v2889_v56 = vpack.c.bf16 %v2862_v39, %v2859_v38  ;;  %v2946_v32 = vld [vmem:[%s2754_s8 + $0xb0] sm:$0xff]  ;;  %v2512_v36 = vld [vmem:[%s3279_s1 + $0x140] sm:$0xff]  }
  0x69   : > { %2221 = vmatprep.subr.bf16.mxu0 %v2488_v54  ;;  %1210 = vmatprep.mubr.bf16.mxu0 %v2787_v55  ;;  %v2874_v45 = vpack.c.bf16 %v434_v42, %v432_v37  ;;  %v2879_v48 = vpack.c.bf16 %v486_v41, %v484_v40  ;;  %v488_v54 = vrot.slane %v368_v23, 2  ;;  %v492_v4 = vrot.slane %v2859_v38, 2  ;;  %v2513_v39 = vld [vmem:[%s3279_s1 + $0x1c0] sm:$0xff]  }
  0x6a   : > { %2285 = vmatprep.subr.bf16.mxu1 %v2489_v58  ;;  %v438_v58 = vrot.slane %v372_v52, 1  ;;  %v444_v25 = vsel %vm409_vm0, %v441_v15, %v443_v16  ;;  %v446_v35 = vrot.slane %v2946_v32, 1  ;;  %v500_v38 = vrot.slane %v375_v8, 2  ;;  %v379_v42 = vld [vmem:[%s2754_s8 + $0xc0] sm:$0xff] }
  0x6b   : > { %2222 = vmatpush3.bf16.msra.mxu0 %v2490_v59  ;;  %v2504_v59 = vld [vmem:[%s3279_s1 + $0x150] sm:$0xff]   ;;  %v489_v0 = vsel %vm466_vm1, %v487_v47, %v488_v54  ;;  %v491_v2 = vsel %vm466_vm1, %v488_v54, %v490_v57  ;;  %v2515_v47 = vld [vmem:[%s3279_s1 + $0x180] sm:$0xff]  }
  0x6c   : > { %2286 = vmatpush3.bf16.msra.mxu1 %v2491_v61  ;;  %2223 = vmatprep.subr.bf16.mxu0 %v2492_v5  ;;  %v437_v61 = vsel %vm409_vm0, %v435_v49, %v436_v50  ;;  %v439_v62 = vsel %vm409_vm0, %v436_v50, %v438_v58  ;;  %v373_v5 = vld [vmem:[%s2754_s8 + $0x90] sm:$0xff]  ;;  %v2980_v49 = vld [vmem:[%s3279_s1 + $0x238] sm:$0xff]  }
  0x6d   : > { %2287 = vmatprep.subr.bf16.mxu1 %v2493_v11  ;;  %v2916_v10 = vpack.c.bf16 %v439_v62, %v437_v61  ;;  %v440_v11 = vrot.slane %v373_v5, 1  ;;  %v2926_v19 = vpack.c.bf16 %v374_v6, %v373_v5  ;;  %v503_v62 = vrot.slane %v2946_v32, 2 }
  0x6e   : > { %1211 = vmatmul.mubr.bf16.gmra.mxu0 %v560_v31  ;;  %v2845_v31 = vpack.c.bf16 %v368_v23, %v367_v22  ;;  %v497_v22 = vrot.slane %v373_v5, 2  ;;  %v498_v23 = vrot.slane %v374_v6, 2 }
  0x6f   : > { %1308 = vmatmul.mubr.bf16.gmra.mxu1 %v2804_v1  ;;  %1218 = vmatprep.mubr.bf16.mxu0 %v2817_v12  ;;  %v442_v24 = vsel %vm409_vm0, %v440_v11, %v441_v15  ;;  %v384_v15 = vld [vmem:[%s2754_s8 + $0xe8] sm:$0x3] }
  0x70   : > { %1315 = vmatprep.mubr.bf16.mxu1 %v2811_v7  ;;  %2224 = vmatpush3.bf16.msra.mxu0 %v2494_v13  ;;  %v495_v13 = vrot.slane %v372_v52, 2  ;;  %v2956_v37 = vpack.c.bf16 %v444_v25, %v442_v24  ;;  %v499_v50 = vsel %vm466_vm1, %v497_v22, %v498_v23  ;;  %v526_v52 = vrot.slane %v379_v42, 1 }
  0x71   : > { %2288 = vmatpush3.bf16.msra.mxu1 %v2495_v14  ;;  %2225 = vmatprep.subr.bf16.mxu0 %v2496_v26  ;;  %v2918_v14 = vpack.c.bf16 %v491_v2, %v489_v0  ;;  %v2940_v26 = vld [vmem:[%s2754_s8 + $0xa8] sm:$0xff]  ;;  %v501_v57 = vsel %vm466_vm1, %v498_v23, %v500_v38 }
  0x72   : > { %2289 = vmatprep.subr.bf16.mxu1 %v2497_v27  ;;  %v494_v27 = vsel %vm466_vm1, %v492_v4, %v493_v9  ;;  %v496_v29 = vsel %vm466_vm1, %v493_v9, %v495_v13  ;;  %v502_v61 = vrot.slane %v2940_v26, 2  ;;  %v3002_v9 = vld [vmem:[%s2754_s8 + $0xd8] sm:$0xff]  ;;  %v3007_v13 = vld [vmem:[%s2754_s8 + $0xe0] sm:$0xff] }
  0x73   : > { %v2961_v40 = vpack.c.bf16 %v496_v29, %v494_v27  ;;  %v543_v16 = vrot.slane %v3002_v9, 1  ;;  %v550_v24 = vrot.slane %v3002_v9, 2  ;;  %v551_v27 = vrot.slane %v3007_v13, 2 }
  0x74   : > { %2226 = vmatpush3.bf16.msra.mxu0 %v2498_v33  ;;  %v445_v33 = vrot.slane %v2940_v26, 1  ;;  %v553_v29 = vrot.slane %v384_v15, 2 }
  0x75   : > { %2290 = vmatpush3.bf16.msra.mxu1 %v2499_v34  ;;  %2227 = vmatprep.subr.bf16.mxu0 %v2500_v43  ;;  %v2950_v34 = vld [vmem:[%s2754_s8 + $0xb8] sm:$0x3]  ;;  %v380_v43 = vld [vmem:[%s2754_s8 + $0xc8] sm:$0xff] }
  0x76   : > { %1219 = vmatmul.mubr.bf16.gmra.mxu0 %v2782_v53  ;;  %2291 = vmatprep.subr.bf16.mxu1 %v2501_v44  ;;  %v448_v41 = vrot.slane %v2950_v34, 1  ;;  %v2514_v44 = vld [vmem:[%s3279_s1 + $0x100] sm:$0xff]   ;;  %v527_v54 = vrot.slane %v380_v43, 1  ;;  %v505_v2 = vrot.slane %v2950_v34, 2  ;;  %v3004_v11 = vpack.c.bf16 %v380_v43, %v379_v42 }
  0x77   : > { %1226 = vmatprep.mubr.bf16.mxu0 %v2843_v30  ;;  %1316 = vmatmul.mubr.bf16.gmra.mxu1 %v2840_v28 }
  0x78   : > { %1323 = vmatprep.mubr.bf16.mxu1 %v2845_v31  ;;  %2228 = vmatpush3.bf16.msra.mxu0 %v2502_v46  ;;  %v2971_v46 = vpack.c.bf16 %v2946_v32, %v2940_v26  ;;  %v449_v58 = vsel %vm409_vm0, %v446_v35, %v448_v41  ;;  %v528_v4 = vsel %vm409_vm0, %v526_v52, %v527_v54  ;;  %v2517_v41 = vld [vmem:[%s3279_s1 + $0x230] sm:$0xff]  }
  0x79   : > { %2292 = vmatpush3.bf16.msra.mxu1 %v2503_v51  ;;  %2229 = vmatprep.subr.bf16.mxu0 %v2504_v59  ;;  %v447_v51 = vsel %vm409_vm0, %v445_v33, %v446_v35  ;;  %v533_v59 = vrot.slane %v379_v42, 2  ;;  %v504_v32 = vsel %vm466_vm1, %v502_v61, %v503_v62  ;;  %v506_v33 = vsel %vm466_vm1, %v503_v62, %v505_v2 }
  0x7a   : > { %2293 = vmatprep.subr.bf16.mxu1 %v2505_v60  ;;  %v534_v60 = vrot.slane %v380_v43, 2  ;;  %v2995_v0 = vpack.c.bf16 %v449_v58, %v447_v51  ;;  %v3035_v35 = vsel %vm466_vm1, %v550_v24, %v551_v27 }
  0x7c   : > { %2230 = vmatpush3.bf16.msra.mxu0 %v2506_v63  ;;  %v2993_v63 = vpack.c.bf16 %v501_v57, %v499_v50  ;;  %v535_v6 = vsel %vm466_vm1, %v533_v59, %v534_v60 }
  0x7d   : > { %2294 = vmatpush3.bf16.msra.mxu1 %v2507_v3  ;;  %2231 = vmatprep.subr.bf16.mxu0 %v2508_v17  ;;  %v381_v3 = vld [vmem:[%s2754_s8 + $0xd0] sm:$0x3] }
  0x7e   : > { %1227 = vmatmul.mubr.bf16.gmra.mxu0 %v2811_v7  ;;  %2295 = vmatprep.subr.bf16.mxu1 %v2509_v18  ;;  %v529_v5 = vrot.slane %v381_v3, 1  ;;  %v536_v8 = vrot.slane %v381_v3, 2 }
  0x7f   : > { %1234 = vmatprep.mubr.bf16.mxu0 %v2874_v45  ;;  %1324 = vmatmul.mubr.bf16.gmra.mxu1 %v2879_v48 }
  0x80   : > { %1331 = vmatprep.mubr.bf16.mxu1 %v2889_v56  ;;  %2232 = vmatpush3.bf16.msra.mxu0 %v2510_v20  ;;  %v530_v17 = vsel %vm409_vm0, %v527_v54, %v529_v5  ;;  %v537_v18 = vsel %vm466_vm1, %v534_v60, %v536_v8  ;;  %v544_v20 = vrot.slane %v3007_v13, 1 }
  0x81   : > { %2296 = vmatpush3.bf16.msra.mxu1 %v2511_v21  ;;  %2233 = vmatprep.subr.bf16.mxu0 %v2512_v36  ;;  %v546_v21 = vrot.slane %v384_v15, 1  ;;  %v3016_v22 = vpack.c.bf16 %v530_v17, %v528_v4  ;;  %v3018_v23 = vpack.c.bf16 %v537_v18, %v535_v6  ;;  %v3038_v36 = vsel %vm466_vm1, %v551_v27, %v553_v29 }
  0x82   : > { %2297 = vmatprep.subr.bf16.mxu1 %v2513_v39  ;;  %v3023_v25 = vsel %vm409_vm0, %v543_v16, %v544_v20  ;;  %v586_v38 = vpack.c.bf16 %v3038_v36, %v3035_v35  ;;  %v3042_v39 = vpack.c.bf16 %v506_v33, %v504_v32 }
  0x83   : > { %v3026_v26 = vsel %vm409_vm0, %v544_v20, %v546_v21 }
  0x84   : > { %2234 = vmatpush3.bf16.msra.mxu0 %v2514_v44  ;;  %v585_v34 = vpack.c.bf16 %v3026_v26, %v3023_v25 }
  0x85   : > { %2363 = vmatprep.subr.bf16.mxu0 %v2980_v49  ;;  %2298 = vmatpush3.bf16.msra.mxu1 %v2515_v47 }
  0x86   : > { %1235 = vmatmul.mubr.bf16.gmra.mxu0 %v2845_v31  ;;  %2395 = vmatprep.subr.bf16.mxu1 %v2980_v49 }
  0x87   : > { %1242 = vmatprep.mubr.bf16.mxu0 %v2916_v10  ;;  %1332 = vmatmul.mubr.bf16.gmra.mxu1 %v2918_v14 }
  0x88   : > { %1339 = vmatprep.mubr.bf16.mxu1 %v2926_v19 }
  0x8e   : > { %1243 = vmatmul.mubr.bf16.gmra.mxu0 %v2889_v56 }
  0x8f   : > { %1250 = vmatprep.mubr.bf16.mxu0 %v2956_v37  ;;  %1340 = vmatmul.mubr.bf16.gmra.mxu1 %v2961_v40 }
  0x90   : > { %1347 = vmatprep.mubr.bf16.mxu1 %v2971_v46 }
  0x96   : > { %1251 = vmatmul.mubr.bf16.gmra.mxu0 %v2926_v19 }
  0x97   : > { %1258 = vmatprep.mubr.bf16.mxu0 %v2995_v0  ;;  %1348 = vmatmul.mubr.bf16.gmra.mxu1 %v2993_v63 }
  0x98   : > { %1355 = vmatprep.mubr.bf16.mxu1 %v3004_v11 }
  0x9e   : > { %1259 = vmatmul.mubr.bf16.gmra.mxu0 %v2971_v46 }
  0x9f   : > { %1396 = vmatprep.mubr.bf16.mxu0 %v2804_v1  ;;  %1356 = vmatmul.mubr.bf16.gmra.mxu1 %v3042_v39  ;;  %v2518_v1 = vld [vmem:[%s3279_s1 + $0x228] sm:$0xff]  }
  0xa0   : > { %1493 = vmatprep.mubr.bf16.mxu1 %v2817_v12 }
  0xa6   : > { %1397 = vmatmul.mubr.bf16.vlgmr.msra.gmra.mxu0 %v2787_v55  ;;  %v2519_v55 = vld [vmem:[%s3279_s1 + $0x220] sm:$0xff]  }
  0xa7   : > { %2364 = vmatpush3.bf16.msra.mxu0 %v2980_v49  ;;  %1404 = vmatprep.mubr.bf16.mxu0 %v2840_v28 }
  0xa8   : > { %1494 = vmatmul.mubr.bf16.vlgmr.msra.gmra.mxu1 %v2782_v53  ;;  %2365 = vmatprep.subr.bf16.mxu0 %v2517_v41  ;;  %v2520_v53 = vld [vmem:[%s3279_s1 + $0x218] sm:$0xff]  }
  0xa9   : > { %2403 = vmatpush3.bf16.msra.mxu1 %v2980_v49  ;;  %1501 = vmatprep.mubr.bf16.mxu1 %v2843_v30 }
  0xaa   : > { %2396 = vmatprep.subr.bf16.mxu1 %v2517_v41 }
  0xab   : > { %2366 = vmatpush3.bf16.msra.mxu0 %v2517_v41 }
  0xac   : > { %2367 = vmatprep.subr.bf16.mxu0 %v2518_v1 }
  0xad   : > { %2404 = vmatpush3.bf16.msra.mxu1 %v2517_v41 }
  0xae   : > { %1405 = vmatmul.mubr.bf16.gmra.mxu0 %v2817_v12  ;;  %2397 = vmatprep.subr.bf16.mxu1 %v2518_v1  ;;  %v2521_v12 = vld [vmem:[%s3279_s1 + $0x210] sm:$0xff]  }
  0xaf   : > { %1412 = vmatprep.mubr.bf16.mxu0 %v2879_v48  ;;  %2368 = vmatpush3.bf16.msra.mxu0 %v2518_v1 }
  0xb0   : > { %1502 = vmatmul.mubr.bf16.gmra.mxu1 %v2811_v7  ;;  %2369 = vmatprep.subr.bf16.mxu0 %v2519_v55  ;;  %v2522_v7 = vld [vmem:[%s3279_s1 + $0x208] sm:$0xff]  }
  0xb1   : > { %1509 = vmatprep.mubr.bf16.mxu1 %v2874_v45  ;;  %2405 = vmatpush3.bf16.msra.mxu1 %v2518_v1 }
  0xb2   : > { %2398 = vmatprep.subr.bf16.mxu1 %v2519_v55 }
  0xb3   : > { %2370 = vmatpush3.bf16.msra.mxu0 %v2519_v55 }
  0xb4   : > { %2371 = vmatprep.subr.bf16.mxu0 %v2520_v53 }
  0xb5   : > { %2406 = vmatpush3.bf16.msra.mxu1 %v2519_v55 }
  0xb6   : > { %1413 = vmatmul.mubr.bf16.gmra.mxu0 %v2843_v30  ;;  %2399 = vmatprep.subr.bf16.mxu1 %v2520_v53  ;;  %v2523_v30 = vld [vmem:[%s3279_s1 + $0x200] sm:$0xff]  }
  0xb7   : > { %1420 = vmatprep.mubr.bf16.mxu0 %v2918_v14  ;;  %2372 = vmatpush3.bf16.msra.mxu0 %v2520_v53 }
  0xb8   : > { %1510 = vmatmul.mubr.bf16.gmra.mxu1 %v2845_v31  ;;  %2373 = vmatprep.subr.bf16.mxu0 %v2521_v12  ;;  %v584_v31 = vpack.c.bf16 %v3007_v13, %v3002_v9 }
  0xb9   : > { %1517 = vmatprep.mubr.bf16.mxu1 %v2916_v10  ;;  %2407 = vmatpush3.bf16.msra.mxu1 %v2520_v53 }
  0xba   : > { %2400 = vmatprep.subr.bf16.mxu1 %v2521_v12 }
  0xbb   : > { %2374 = vmatpush3.bf16.msra.mxu0 %v2521_v12 }
  0xbc   : > { %2375 = vmatprep.subr.bf16.mxu0 %v2522_v7 }
  0xbd   : > { %2408 = vmatpush3.bf16.msra.mxu1 %v2521_v12 }
  0xbe   : > { %1421 = vmatmul.mubr.bf16.gmra.mxu0 %v2874_v45  ;;  %2401 = vmatprep.subr.bf16.mxu1 %v2522_v7 }
  0xbf   : > { %1428 = vmatprep.mubr.bf16.mxu0 %v2961_v40  ;;  %2376 = vmatpush3.bf16.msra.mxu0 %v2522_v7 }
  0xc0   : > { %1518 = vmatmul.mubr.bf16.gmra.mxu1 %v2889_v56  ;;  %2377 = vmatprep.subr.bf16.mxu0 %v2523_v30 }
  0xc1   : > { %1525 = vmatprep.mubr.bf16.mxu1 %v2956_v37  ;;  %2409 = vmatpush3.bf16.msra.mxu1 %v2522_v7 }
  0xc2   : > { %2402 = vmatprep.subr.bf16.mxu1 %v2523_v30 }
  0xc3   : > { %2378 = vmatpush3.bf16.msra.mxu0 %v2523_v30 }
  0xc5   : > { %2410 = vmatpush3.bf16.msra.mxu1 %v2523_v30 }
  0xc6   : > { %1429 = vmatmul.mubr.bf16.gmra.mxu0 %v2916_v10 }
  0xc7   : > { %1436 = vmatprep.mubr.bf16.mxu0 %v2993_v63 }
  0xc8   : > { %1526 = vmatmul.mubr.bf16.gmra.mxu1 %v2926_v19 }
  0xc9   : > { %1533 = vmatprep.mubr.bf16.mxu1 %v2995_v0 }
  0xce   : > { %1437 = vmatmul.mubr.bf16.gmra.mxu0 %v2956_v37 }
  0xcf   : > { %1444 = vmatprep.mubr.bf16.mxu0 %v3042_v39 }
  0xd0   : > { %1534 = vmatmul.mubr.bf16.gmra.mxu1 %v2971_v46 }
  0xd1   : > { %1541 = vmatprep.mubr.bf16.mxu1 %v3016_v22 }
  0xd6   : > { %1445 = vmatmul.mubr.bf16.gmra.mxu0 %v2995_v0 }
  0xd7   : > { %1452 = vmatprep.mubr.bf16.mxu0 %v3018_v23 }
  0xd8   : > { %1542 = vmatmul.mubr.bf16.gmra.mxu1 %v3004_v11 }
  0xd9   : > { %1549 = vmatprep.mubr.bf16.mxu1 %v585_v34 }
  0xde   : > { %1453 = vmatmul.mubr.bf16.gmra.mxu0 %v3016_v22 }
  0xdf   : > { %2379 = vmatprep.mubr.bf16.mxu0 %v2840_v28  ;;  %v3117_v28 = vld [vmem:[%s3280_s2] ss:$0 sm:$0xff] }
  0xe0   : > { %1550 = vmatmul.mubr.bf16.gmra.mxu1 %v584_v31 }
  0xe1   : > { %2387 = vmatprep.mubr.bf16.mxu1 %v2993_v63 }
  0xe6   : > { %2380 = vmatmul.mubr.bf16.vlgmr.msra.gmra.mxu0 %v2879_v48 }
  0xe7   : > { %2383 = vmatprep.mubr.bf16.mxu0 %v2918_v14 }
  0xe8   : > { %2388 = vmatmul.mubr.bf16.vlgmr.msra.gmra.mxu1 %v3042_v39 }
  0xe9   : > { %2391 = vmatprep.mubr.bf16.mxu1 %v3018_v23 }
  0xee   : > { %2384 = vmatmul.mubr.bf16.gmra.mxu0 %v2961_v40 }
  0xf0   : > { %2392 = vmatmul.mubr.bf16.gmra.mxu1 %v586_v38 }
 0x126   : > { %v2107_v45 = vpop.f32.mrf.mxu0 }
 0x127   : > { %v2171_v56 = vpop.f32.mrf.mxu1 }
 0x128   : > { %v2108_v48 = vpop.f32.mrf.mxu0 }
 0x129   : > { %v2109_v10 = vadd.f32 %v2108_v48, %v2107_v45  ;;  %v2172_v14 = vpop.f32.mrf.mxu1 }
 0x12a   : > { %v2110_v19 = vpop.f32.mrf.mxu0  ;;  %v2173_v42 = vadd.f32 %v2172_v14, %v2171_v56 }
 0x12b   : > { %v1205_v37 = vadd.f32 %v2109_v10, %v3117_v28  ;;  %v2174_v43 = vpop.f32.mrf.mxu1 }
 0x12c   : > { %v2111_v40 = vpop.f32.mrf.mxu0 }
 0x12d   : > { %v3120_v44 = vadd.f32 %v2173_v42, %v1205_v37  ;;  %v2112_v46 = vadd.f32 %v2111_v40, %v2110_v19  ;;  %v2175_v47 = vpop.f32.mrf.mxu1 }
 0x12e   : > { %v2113_v49 = vpop.f32.mrf.mxu0  ;;  %v2176_v51 = vadd.f32 %v2175_v47, %v2174_v43 }
 0x12f   : > { %v1208_v50 = vadd.f32 %v2112_v46, %v3117_v28  ;;  %v2177_v52 = vpop.f32.mrf.mxu1 }
 0x130   : > { %v2114_v54 = vpop.f32.mrf.mxu0 }
 0x131   : > { %v3123_v57 = vadd.f32 %v2176_v51, %v1208_v50  ;;  %v2115_v58 = vadd.f32 %v2114_v54, %v2113_v49  ;;  %v2178_v59 = vpop.f32.mrf.mxu1 }
 0x132   : > { %v2116_v60 = vpop.f32.mrf.mxu0  ;;  %v2179_v62 = vadd.f32 %v2178_v59, %v2177_v52 }
 0x133   : > { %v1213_v61 = vadd.f32 %v2115_v58, %v3117_v28  ;;  %v2180_v63 = vpop.f32.mrf.mxu1 }
 0x134   : > { %v2117_v0 = vpop.f32.mrf.mxu0 }
 0x135   : > { %v3126_v2 = vadd.f32 %v2179_v62, %v1213_v61  ;;  %v2118_v3 = vadd.f32 %v2117_v0, %v2116_v60  ;;  %v2181_v4 = vpop.f32.mrf.mxu1 }
 0x136   : > { %v2119_v5 = vpop.f32.mrf.mxu0  ;;  %v2182_v8 = vadd.f32 %v2181_v4, %v2180_v63 }
 0x137   : > { %v1216_v6 = vadd.f32 %v2118_v3, %v3117_v28  ;;  %v2183_v9 = vpop.f32.mrf.mxu1 }
 0x138   : > { %v2120_v11 = vpop.f32.mrf.mxu0 }
 0x139   : > { %v3129_v13 = vadd.f32 %v2182_v8, %v1216_v6  ;;  %v2121_v15 = vadd.f32 %v2120_v11, %v2119_v5  ;;  %v2184_v16 = vpop.f32.mrf.mxu1 }
 0x13a   : > { %v2122_v17 = vpop.f32.mrf.mxu0  ;;  %v2185_v20 = vadd.f32 %v2184_v16, %v2183_v9 }
 0x13b   : > { %v1221_v18 = vadd.f32 %v2121_v15, %v3117_v28  ;;  %v2186_v21 = vpop.f32.mrf.mxu1 }
 0x13c   : > { %v2123_v22 = vpop.f32.mrf.mxu0 }
 0x13d   : > { %v3132_v23 = vadd.f32 %v2185_v20, %v1221_v18  ;;  %v2124_v24 = vadd.f32 %v2123_v22, %v2122_v17  ;;  %v2187_v25 = vpop.f32.mrf.mxu1 }
 0x13e   : > { %v2125_v26 = vpop.f32.mrf.mxu0  ;;  %v2188_v29 = vadd.f32 %v2187_v25, %v2186_v21 }
 0x13f   : > { %v1224_v27 = vadd.f32 %v2124_v24, %v3117_v28  ;;  %v2189_v32 = vpop.f32.mrf.mxu1 }
 0x140   : > { %v2126_v33 = vpop.f32.mrf.mxu0 }
 0x141   : > { %v3135_v34 = vadd.f32 %v2188_v29, %v1224_v27  ;;  %v2127_v35 = vadd.f32 %v2126_v33, %v2125_v26  ;;  %v2190_v36 = vpop.f32.mrf.mxu1 }
 0x142   : > { %v2128_v38 = vpop.f32.mrf.mxu0  ;;  %v2191_v41 = vadd.f32 %v2190_v36, %v2189_v32 }
 0x143   : > { %v1229_v39 = vadd.f32 %v2127_v35, %v3117_v28  ;;  %v2192_v1 = vpop.f32.mrf.mxu1 }
 0x144   : > { %v2129_v55 = vpop.f32.mrf.mxu0 }
 0x145   : > { %v3138_v53 = vadd.f32 %v2191_v41, %v1229_v39  ;;  %v2130_v12 = vadd.f32 %v2129_v55, %v2128_v38  ;;  %v2193_v7 = vpop.f32.mrf.mxu1 }
 0x146   : > { %v2131_v30 = vpop.f32.mrf.mxu0  ;;  %v2194_v45 = vadd.f32 %v2193_v7, %v2192_v1 }
 0x147   : > { %v1232_v31 = vadd.f32 %v2130_v12, %v3117_v28  ;;  %v2195_v56 = vpop.f32.mrf.mxu1 }
 0x148   : > { %v2132_v48 = vpop.f32.mrf.mxu0 }
 0x149   : > { %v3141_v10 = vadd.f32 %v2194_v45, %v1232_v31  ;;  %v2133_v14 = vadd.f32 %v2132_v48, %v2131_v30  ;;  %v2196_v19 = vpop.f32.mrf.mxu1 }
 0x14a   : > { %v2134_v37 = vpop.f32.mrf.mxu0  ;;  %v2197_v43 = vadd.f32 %v2196_v19, %v2195_v56 }
 0x14b   : > { %v1237_v42 = vadd.f32 %v2133_v14, %v3117_v28  ;;  %v2198_v40 = vpop.f32.mrf.mxu1 }
 0x14c   : > { %v2135_v46 = vpop.f32.mrf.mxu0 }
 0x14d   : > { %v3144_v47 = vadd.f32 %v2197_v43, %v1237_v42  ;;  %v2136_v49 = vadd.f32 %v2135_v46, %v2134_v37  ;;  %v2199_v50 = vpop.f32.mrf.mxu1 }
 0x14e   : > { %v2137_v51 = vpop.f32.mrf.mxu0  ;;  %v2200_v54 = vadd.f32 %v2199_v50, %v2198_v40 }
 0x14f   : > { %v1240_v52 = vadd.f32 %v2136_v49, %v3117_v28  ;;  %v2201_v58 = vpop.f32.mrf.mxu1 }
 0x150   : > { %v2138_v59 = vpop.f32.mrf.mxu0 }
 0x151   : > { %v3147_v60 = vadd.f32 %v2200_v54, %v1240_v52  ;;  %v2139_v61 = vadd.f32 %v2138_v59, %v2137_v51  ;;  %v2202_v62 = vpop.f32.mrf.mxu1 }
 0x152   : > { %v2140_v63 = vpop.f32.mrf.mxu0  ;;  %v2203_v3 = vadd.f32 %v2202_v62, %v2201_v58 }
 0x153   : > { %3282 = vst [vmem:[#allocation3_spill] sm:$0xff] %v3147_v60  ;;  %v1245_v0 = vadd.f32 %v2139_v61, %v3117_v28  ;;  %v2204_v4 = vpop.f32.mrf.mxu1 }
 0x154   : > { %v2141_v5 = vpop.f32.mrf.mxu0 }
 0x155   : > { %v3150_v6 = vadd.f32 %v2203_v3, %v1245_v0  ;;  %v2142_v8 = vadd.f32 %v2141_v5, %v2140_v63  ;;  %v2205_v9 = vpop.f32.mrf.mxu1 }
 0x156   : > { %v2143_v11 = vpop.f32.mrf.mxu0  ;;  %v2206_v16 = vadd.f32 %v2205_v9, %v2204_v4 }
 0x157   : > { %v1248_v15 = vadd.f32 %v2142_v8, %v3117_v28  ;;  %v2207_v17 = vpop.f32.mrf.mxu1 }
 0x158   : > { %v2144_v18 = vpop.f32.mrf.mxu0 }
 0x159   : > { %v3153_v20 = vadd.f32 %v2206_v16, %v1248_v15  ;;  %v2145_v21 = vadd.f32 %v2144_v18, %v2143_v11  ;;  %v2208_v22 = vpop.f32.mrf.mxu1 }
 0x15a   : > { %v2146_v24 = vpop.f32.mrf.mxu0  ;;  %v2209_v26 = vadd.f32 %v2208_v22, %v2207_v17 }
 0x15b   : > { %3283 = vst [vmem:[#allocation4_spill] sm:$0xff] %v3153_v20  ;;  %v1253_v25 = vadd.f32 %v2145_v21, %v3117_v28  ;;  %v2210_v27 = vpop.f32.mrf.mxu1 }
 0x15c   : > { %v2147_v29 = vpop.f32.mrf.mxu0 }
 0x15d   : > { %v3156_v32 = vadd.f32 %v2209_v26, %v1253_v25  ;;  %v2148_v33 = vadd.f32 %v2147_v29, %v2146_v24  ;;  %v2211_v35 = vpop.f32.mrf.mxu1 }
 0x15e   : > { %v2149_v36 = vpop.f32.mrf.mxu0  ;;  %v2212_v39 = vadd.f32 %v2211_v35, %v2210_v27 }
 0x15f   : > { %3284 = vst [vmem:[#allocation5_spill] sm:$0xff] %v3156_v32  ;;  %v1256_v38 = vadd.f32 %v2148_v33, %v3117_v28  ;;  %v2213_v41 = vpop.f32.mrf.mxu1 }
 0x160   : > { %v2150_v1 = vpop.f32.mrf.mxu0 }
 0x161   : > { %v3159_v55 = vadd.f32 %v2212_v39, %v1256_v38  ;;  %v2151_v12 = vadd.f32 %v2150_v1, %v2149_v36  ;;  %v2214_v7 = vpop.f32.mrf.mxu1 }
 0x162   : > { %v2152_v30 = vpop.f32.mrf.mxu0  ;;  %v2215_v45 = vadd.f32 %v2214_v7, %v2213_v41 }
 0x163   : > { %3285 = vst [vmem:[#allocation6_spill] sm:$0xff] %v3159_v55  ;;  %v1261_v31 = vadd.f32 %v2151_v12, %v3117_v28  ;;  %v2216_v56 = vpop.f32.mrf.mxu1 }
 0x164   : > { %v2153_v48 = vpop.f32.mrf.mxu0 }
 0x165   : > { %v3162_v14 = vadd.f32 %v2215_v45, %v1261_v31  ;;  %v2154_v19 = vadd.f32 %v2153_v48, %v2152_v30  ;;  %v2217_v37 = vpop.f32.mrf.mxu1 }
 0x166   : > { %v2235_v42 = vpop.f32.mrf.mxu0  ;;  %v2218_v40 = vadd.f32 %v2217_v37, %v2216_v56 }
 0x167   : > { %3286 = vst [vmem:[#allocation7_spill] sm:$0xff] %v3162_v14  ;;  %v1264_v43 = vadd.f32 %v2154_v19, %v3117_v28 }
 0x168   : > { %v2299_v46 = vpop.f32.mrf.mxu1  ;;  %v2236_v49 = vpop.f32.mrf.mxu0 }
 0x169   : > { %v3165_v50 = vadd.f32 %v2218_v40, %v1264_v43  ;;  %v2237_v51 = vadd.f32 %v2236_v49, %v2235_v42 }
 0x16a   : > { %v2300_v52 = vpop.f32.mrf.mxu1  ;;  %v2238_v54 = vpop.f32.mrf.mxu0 }
 0x16b   : > { %3287 = vst [vmem:[#allocation8_spill] sm:$0xff] %v3165_v50  ;;  %v1399_v58 = vadd.f32 %v2237_v51, %v3120_v44  ;;  %v2301_v59 = vadd.f32 %v2300_v52, %v2299_v46 }
 0x16c   : > { %v3168_v61 = vpop.f32.mrf.mxu1  ;;  %v2239_v62 = vpop.f32.mrf.mxu0 }
 0x16d   : > { %v3170_v63 = vadd.f32 %v2301_v59, %v1399_v58  ;;  %v2240_v50 = vadd.f32 %v2239_v62, %v2238_v54 }
 0x16e   : > { %v3172_v0 = vpop.f32.mrf.mxu1  ;;  %v2241_v3 = vpop.f32.mrf.mxu0 }
 0x16f   : > { %3288 = vst [vmem:[#allocation9_spill] sm:$0xff] %v3170_v63  ;;  %v1402_v20 = vadd.f32 %v2240_v50, %v3123_v57 }
 0x170   : > { %v3174_v28 = vpop.f32.mrf.mxu1  ;;  %v2242_v4 = vpop.f32.mrf.mxu0 }
 0x171   : > { %v2243_v14 = vadd.f32 %v2242_v4, %v2241_v3 }
 0x172   : > { %v2306_v5 = vpop.f32.mrf.mxu1  ;;  %v2244_v8 = vpop.f32.mrf.mxu0 }
 0x174   : > { %v2308_v9 = vpop.f32.mrf.mxu1  ;;  %v2245_v11 = vpop.f32.mrf.mxu0 }
 0x175   : > { %v2246_v32 = vadd.f32 %v2245_v11, %v2244_v8  ;;  %v2304_v11 = vadd.f32 %v3172_v0, %v3168_v61 }
 0x176   : > { %v2309_v15 = vpop.f32.mrf.mxu1  ;;  %v2247_v16 = vpop.f32.mrf.mxu0 }
 0x177   : > { %v1410_v60 = vadd.f32 %v2246_v32, %v3129_v13 }
 0x178   : > { %v2311_v17 = vpop.f32.mrf.mxu1  ;;  %v2248_v44 = vpop.f32.mrf.mxu0 }
 0x17a   : > { %v2312_v18 = vpop.f32.mrf.mxu1  ;;  %v2250_v21 = vpop.f32.mrf.mxu0 }
 0x17c   : > { %v3176_v22 = vpop.f32.mrf.mxu1  ;;  %v2251_v24 = vpop.f32.mrf.mxu0 }
 0x17d   : > { %v2252_v3 = vadd.f32 %v2251_v24, %v2250_v21  ;;  %v1499_v24 = vadd.f32 %v2304_v11, %v1402_v20 }
 0x17e   : > { %v3178_v25 = vpop.f32.mrf.mxu1  ;;  %v2253_v26 = vpop.f32.mrf.mxu0 }
 0x180   : > { %v3180_v27 = vpop.f32.mrf.mxu1  ;;  %v2254_v29 = vpop.f32.mrf.mxu0 }
 0x181   : > { %v2255_v4 = vadd.f32 %v2254_v29, %v2253_v26  ;;  %v3219_v26 = vadd.f32 %v2252_v3, %v3135_v34  ;;  %v3305_v3 = vld [vmem:[#allocation5_spill] sm:$0xff] }
 0x182   : > { %v3182_v33 = vpop.f32.mrf.mxu1  ;;  %v2256_v35 = vpop.f32.mrf.mxu0 }
 0x183   : > { %v1423_v61 = vadd.f32 %v2255_v4, %v3138_v53  ;;  %v3298_v53 = vld [vmem:[#allocation3_spill] sm:$0xff] }
 0x184   : > { %v3184_v36 = vpop.f32.mrf.mxu1  ;;  %v2257_v38 = vpop.f32.mrf.mxu0 }
 0x185   : > { %v2258_v8 = vadd.f32 %v2257_v38, %v2256_v35 }
 0x186   : > { %v3186_v39 = vpop.f32.mrf.mxu1  ;;  %v2259_v41 = vpop.f32.mrf.mxu0 }
 0x187   : > { %3289 = vst [vmem:[#allocation10_spill] sm:$0xff] %v3186_v39  ;;  %v1426_v0 = vadd.f32 %v2258_v8, %v3141_v10  ;;  %v3299_v10 = vld [vmem:[#allocation4_spill] sm:$0xff] }
 0x188   : > { %v3188_v1 = vpop.f32.mrf.mxu1  ;;  %v2260_v12 = vpop.f32.mrf.mxu0 }
 0x189   : > { %3290 = vst [vmem:[#allocation11_spill] sm:$0xff] %v3188_v1  ;;  %v2261_v57 = vadd.f32 %v2260_v12, %v2259_v41 }
 0x18a   : > { %v3190_v7 = vpop.f32.mrf.mxu1  ;;  %v2262_v30 = vpop.f32.mrf.mxu0 }
 0x18b   : > { %3291 = vst [vmem:[#allocation12_spill] sm:$0xff] %v3190_v7 }
 0x18c   : > { %v3192_v31 = vpop.f32.mrf.mxu1  ;;  %v2263_v45 = vpop.f32.mrf.mxu0 }
 0x18d   : > { %3292 = vst [vmem:[#allocation13_spill] sm:$0xff] %v3192_v31  ;;  %v2249_v31 = vadd.f32 %v2248_v44, %v2247_v16  ;;  %v2307_v16 = vadd.f32 %v2306_v5, %v3174_v28  ;;  %v2310_v44 = vadd.f32 %v2309_v15, %v2308_v9  ;;  %v2264_v13 = vadd.f32 %v2263_v45, %v2262_v30 }
 0x18e   : > { %v3194_v56 = vpop.f32.mrf.mxu1  ;;  %v2265_v48 = vpop.f32.mrf.mxu0  ;;  %v3227_v5 = vadd.f32 %v3178_v25, %v3176_v22  ;;  %v1431_v9 = vadd.f32 %v2261_v57, %v3144_v47  ;;  %v3297_v34 = vld [vmem:[#allocation10_spill] sm:$0xff] }
 0x18f   : > { %3293 = vst [vmem:[#allocation14_spill] sm:$0xff] %v3194_v56  ;;  %v1415_v62 = vadd.f32 %v2249_v31, %v3132_v23  ;;  %v1507_v21 = vadd.f32 %v2310_v44, %v1410_v60 }
 0x190   : > { %v2329_v19 = vpop.f32.mrf.mxu1  ;;  %v2266_v37 = vpop.f32.mrf.mxu0  ;;  %v3300_v38 = vld [vmem:[#allocation11_spill] sm:$0xff] }
 0x192   : > { %v2330_v42 = vpop.f32.mrf.mxu1  ;;  %v2268_v43 = vpop.f32.mrf.mxu0  ;;  %v3301_v41 = vld [vmem:[#allocation12_spill] sm:$0xff] }
 0x193   : > { %v2331_v60 = vadd.f32 %v2330_v42, %v2329_v19  ;;  %v2325_v22 = vadd.f32 %v3301_v41, %v3300_v38 }
 0x194   : > { %v2332_v40 = vpop.f32.mrf.mxu1  ;;  %v2269_v46 = vpop.f32.mrf.mxu0  ;;  %v3302_v47 = vld [vmem:[#allocation13_spill] sm:$0xff] }
 0x195   : > { %v2270_v32 = vadd.f32 %v2269_v46, %v2268_v43 }
 0x196   : > { %v2333_v49 = vpop.f32.mrf.mxu1  ;;  %v2271_v51 = vpop.f32.mrf.mxu0  ;;  %v3303_v31 = vld [vmem:[#allocation14_spill] sm:$0xff] }
 0x197   : > { %v1442_v29 = vadd.f32 %v2270_v32, %v3299_v10  ;;  %v2328_v45 = vadd.f32 %v3303_v31, %v3302_v47  ;;  %v2334_v19 = vadd.f32 %v2333_v49, %v2332_v40  ;;  %v3308_v49 = vld [vmem:[#allocation7_spill] sm:$0xff] }
 0x198   : > { %v3196_v52 = vpop.f32.mrf.mxu1  ;;  %v2272_v58 = vpop.f32.mrf.mxu0 }
 0x199   : > { %3294 = vst [vmem:[#allocation15_spill] sm:$0xff] %v3196_v52  ;;  %v1407_v52 = vadd.f32 %v2243_v14, %v3126_v2  ;;  %v2313_v14 = vadd.f32 %v2312_v18, %v2311_v17  ;;  %v2322_v17 = vadd.f32 %v3297_v34, %v3184_v36  ;;  %v1434_v18 = vadd.f32 %v2264_v13, %v3298_v53  ;;  %v3310_v53 = vld [vmem:[#allocation6_spill] sm:$0xff] }
 0x19a   : > { %v3198_v59 = vpop.f32.mrf.mxu1  ;;  %v3200_v55 = vpop.f32.mrf.mxu0  ;;  %v2273_v35 = vadd.f32 %v2272_v58, %v2271_v51 }
 0x19b   : > { %3295 = vst [vmem:[#allocation16_spill] sm:$0xff] %v3198_v59  ;;  %v2267_v59 = vadd.f32 %v2266_v37, %v2265_v48  ;;  %v1504_v23 = vadd.f32 %v2307_v16, %v1407_v52  ;;  %v3223_v28 = vadd.f32 %v2313_v14, %v1415_v62  ;;  %v1523_v43 = vadd.f32 %v2322_v17, %v1426_v0  ;;  %v3304_v52 = vld [vmem:[#allocation9_spill] sm:$0xff] }
 0x19c   : > { %v3202_v63 = vpop.f32.mrf.mxu1  ;;  %v3204_v56 = vpop.f32.mrf.mxu0  ;;  %v1528_v62 = vadd.f32 %v2325_v22, %v1431_v9  ;;  %v1447_v4 = vadd.f32 %v2273_v35, %v3305_v3  ;;  %v1531_v8 = vadd.f32 %v2328_v45, %v1434_v18 }
 0x19d   : > { %v1439_v48 = vadd.f32 %v2267_v59, %v3150_v6  ;;  %v2319_v6 = vadd.f32 %v3182_v33, %v3180_v27  ;;  %v2276_v40 = vadd.f32 %v3204_v56, %v3200_v55 }
 0x19e   : > { %v3206_v7 = vpop.f32.mrf.mxu1  ;;  %v2277_v1 = vpop.f32.mrf.mxu0 }
 0x19f   : > { %3296 = vst [vmem:[#allocation17_spill] sm:$0xff] %v3206_v7  ;;  %v1536_v30 = vadd.f32 %v2331_v60, %v1439_v48  ;;  %v1520_v42 = vadd.f32 %v2319_v6, %v1423_v61  ;;  %v1450_v18 = vadd.f32 %v2276_v40, %v3310_v53 }
 0x1a0   : > { %v3211_v39 = vpop.f32.mrf.mxu1  ;;  %v2278_v54 = vpop.f32.mrf.mxu0  ;;  %v3306_v11 = vld [vmem:[#allocation15_spill] sm:$0xff] }
 0x1a1   : > { %v2279_v25 = vadd.f32 %v2278_v54, %v2277_v1  ;;  %v1539_v54 = vadd.f32 %v2334_v19, %v1442_v29 }
 0x1a2   : > { %v2342_v50 = vpop.f32.mrf.mxu1  ;;  %v2280_v2 = vpop.f32.mrf.mxu0  ;;  %v3307_v16 = vld [vmem:[#allocation16_spill] sm:$0xff] }
 0x1a3   : > { %v2337_v44 = vadd.f32 %v3307_v16, %v3306_v11  ;;  %v1455_v57 = vadd.f32 %v2279_v25, %v3308_v49  ;;  %v2343_v61 = vadd.f32 %v2342_v50, %v3211_v39 }
 0x1a4   : > { %v2344_v37 = vpop.f32.mrf.mxu1  ;;  %v2281_v7 = vpop.f32.mrf.mxu0 }
 0x1a5   : > { %v2282_v36 = vadd.f32 %v2281_v7, %v2280_v2  ;;  %v1544_v31 = vadd.f32 %v2337_v44, %v1447_v4 }
 0x1a6   : > { %v2345_v20 = vpop.f32.mrf.mxu1  ;;  %v2381_v15 = vpop.f32.mrf.mxu0  ;;  %v3311_v25 = vld [vmem:[#allocation17_spill] sm:$0xff] }
 0x1a7   : > { %v1601_v12 = vadd.f32 %v2381_v15, %v1504_v23  ;;  %v2346_v10 = vadd.f32 %v2345_v20, %v2344_v37  ;;  %v1515_v20 = vadd.f32 %v3227_v5, %v3219_v26 }
 0x1a8   : > { %v2389_v27 = vpop.f32.mrf.mxu1  ;;  %v1592_v33 = vpop.f32.mrf.mxu0 }
 0x1a9   : > { %v1633_v46 = vadd.f32 %v2389_v27, %v1536_v30  ;;  %v1593_v59 = vadd.f32 %v1592_v33, %v3304_v52  ;;  %v1657_v7 = vmax.f32 %v1601_v12, 0.0  ;;  %v2340_v12 = vadd.f32 %v3311_v25, %v3202_v63 }
 0x1aa   : > { %v1624_v51 = vpop.f32.mrf.mxu1  ;;  %v2382_v58 = vpop.f32.mrf.mxu0 }
 0x1ab   : > { %v1604_v1 = vadd.f32 %v2382_v58, %v1507_v21  ;;  %v1625_v13 = vadd.f32 %v1624_v51, %v1528_v62  ;;  %v3309_v21 = vld [vmem:[#allocation8_spill] sm:$0xff]  ;;  %v1665_v6 = vmax.f32 %v1633_v46, 0.0  ;;  %v1655_v9 = vmax.f32 %v1593_v59, 0.0 }
 0x1ac   : > { %v2390_v2 = vpop.f32.mrf.mxu1  ;;  %v1595_v14 = vpop.f32.mrf.mxu0  ;;  %v1458_v0 = vadd.f32 %v2282_v36, %v3309_v21  ;;  %v1547_v63 = vadd.f32 %v2340_v12, %v1450_v18 }
 0x1ad   : > { %v1658_v32 = vmax.f32 %v1604_v1, 0.0  ;;  %v1636_v48 = vadd.f32 %v2390_v2, %v1539_v54  ;;  %v1596_v23 = vadd.f32 %v1595_v14, %v1499_v24  ;;  %v1552_v24 = vadd.f32 %v2343_v61, %v1455_v57 }
 0x1ae   : > { %v1627_v60 = vpop.f32.mrf.mxu1  ;;  %v2385_v15 = vpop.f32.mrf.mxu0  ;;  %v1663_v50 = vmax.f32 %v1625_v13, 0.0  ;;  %v1555_v19 = vadd.f32 %v2346_v10, %v1458_v0 }
 0x1af   : > { %v2037_v34 = vpack.c.bf16 %v1658_v32, %v1657_v7  ;;  %v1666_v55 = vmax.f32 %v1636_v48, 0.0  ;;  %v1656_v56 = vmax.f32 %v1596_v23, 0.0  ;;  %v1628_v17 = vadd.f32 %v1627_v60, %v1531_v8 }
 0x1b0   : > { %v1617_v29 = vadd.f32 %v2385_v15, %v1520_v42  ;;  %v2393_v35 = vpop.f32.mrf.mxu1  ;;  %v1608_v39 = vpop.f32.mrf.mxu0 }
 0x1b1   : > { %2084 = vst [vmem:[%s2626_s30 + $0x8] sm:$0xff] %v2037_v34   ;;  %v2057_v38 = vpack.c.bf16 %v1666_v55, %v1665_v6  ;;  %v2032_v41 = vpack.c.bf16 %v1656_v56, %v1655_v9  ;;  %v1664_v22 = vmax.f32 %v1628_v17, 0.0  ;;  %v1649_v30 = vadd.f32 %v2393_v35, %v1552_v24 }
 0x1b2   : > { %v1609_v27 = vadd.f32 %v1608_v39, %v3223_v28  ;;  %v1640_v33 = vpop.f32.mrf.mxu1  ;;  %v2386_v37 = vpop.f32.mrf.mxu0  ;;  %v1661_v42 = vmax.f32 %v1617_v29, 0.0 }
 0x1b3   : > { %2088 = vst [vmem:[%s2626_s30 + $0x28] sm:$0xff] %v2057_v38   ;;  %2033 = vst [vmem:[%s2626_s30] sm:$0xff] %v2032_v41   ;;  %v2052_v47 = vpack.c.bf16 %v1664_v22, %v1663_v50  ;;  %v1620_v45 = vadd.f32 %v2386_v37, %v1523_v43  ;;  %v1641_v52 = vadd.f32 %v1640_v33, %v1544_v31  ;;  %v1669_v26 = vmax.f32 %v1649_v30, 0.0 }
 0x1b4   : > { %v2394_v36 = vpop.f32.mrf.mxu1  ;;  %v1611_v46 = vpop.f32.mrf.mxu0  ;;  %v1659_v5 = vmax.f32 %v1609_v27, 0.0 }
 0x1b5   : > { %2087 = vst [vmem:[%s2626_s30 + $0x20] sm:$0xff] %v2052_v47   ;;  %v1662_v28 = vmax.f32 %v1620_v45, 0.0  ;;  %v1652_v59 = vadd.f32 %v2394_v36, %v1555_v19  ;;  %v1612_v62 = vadd.f32 %v1611_v46, %v1515_v20  ;;  %v1667_v1 = vmax.f32 %v1641_v52, 0.0 }
 0x1b6   : > { %v1643_v51 = vpop.f32.mrf.mxu1 }
 0x1b7   : > { %v2047_v58 = vpack.c.bf16 %v1662_v28, %v1661_v42  ;;  %v1670_v3 = vmax.f32 %v1652_v59, 0.0  ;;  %v1660_v43 = vmax.f32 %v1612_v62, 0.0  ;;  %v1644_v4 = vadd.f32 %v1643_v51, %v1547_v63 }
 0x1b9   : > { %2086 = vst [vmem:[%s2626_s30 + $0x18] sm:$0xff] %v2047_v58   ;;  %v2067_v54 = vpack.c.bf16 %v1670_v3, %v1669_v26  ;;  %v2042_v8 = vpack.c.bf16 %v1660_v43, %v1659_v5  ;;  %v1668_v11 = vmax.f32 %v1644_v4, 0.0 }
 0x1bb   : > { %2090 = vst [vmem:[%s2626_s30 + $0x38] sm:$0xff] %v2067_v54   ;;  %2085 = vst [vmem:[%s2626_s30 + $0x10] sm:$0xff] %v2042_v8   ;;  %v2062_v16 = vpack.c.bf16 %v1668_v11, %v1667_v1 }
 0x1bd   : > { %2089 = vst [vmem:[%s2626_s30 + $0x30] sm:$0xff] %v2062_v16  }
 0x1be PF: > { %s13_s16 = sadd.s32 1, %s2562_s16   ;;  %s3312_s12 = smov %s2554_s14 }
 0x1bf   : > { %p10_p8 = scmp.ge.s32.totalorder %s13_s16, 6   ;;  %s3313_s13 = smov %s2558_s15 }
 0x1c0   : > { %s3314_s14 = smov %s3317_s17  ;;  %s3315_s15 = smov %s3321_s18 }
 0x1c1   :  { %12 = sbr.rel (!%p10_p8) target bundleno = 3 (0x3), region = 68 }

</bundles_post_ra>
